<compile_context>
chip_gen: v7x
topology: tpu7x:2x2x1
jax: 0.10.0
libtpu: 0.0.40
codegen_flags: <defaults>
</compile_context>

<pallas_src>
import jax
import jax.numpy as jnp
from jax.experimental import pallas as pl
from jax.experimental.pallas import tpu as pltpu


def illumination_estimator_kernel(img_ref, w1_ref, b1_ref, wd_ref, bd_ref,
                                  wcat_ref, bcat_ref, fea_ref, map_ref):
    """One (batch, H-tile) per grid step.

    img_ref  : (1, 1, TH+4, W, 3)  image tile incl. 2-row top/bottom halo
    w1_ref   : (3, C)              conv1 weight with mean channel folded in
    b1_ref   : (1, C)
    wd_ref   : (25, C)             depthwise 5x5 weights, tap-major (dy*5+dx)
    bd_ref   : (1, C)
    wcat_ref : (C, C+3)            [pointwise.W | pointwise.W @ conv2.W]
    bcat_ref : (1, C+3)            [pointwise.b | pointwise.b @ conv2.W + conv2.b]
    fea_ref  : (1, TH, W, C)       illu_fea output tile
    map_ref  : (1, TH, W, 3)       illu_map output tile
    """
    h = pl.program_id(1)
    n_h = pl.num_programs(1)

    img = img_ref[0, 0]                       # (TH+4, W, 3)
    THp, W, Cimg = img.shape
    TH = THp - 4
    C = w1_ref.shape[1]
    Ctot = wcat_ref.shape[1]
    Cout = Ctot - C

    # conv1 (1x1), mean channel already folded into w1: one small MXU matmul.
    x1 = (jnp.dot(img.reshape(THp * W, Cimg), w1_ref[...],
                  preferred_element_type=jnp.float32)
          + b1_ref[...]).reshape(THp, W, C)

    # Vertical zero-padding of x1 at the image borders (depthwise padding=2):
    # zero the halo rows that fall outside the image.
    row = jax.lax.broadcasted_iota(jnp.int32, (THp, 1, 1), 0)
    top = jnp.where(h == 0, 2, 0)
    bot = jnp.where(h == n_h - 1, TH + 2, THp)
    x1 = jnp.where((row >= top) & (row < bot), x1, 0.0)

    # Depthwise 5x5 conv: horizontal taps via 5 aligned circular rolls along W
    # (XLU) with boundary-column masks; vertical taps are free outer-dim
    # slices.  25 VPU multiply-accumulates total.
    wd_all = wd_ref[...]                      # (25, C)
    col = jax.lax.broadcasted_iota(jnp.int32, (1, W, 1), 1)
    acc = jnp.zeros((TH, W, C), jnp.float32)
    for dx in range(5):
        if dx == 2:
            shifted = x1
        else:
            shifted = pltpu.roll(x1, shift=(2 - dx) % W, axis=1)
            lo = max(0, 2 - dx)              # columns wrapped from the left
            hi = W + min(0, 2 - dx)          # columns wrapped from the right
            shifted = jnp.where((col >= lo) & (col < hi), shifted, 0.0)
        for dy in range(5):
            acc = acc + shifted[dy:dy + TH, :, :] * wd_all[dy * 5 + dx]
    dw = acc + bd_ref[...]                    # (TH, W, C)

    # Fused pointwise(1x1) + conv2(1x1): a single (TH*W, C) @ (C, C+3) matmul.
    res = (jnp.dot(dw.reshape(TH * W, C), wcat_ref[...],
                   preferred_element_type=jnp.float32) + bcat_ref[...])
    fea_ref[0] = res[:, :C].reshape(TH, W, C)
    map_ref[0] = res[:, C:].reshape(TH, W, Cout)


def illumination_estimator(img_nhwc, params, tile_h=8):
    """img_nhwc: (B, H, W, 3) float32.  Returns (illu_fea, illu_map) in NHWC."""
    w1, b1, wd, bd, wp, bp, w2, b2 = params
    B, H, W, Cimg = img_nhwc.shape
    C = w1.shape[1]
    Cout = w2.shape[1]

    TH = min(tile_h, H)
    assert H % TH == 0, "H must be divisible by the H-tile size"
    assert W % 8 == 0, "W must be a multiple of 8 (sublane alignment)"
    n_h = H // TH
    THp = TH + 4

    # --- algebraic weight folds (done once in the wrapper) -----------------
    # mean over the Cimg image channels folded into conv1's weight:
    w1_eff = w1[:Cimg] + w1[Cimg:Cimg + 1] / float(Cimg)         # (Cimg, C)
    # pointwise + conv2 fused into one matmul:
    wcat = jnp.concatenate([wp, wp @ w2], axis=1)                # (C, C+Cout)
    bcat = jnp.concatenate([bp, bp @ w2 + b2], axis=1)           # (1, C+Cout)

    # --- overlapping H-tiles with a 2-row halo for the depthwise 5x5 -------
    img_pad = jnp.pad(img_nhwc, ((0, 0), (2, 2), (0, 0), (0, 0)))
    rows = jnp.arange(n_h)[:, None] * TH + jnp.arange(THp)[None, :]
    img_tiles = img_pad[:, rows]                                 # (B,n_h,THp,W,Cimg)

    fea, imap = pl.pallas_call(
        illumination_estimator_kernel,
        out_shape=(jax.ShapeDtypeStruct((B, H, W, C), jnp.float32),
                   jax.ShapeDtypeStruct((B, H, W, Cout), jnp.float32)),
        grid_spec=pltpu.PrefetchScalarGridSpec(
            num_scalar_prefetch=0,
            grid=(B, n_h),
            in_specs=[
                pl.BlockSpec((1, 1, THp, W, Cimg), lambda b, h: (b, h, 0, 0, 0)),
                pl.BlockSpec(w1_eff.shape, lambda b, h: (0, 0)),
                pl.BlockSpec(b1.shape, lambda b, h: (0, 0)),
                pl.BlockSpec(wd.shape, lambda b, h: (0, 0)),
                pl.BlockSpec(bd.shape, lambda b, h: (0, 0)),
                pl.BlockSpec(wcat.shape, lambda b, h: (0, 0)),
                pl.BlockSpec(bcat.shape, lambda b, h: (0, 0)),
            ],
            out_specs=[
                pl.BlockSpec((1, TH, W, C), lambda b, h: (b, h, 0, 0)),
                pl.BlockSpec((1, TH, W, Cout), lambda b, h: (b, h, 0, 0)),
            ],
        ),
        compiler_params=pltpu.CompilerParams(
            dimension_semantics=("parallel", "parallel"),
            vmem_limit_bytes=48 * 1024 * 1024),
    )(img_tiles, w1_eff, b1, wd, bd, wcat, bcat)
    return fea, imap


def init_params(key, n_fea_middle=32, n_fea_in=4, n_fea_out=3):
    """Deterministic synthetic weights matching the PyTorch module's shapes
    (stored pre-transposed for the channels-last matmul formulation)."""
    ks = jax.random.split(key, 8)
    C = n_fea_middle
    w1 = jax.random.normal(ks[0], (n_fea_in, C), jnp.float32) * 0.1   # conv1.weight.T
    b1 = jax.random.normal(ks[1], (1, C), jnp.float32) * 0.1
    wd = jax.random.normal(ks[2], (25, C), jnp.float32) * 0.1         # depthwise 5x5
    bd = jax.random.normal(ks[3], (1, C), jnp.float32) * 0.1
    wp = jax.random.normal(ks[4], (C, C), jnp.float32) * 0.1          # pointwise.weight.T
    bp = jax.random.normal(ks[5], (1, C), jnp.float32) * 0.1
    w2 = jax.random.normal(ks[6], (C, n_fea_out), jnp.float32) * 0.1  # conv2.weight.T
    b2 = jax.random.normal(ks[7], (1, n_fea_out), jnp.float32) * 0.1
    return (w1, b1, wd, bd, wp, bp, w2, b2)


def reference_forward(img_nhwc, params):
    """Pure-JAX reference mirroring the PyTorch forward semantics (NHWC),
    using the ORIGINAL (unfused) parameters."""
    w1, b1, wd, bd, wp, bp, w2, b2 = params
    B, H, W, _ = img_nhwc.shape
    C = w1.shape[1]
    mean_c = jnp.mean(img_nhwc, axis=-1, keepdims=True)
    inp = jnp.concatenate([img_nhwc, mean_c], axis=-1)                 # (B,H,W,4)
    x1 = jnp.einsum('bhwi,ic->bhwc', inp, w1) + b1.reshape(1, 1, 1, C)
    xp = jnp.pad(x1, ((0, 0), (2, 2), (2, 2), (0, 0)))
    acc = jnp.zeros_like(x1)
    for dy in range(5):
        for dx in range(5):
            acc = acc + xp[:, dy:dy + H, dx:dx + W, :] * wd[dy * 5 + dx]
    dw = acc + bd.reshape(1, 1, 1, C)
    fea = jnp.einsum('bhwc,cd->bhwd', dw, wp) + bp.reshape(1, 1, 1, C)
    imap = jnp.einsum('bhwc,cd->bhwd', fea, w2) + b2.reshape(1, 1, 1, -1)
    return fea, imap


if __name__ == "__main__":
    key = jax.random.PRNGKey(0)
    k_img, k_par = jax.random.split(key)

    B, H, W = 2, 16, 16
    n_fea_middle = 32

    # PyTorch-convention input (NCHW), transposed to the kernel's NHWC layout.
    img_nchw = jax.random.uniform(k_img, (B, 3, H, W), jnp.float32)
    img_nhwc = jnp.transpose(img_nchw, (0, 2, 3, 1))

    params = init_params(k_par, n_fea_middle=n_fea_middle)

    illu_fea, illu_map = illumination_estimator(img_nhwc, params, tile_h=8)
    jax.block_until_ready((illu_fea, illu_map))

    fea_ref, map_ref = reference_forward(img_nhwc, params)
    assert illu_fea.shape == (B, H, W, n_fea_middle)
    assert illu_map.shape == (B, H, W, 3)
    assert jnp.allclose(illu_fea, fea_ref, rtol=1e-4, atol=1e-4)
    assert jnp.allclose(illu_map, map_ref, rtol=1e-4, atol=1e-4)

    print("KERNEL_OK")
</pallas_src>

<mosaic_0001>
module attributes {stable_mosaic.version = 11 : i64} {
  func.func @illumination_estimator_kernel(%arg0: i32, %arg1: i32, %arg2: memref<1x1x12x16x3xf32, #tpu.memory_space<vmem>>, %arg3: memref<3x32xf32, #tpu.memory_space<vmem>>, %arg4: memref<1x32xf32, #tpu.memory_space<vmem>>, %arg5: memref<25x32xf32, #tpu.memory_space<vmem>>, %arg6: memref<1x32xf32, #tpu.memory_space<vmem>>, %arg7: memref<32x35xf32, #tpu.memory_space<vmem>>, %arg8: memref<1x35xf32, #tpu.memory_space<vmem>>, %arg9: memref<1x8x16x32xf32, #tpu.memory_space<vmem>>, %arg10: memref<1x8x16x3xf32, #tpu.memory_space<vmem>>) attributes {dimension_semantics = [#tpu.dimension_semantics<parallel>, #tpu.dimension_semantics<parallel>], iteration_bounds = array<i64: 2, 2>, scalar_prefetch = 0 : i64, scratch_operands = 0 : i64, tpu.core_type = #tpu.core_type<tc>, window_params = [{transform_indices = @transform_0, window_bounds = array<i64: 1, 1, 12, 16, 3>}, {pipeline_mode = #tpu.pipeline_mode<synchronous>, transform_indices = @transform_1, window_bounds = array<i64: 3, 32>}, {pipeline_mode = #tpu.pipeline_mode<synchronous>, transform_indices = @transform_2, window_bounds = array<i64: 1, 32>}, {pipeline_mode = #tpu.pipeline_mode<synchronous>, transform_indices = @transform_3, window_bounds = array<i64: 25, 32>}, {pipeline_mode = #tpu.pipeline_mode<synchronous>, transform_indices = @transform_4, window_bounds = array<i64: 1, 32>}, {pipeline_mode = #tpu.pipeline_mode<synchronous>, transform_indices = @transform_5, window_bounds = array<i64: 32, 35>}, {pipeline_mode = #tpu.pipeline_mode<synchronous>, transform_indices = @transform_6, window_bounds = array<i64: 1, 35>}, {transform_indices = @transform_7, window_bounds = array<i64: 1, 8, 16, 32>}, {transform_indices = @transform_8, window_bounds = array<i64: 1, 8, 16, 3>}]} {
    %c0 = arith.constant 0 : index
    %c0_0 = arith.constant 0 : index
    %c0_1 = arith.constant 0 : index
    %c0_2 = arith.constant 0 : index
    %c0_3 = arith.constant 0 : index
    %0 = vector.load %arg2[%c0, %c0_0, %c0_1, %c0_2, %c0_3] : memref<1x1x12x16x3xf32, #tpu.memory_space<vmem>>, vector<1x1x12x16x3xf32>
    %1 = vector.shape_cast %0 : vector<1x1x12x16x3xf32> to vector<12x16x3xf32>
    %2 = vector.shape_cast %1 : vector<12x16x3xf32> to vector<192x3xf32>
    %c0_4 = arith.constant 0 : index
    %c0_5 = arith.constant 0 : index
    %3 = vector.load %arg3[%c0_4, %c0_5] : memref<3x32xf32, #tpu.memory_space<vmem>>, vector<3x32xf32>
    %cst = arith.constant dense<0.000000e+00> : vector<192x32xf32>
    %4 = tpu.matmul %2, %3, %cst {dimension_numbers = #tpu.dot_dimension_numbers<[1], [0], [0], [1], [0, 0, 1, 1], [], []>} : vector<192x3xf32>, vector<3x32xf32>, vector<192x32xf32> -> vector<192x32xf32>
    %c0_6 = arith.constant 0 : index
    %c0_7 = arith.constant 0 : index
    %5 = vector.load %arg4[%c0_6, %c0_7] : memref<1x32xf32, #tpu.memory_space<vmem>>, vector<1x32xf32>
    %6 = vector.broadcast %5 : vector<1x32xf32> to vector<192x32xf32>
    %7 = arith.addf %4, %6 : vector<192x32xf32>
    %8 = vector.shape_cast %7 : vector<192x32xf32> to vector<12x16x32xf32>
    %9 = tpu.iota {dimensions = array<i32: 0>} : vector<12x1x1xi32>
    %c0_i32 = arith.constant 0 : i32
    %10 = arith.cmpi eq, %arg1, %c0_i32 : i32
    %c2_i32 = arith.constant 2 : i32
    %c0_i32_8 = arith.constant 0 : i32
    %11 = arith.select %10, %c2_i32, %c0_i32_8 : i32
    %c1_i32 = arith.constant 1 : i32
    %12 = arith.cmpi eq, %arg1, %c1_i32 : i32
    %c10_i32 = arith.constant 10 : i32
    %c12_i32 = arith.constant 12 : i32
    %13 = arith.select %12, %c10_i32, %c12_i32 : i32
    %14 = vector.broadcast %11 : i32 to vector<12x1x1xi32>
    %15 = arith.cmpi sge, %9, %14 : vector<12x1x1xi32>
    %16 = vector.broadcast %13 : i32 to vector<12x1x1xi32>
    %17 = arith.cmpi slt, %9, %16 : vector<12x1x1xi32>
    %18 = arith.andi %15, %17 : vector<12x1x1xi1>
    %cst_9 = arith.constant 0.000000e+00 : f32
    %19 = vector.shape_cast %18 : vector<12x1x1xi1> to vector<12x1x1xi1>
    %20 = vector.broadcast %19 : vector<12x1x1xi1> to vector<12x16x32xi1>
    %21 = vector.broadcast %cst_9 : f32 to vector<12x16x32xf32>
    %22 = arith.select %20, %8, %21 : vector<12x16x32xi1>, vector<12x16x32xf32>
    %c0_10 = arith.constant 0 : index
    %c0_11 = arith.constant 0 : index
    %23 = vector.load %arg5[%c0_10, %c0_11] : memref<25x32xf32, #tpu.memory_space<vmem>>, vector<25x32xf32>
    %24 = tpu.iota {dimensions = array<i32: 1>} : vector<1x16x1xi32>
    %cst_12 = arith.constant 0.000000e+00 : f32
    %25 = vector.broadcast %cst_12 : f32 to vector<8x16x32xf32>
    %c2_i32_13 = arith.constant 2 : i32
    %26 = tpu.dynamic_rotate %22 by %c2_i32_13 dim 1 : vector<12x16x32xf32>, i32 -> vector<12x16x32xf32>
    %c2_i32_14 = arith.constant 2 : i32
    %27 = vector.broadcast %c2_i32_14 : i32 to vector<1x16x1xi32>
    %28 = arith.cmpi sge, %24, %27 : vector<1x16x1xi32>
    %c16_i32 = arith.constant 16 : i32
    %29 = vector.broadcast %c16_i32 : i32 to vector<1x16x1xi32>
    %30 = arith.cmpi slt, %24, %29 : vector<1x16x1xi32>
    %31 = arith.andi %28, %30 : vector<1x16x1xi1>
    %cst_15 = arith.constant 0.000000e+00 : f32
    %32 = vector.shape_cast %31 : vector<1x16x1xi1> to vector<1x16x1xi1>
    %33 = vector.broadcast %32 : vector<1x16x1xi1> to vector<12x16x32xi1>
    %34 = vector.broadcast %cst_15 : f32 to vector<12x16x32xf32>
    %35 = arith.select %33, %26, %34 : vector<12x16x32xi1>, vector<12x16x32xf32>
    %36 = vector.extract_strided_slice %35 {offsets = [0, 0, 0], sizes = [8, 16, 32], strides = [1, 1, 1]} : vector<12x16x32xf32> to vector<8x16x32xf32>
    %37 = vector.extract_strided_slice %23 {offsets = [0, 0], sizes = [1, 32], strides = [1, 1]} : vector<25x32xf32> to vector<1x32xf32>
    %38 = vector.shape_cast %37 : vector<1x32xf32> to vector<32xf32>
    %39 = vector.shape_cast %38 : vector<32xf32> to vector<1x1x32xf32>
    %40 = vector.broadcast %39 : vector<1x1x32xf32> to vector<8x16x32xf32>
    %41 = arith.mulf %36, %40 : vector<8x16x32xf32>
    %42 = arith.addf %25, %41 : vector<8x16x32xf32>
    %43 = vector.extract_strided_slice %35 {offsets = [1, 0, 0], sizes = [8, 16, 32], strides = [1, 1, 1]} : vector<12x16x32xf32> to vector<8x16x32xf32>
    %44 = vector.extract_strided_slice %23 {offsets = [5, 0], sizes = [1, 32], strides = [1, 1]} : vector<25x32xf32> to vector<1x32xf32>
    %45 = vector.shape_cast %44 : vector<1x32xf32> to vector<32xf32>
    %46 = vector.shape_cast %45 : vector<32xf32> to vector<1x1x32xf32>
    %47 = vector.broadcast %46 : vector<1x1x32xf32> to vector<8x16x32xf32>
    %48 = arith.mulf %43, %47 : vector<8x16x32xf32>
    %49 = arith.addf %42, %48 : vector<8x16x32xf32>
    %50 = vector.extract_strided_slice %35 {offsets = [2, 0, 0], sizes = [8, 16, 32], strides = [1, 1, 1]} : vector<12x16x32xf32> to vector<8x16x32xf32>
    %51 = vector.extract_strided_slice %23 {offsets = [10, 0], sizes = [1, 32], strides = [1, 1]} : vector<25x32xf32> to vector<1x32xf32>
    %52 = vector.shape_cast %51 : vector<1x32xf32> to vector<32xf32>
    %53 = vector.shape_cast %52 : vector<32xf32> to vector<1x1x32xf32>
    %54 = vector.broadcast %53 : vector<1x1x32xf32> to vector<8x16x32xf32>
    %55 = arith.mulf %50, %54 : vector<8x16x32xf32>
    %56 = arith.addf %49, %55 : vector<8x16x32xf32>
    %57 = vector.extract_strided_slice %35 {offsets = [3, 0, 0], sizes = [8, 16, 32], strides = [1, 1, 1]} : vector<12x16x32xf32> to vector<8x16x32xf32>
    %58 = vector.extract_strided_slice %23 {offsets = [15, 0], sizes = [1, 32], strides = [1, 1]} : vector<25x32xf32> to vector<1x32xf32>
    %59 = vector.shape_cast %58 : vector<1x32xf32> to vector<32xf32>
    %60 = vector.shape_cast %59 : vector<32xf32> to vector<1x1x32xf32>
    %61 = vector.broadcast %60 : vector<1x1x32xf32> to vector<8x16x32xf32>
    %62 = arith.mulf %57, %61 : vector<8x16x32xf32>
    %63 = arith.addf %56, %62 : vector<8x16x32xf32>
    %64 = vector.extract_strided_slice %35 {offsets = [4, 0, 0], sizes = [8, 16, 32], strides = [1, 1, 1]} : vector<12x16x32xf32> to vector<8x16x32xf32>
    %65 = vector.extract_strided_slice %23 {offsets = [20, 0], sizes = [1, 32], strides = [1, 1]} : vector<25x32xf32> to vector<1x32xf32>
    %66 = vector.shape_cast %65 : vector<1x32xf32> to vector<32xf32>
    %67 = vector.shape_cast %66 : vector<32xf32> to vector<1x1x32xf32>
    %68 = vector.broadcast %67 : vector<1x1x32xf32> to vector<8x16x32xf32>
    %69 = arith.mulf %64, %68 : vector<8x16x32xf32>
    %70 = arith.addf %63, %69 : vector<8x16x32xf32>
    %c1_i32_16 = arith.constant 1 : i32
    %71 = tpu.dynamic_rotate %22 by %c1_i32_16 dim 1 : vector<12x16x32xf32>, i32 -> vector<12x16x32xf32>
    %c1_i32_17 = arith.constant 1 : i32
    %72 = vector.broadcast %c1_i32_17 : i32 to vector<1x16x1xi32>
    %73 = arith.cmpi sge, %24, %72 : vector<1x16x1xi32>
    %c16_i32_18 = arith.constant 16 : i32
    %74 = vector.broadcast %c16_i32_18 : i32 to vector<1x16x1xi32>
    %75 = arith.cmpi slt, %24, %74 : vector<1x16x1xi32>
    %76 = arith.andi %73, %75 : vector<1x16x1xi1>
    %cst_19 = arith.constant 0.000000e+00 : f32
    %77 = vector.shape_cast %76 : vector<1x16x1xi1> to vector<1x16x1xi1>
    %78 = vector.broadcast %77 : vector<1x16x1xi1> to vector<12x16x32xi1>
    %79 = vector.broadcast %cst_19 : f32 to vector<12x16x32xf32>
    %80 = arith.select %78, %71, %79 : vector<12x16x32xi1>, vector<12x16x32xf32>
    %81 = vector.extract_strided_slice %80 {offsets = [0, 0, 0], sizes = [8, 16, 32], strides = [1, 1, 1]} : vector<12x16x32xf32> to vector<8x16x32xf32>
    %82 = vector.extract_strided_slice %23 {offsets = [1, 0], sizes = [1, 32], strides = [1, 1]} : vector<25x32xf32> to vector<1x32xf32>
    %83 = vector.shape_cast %82 : vector<1x32xf32> to vector<32xf32>
    %84 = vector.shape_cast %83 : vector<32xf32> to vector<1x1x32xf32>
    %85 = vector.broadcast %84 : vector<1x1x32xf32> to vector<8x16x32xf32>
    %86 = arith.mulf %81, %85 : vector<8x16x32xf32>
    %87 = arith.addf %70, %86 : vector<8x16x32xf32>
    %88 = vector.extract_strided_slice %80 {offsets = [1, 0, 0], sizes = [8, 16, 32], strides = [1, 1, 1]} : vector<12x16x32xf32> to vector<8x16x32xf32>
    %89 = vector.extract_strided_slice %23 {offsets = [6, 0], sizes = [1, 32], strides = [1, 1]} : vector<25x32xf32> to vector<1x32xf32>
    %90 = vector.shape_cast %89 : vector<1x32xf32> to vector<32xf32>
    %91 = vector.shape_cast %90 : vector<32xf32> to vector<1x1x32xf32>
    %92 = vector.broadcast %91 : vector<1x1x32xf32> to vector<8x16x32xf32>
    %93 = arith.mulf %88, %92 : vector<8x16x32xf32>
    %94 = arith.addf %87, %93 : vector<8x16x32xf32>
    %95 = vector.extract_strided_slice %80 {offsets = [2, 0, 0], sizes = [8, 16, 32], strides = [1, 1, 1]} : vector<12x16x32xf32> to vector<8x16x32xf32>
    %96 = vector.extract_strided_slice %23 {offsets = [11, 0], sizes = [1, 32], strides = [1, 1]} : vector<25x32xf32> to vector<1x32xf32>
    %97 = vector.shape_cast %96 : vector<1x32xf32> to vector<32xf32>
    %98 = vector.shape_cast %97 : vector<32xf32> to vector<1x1x32xf32>
    %99 = vector.broadcast %98 : vector<1x1x32xf32> to vector<8x16x32xf32>
    %100 = arith.mulf %95, %99 : vector<8x16x32xf32>
    %101 = arith.addf %94, %100 : vector<8x16x32xf32>
    %102 = vector.extract_strided_slice %80 {offsets = [3, 0, 0], sizes = [8, 16, 32], strides = [1, 1, 1]} : vector<12x16x32xf32> to vector<8x16x32xf32>
    %103 = vector.extract_strided_slice %23 {offsets = [16, 0], sizes = [1, 32], strides = [1, 1]} : vector<25x32xf32> to vector<1x32xf32>
    %104 = vector.shape_cast %103 : vector<1x32xf32> to vector<32xf32>
    %105 = vector.shape_cast %104 : vector<32xf32> to vector<1x1x32xf32>
    %106 = vector.broadcast %105 : vector<1x1x32xf32> to vector<8x16x32xf32>
    %107 = arith.mulf %102, %106 : vector<8x16x32xf32>
    %108 = arith.addf %101, %107 : vector<8x16x32xf32>
    %109 = vector.extract_strided_slice %80 {offsets = [4, 0, 0], sizes = [8, 16, 32], strides = [1, 1, 1]} : vector<12x16x32xf32> to vector<8x16x32xf32>
    %110 = vector.extract_strided_slice %23 {offsets = [21, 0], sizes = [1, 32], strides = [1, 1]} : vector<25x32xf32> to vector<1x32xf32>
    %111 = vector.shape_cast %110 : vector<1x32xf32> to vector<32xf32>
    %112 = vector.shape_cast %111 : vector<32xf32> to vector<1x1x32xf32>
    %113 = vector.broadcast %112 : vector<1x1x32xf32> to vector<8x16x32xf32>
    %114 = arith.mulf %109, %113 : vector<8x16x32xf32>
    %115 = arith.addf %108, %114 : vector<8x16x32xf32>
    %116 = vector.extract_strided_slice %22 {offsets = [0, 0, 0], sizes = [8, 16, 32], strides = [1, 1, 1]} : vector<12x16x32xf32> to vector<8x16x32xf32>
    %117 = vector.extract_strided_slice %23 {offsets = [2, 0], sizes = [1, 32], strides = [1, 1]} : vector<25x32xf32> to vector<1x32xf32>
    %118 = vector.shape_cast %117 : vector<1x32xf32> to vector<32xf32>
    %119 = vector.shape_cast %118 : vector<32xf32> to vector<1x1x32xf32>
    %120 = vector.broadcast %119 : vector<1x1x32xf32> to vector<8x16x32xf32>
    %121 = arith.mulf %116, %120 : vector<8x16x32xf32>
    %122 = arith.addf %115, %121 : vector<8x16x32xf32>
    %123 = vector.extract_strided_slice %22 {offsets = [1, 0, 0], sizes = [8, 16, 32], strides = [1, 1, 1]} : vector<12x16x32xf32> to vector<8x16x32xf32>
    %124 = vector.extract_strided_slice %23 {offsets = [7, 0], sizes = [1, 32], strides = [1, 1]} : vector<25x32xf32> to vector<1x32xf32>
    %125 = vector.shape_cast %124 : vector<1x32xf32> to vector<32xf32>
    %126 = vector.shape_cast %125 : vector<32xf32> to vector<1x1x32xf32>
    %127 = vector.broadcast %126 : vector<1x1x32xf32> to vector<8x16x32xf32>
    %128 = arith.mulf %123, %127 : vector<8x16x32xf32>
    %129 = arith.addf %122, %128 : vector<8x16x32xf32>
    %130 = vector.extract_strided_slice %22 {offsets = [2, 0, 0], sizes = [8, 16, 32], strides = [1, 1, 1]} : vector<12x16x32xf32> to vector<8x16x32xf32>
    %131 = vector.extract_strided_slice %23 {offsets = [12, 0], sizes = [1, 32], strides = [1, 1]} : vector<25x32xf32> to vector<1x32xf32>
    %132 = vector.shape_cast %131 : vector<1x32xf32> to vector<32xf32>
    %133 = vector.shape_cast %132 : vector<32xf32> to vector<1x1x32xf32>
    %134 = vector.broadcast %133 : vector<1x1x32xf32> to vector<8x16x32xf32>
    %135 = arith.mulf %130, %134 : vector<8x16x32xf32>
    %136 = arith.addf %129, %135 : vector<8x16x32xf32>
    %137 = vector.extract_strided_slice %22 {offsets = [3, 0, 0], sizes = [8, 16, 32], strides = [1, 1, 1]} : vector<12x16x32xf32> to vector<8x16x32xf32>
    %138 = vector.extract_strided_slice %23 {offsets = [17, 0], sizes = [1, 32], strides = [1, 1]} : vector<25x32xf32> to vector<1x32xf32>
    %139 = vector.shape_cast %138 : vector<1x32xf32> to vector<32xf32>
    %140 = vector.shape_cast %139 : vector<32xf32> to vector<1x1x32xf32>
    %141 = vector.broadcast %140 : vector<1x1x32xf32> to vector<8x16x32xf32>
    %142 = arith.mulf %137, %141 : vector<8x16x32xf32>
    %143 = arith.addf %136, %142 : vector<8x16x32xf32>
    %144 = vector.extract_strided_slice %22 {offsets = [4, 0, 0], sizes = [8, 16, 32], strides = [1, 1, 1]} : vector<12x16x32xf32> to vector<8x16x32xf32>
    %145 = vector.extract_strided_slice %23 {offsets = [22, 0], sizes = [1, 32], strides = [1, 1]} : vector<25x32xf32> to vector<1x32xf32>
    %146 = vector.shape_cast %145 : vector<1x32xf32> to vector<32xf32>
    %147 = vector.shape_cast %146 : vector<32xf32> to vector<1x1x32xf32>
    %148 = vector.broadcast %147 : vector<1x1x32xf32> to vector<8x16x32xf32>
    %149 = arith.mulf %144, %148 : vector<8x16x32xf32>
    %150 = arith.addf %143, %149 : vector<8x16x32xf32>
    %c15_i32 = arith.constant 15 : i32
    %151 = tpu.dynamic_rotate %22 by %c15_i32 dim 1 : vector<12x16x32xf32>, i32 -> vector<12x16x32xf32>
    %c0_i32_20 = arith.constant 0 : i32
    %152 = vector.broadcast %c0_i32_20 : i32 to vector<1x16x1xi32>
    %153 = arith.cmpi sge, %24, %152 : vector<1x16x1xi32>
    %c15_i32_21 = arith.constant 15 : i32
    %154 = vector.broadcast %c15_i32_21 : i32 to vector<1x16x1xi32>
    %155 = arith.cmpi slt, %24, %154 : vector<1x16x1xi32>
    %156 = arith.andi %153, %155 : vector<1x16x1xi1>
    %cst_22 = arith.constant 0.000000e+00 : f32
    %157 = vector.shape_cast %156 : vector<1x16x1xi1> to vector<1x16x1xi1>
    %158 = vector.broadcast %157 : vector<1x16x1xi1> to vector<12x16x32xi1>
    %159 = vector.broadcast %cst_22 : f32 to vector<12x16x32xf32>
    %160 = arith.select %158, %151, %159 : vector<12x16x32xi1>, vector<12x16x32xf32>
    %161 = vector.extract_strided_slice %160 {offsets = [0, 0, 0], sizes = [8, 16, 32], strides = [1, 1, 1]} : vector<12x16x32xf32> to vector<8x16x32xf32>
    %162 = vector.extract_strided_slice %23 {offsets = [3, 0], sizes = [1, 32], strides = [1, 1]} : vector<25x32xf32> to vector<1x32xf32>
    %163 = vector.shape_cast %162 : vector<1x32xf32> to vector<32xf32>
    %164 = vector.shape_cast %163 : vector<32xf32> to vector<1x1x32xf32>
    %165 = vector.broadcast %164 : vector<1x1x32xf32> to vector<8x16x32xf32>
    %166 = arith.mulf %161, %165 : vector<8x16x32xf32>
    %167 = arith.addf %150, %166 : vector<8x16x32xf32>
    %168 = vector.extract_strided_slice %160 {offsets = [1, 0, 0], sizes = [8, 16, 32], strides = [1, 1, 1]} : vector<12x16x32xf32> to vector<8x16x32xf32>
    %169 = vector.extract_strided_slice %23 {offsets = [8, 0], sizes = [1, 32], strides = [1, 1]} : vector<25x32xf32> to vector<1x32xf32>
    %170 = vector.shape_cast %169 : vector<1x32xf32> to vector<32xf32>
    %171 = vector.shape_cast %170 : vector<32xf32> to vector<1x1x32xf32>
    %172 = vector.broadcast %171 : vector<1x1x32xf32> to vector<8x16x32xf32>
    %173 = arith.mulf %168, %172 : vector<8x16x32xf32>
    %174 = arith.addf %167, %173 : vector<8x16x32xf32>
    %175 = vector.extract_strided_slice %160 {offsets = [2, 0, 0], sizes = [8, 16, 32], strides = [1, 1, 1]} : vector<12x16x32xf32> to vector<8x16x32xf32>
    %176 = vector.extract_strided_slice %23 {offsets = [13, 0], sizes = [1, 32], strides = [1, 1]} : vector<25x32xf32> to vector<1x32xf32>
    %177 = vector.shape_cast %176 : vector<1x32xf32> to vector<32xf32>
    %178 = vector.shape_cast %177 : vector<32xf32> to vector<1x1x32xf32>
    %179 = vector.broadcast %178 : vector<1x1x32xf32> to vector<8x16x32xf32>
    %180 = arith.mulf %175, %179 : vector<8x16x32xf32>
    %181 = arith.addf %174, %180 : vector<8x16x32xf32>
    %182 = vector.extract_strided_slice %160 {offsets = [3, 0, 0], sizes = [8, 16, 32], strides = [1, 1, 1]} : vector<12x16x32xf32> to vector<8x16x32xf32>
    %183 = vector.extract_strided_slice %23 {offsets = [18, 0], sizes = [1, 32], strides = [1, 1]} : vector<25x32xf32> to vector<1x32xf32>
    %184 = vector.shape_cast %183 : vector<1x32xf32> to vector<32xf32>
    %185 = vector.shape_cast %184 : vector<32xf32> to vector<1x1x32xf32>
    %186 = vector.broadcast %185 : vector<1x1x32xf32> to vector<8x16x32xf32>
    %187 = arith.mulf %182, %186 : vector<8x16x32xf32>
    %188 = arith.addf %181, %187 : vector<8x16x32xf32>
    %189 = vector.extract_strided_slice %160 {offsets = [4, 0, 0], sizes = [8, 16, 32], strides = [1, 1, 1]} : vector<12x16x32xf32> to vector<8x16x32xf32>
    %190 = vector.extract_strided_slice %23 {offsets = [23, 0], sizes = [1, 32], strides = [1, 1]} : vector<25x32xf32> to vector<1x32xf32>
    %191 = vector.shape_cast %190 : vector<1x32xf32> to vector<32xf32>
    %192 = vector.shape_cast %191 : vector<32xf32> to vector<1x1x32xf32>
    %193 = vector.broadcast %192 : vector<1x1x32xf32> to vector<8x16x32xf32>
    %194 = arith.mulf %189, %193 : vector<8x16x32xf32>
    %195 = arith.addf %188, %194 : vector<8x16x32xf32>
    %c14_i32 = arith.constant 14 : i32
    %196 = tpu.dynamic_rotate %22 by %c14_i32 dim 1 : vector<12x16x32xf32>, i32 -> vector<12x16x32xf32>
    %c0_i32_23 = arith.constant 0 : i32
    %197 = vector.broadcast %c0_i32_23 : i32 to vector<1x16x1xi32>
    %198 = arith.cmpi sge, %24, %197 : vector<1x16x1xi32>
    %c14_i32_24 = arith.constant 14 : i32
    %199 = vector.broadcast %c14_i32_24 : i32 to vector<1x16x1xi32>
    %200 = arith.cmpi slt, %24, %199 : vector<1x16x1xi32>
    %201 = arith.andi %198, %200 : vector<1x16x1xi1>
    %cst_25 = arith.constant 0.000000e+00 : f32
    %202 = vector.shape_cast %201 : vector<1x16x1xi1> to vector<1x16x1xi1>
    %203 = vector.broadcast %202 : vector<1x16x1xi1> to vector<12x16x32xi1>
    %204 = vector.broadcast %cst_25 : f32 to vector<12x16x32xf32>
    %205 = arith.select %203, %196, %204 : vector<12x16x32xi1>, vector<12x16x32xf32>
    %206 = vector.extract_strided_slice %205 {offsets = [0, 0, 0], sizes = [8, 16, 32], strides = [1, 1, 1]} : vector<12x16x32xf32> to vector<8x16x32xf32>
    %207 = vector.extract_strided_slice %23 {offsets = [4, 0], sizes = [1, 32], strides = [1, 1]} : vector<25x32xf32> to vector<1x32xf32>
    %208 = vector.shape_cast %207 : vector<1x32xf32> to vector<32xf32>
    %209 = vector.shape_cast %208 : vector<32xf32> to vector<1x1x32xf32>
    %210 = vector.broadcast %209 : vector<1x1x32xf32> to vector<8x16x32xf32>
    %211 = arith.mulf %206, %210 : vector<8x16x32xf32>
    %212 = arith.addf %195, %211 : vector<8x16x32xf32>
    %213 = vector.extract_strided_slice %205 {offsets = [1, 0, 0], sizes = [8, 16, 32], strides = [1, 1, 1]} : vector<12x16x32xf32> to vector<8x16x32xf32>
    %214 = vector.extract_strided_slice %23 {offsets = [9, 0], sizes = [1, 32], strides = [1, 1]} : vector<25x32xf32> to vector<1x32xf32>
    %215 = vector.shape_cast %214 : vector<1x32xf32> to vector<32xf32>
    %216 = vector.shape_cast %215 : vector<32xf32> to vector<1x1x32xf32>
    %217 = vector.broadcast %216 : vector<1x1x32xf32> to vector<8x16x32xf32>
    %218 = arith.mulf %213, %217 : vector<8x16x32xf32>
    %219 = arith.addf %212, %218 : vector<8x16x32xf32>
    %220 = vector.extract_strided_slice %205 {offsets = [2, 0, 0], sizes = [8, 16, 32], strides = [1, 1, 1]} : vector<12x16x32xf32> to vector<8x16x32xf32>
    %221 = vector.extract_strided_slice %23 {offsets = [14, 0], sizes = [1, 32], strides = [1, 1]} : vector<25x32xf32> to vector<1x32xf32>
    %222 = vector.shape_cast %221 : vector<1x32xf32> to vector<32xf32>
    %223 = vector.shape_cast %222 : vector<32xf32> to vector<1x1x32xf32>
    %224 = vector.broadcast %223 : vector<1x1x32xf32> to vector<8x16x32xf32>
    %225 = arith.mulf %220, %224 : vector<8x16x32xf32>
    %226 = arith.addf %219, %225 : vector<8x16x32xf32>
    %227 = vector.extract_strided_slice %205 {offsets = [3, 0, 0], sizes = [8, 16, 32], strides = [1, 1, 1]} : vector<12x16x32xf32> to vector<8x16x32xf32>
    %228 = vector.extract_strided_slice %23 {offsets = [19, 0], sizes = [1, 32], strides = [1, 1]} : vector<25x32xf32> to vector<1x32xf32>
    %229 = vector.shape_cast %228 : vector<1x32xf32> to vector<32xf32>
    %230 = vector.shape_cast %229 : vector<32xf32> to vector<1x1x32xf32>
    %231 = vector.broadcast %230 : vector<1x1x32xf32> to vector<8x16x32xf32>
    %232 = arith.mulf %227, %231 : vector<8x16x32xf32>
    %233 = arith.addf %226, %232 : vector<8x16x32xf32>
    %234 = vector.extract_strided_slice %205 {offsets = [4, 0, 0], sizes = [8, 16, 32], strides = [1, 1, 1]} : vector<12x16x32xf32> to vector<8x16x32xf32>
    %235 = vector.extract_strided_slice %23 {offsets = [24, 0], sizes = [1, 32], strides = [1, 1]} : vector<25x32xf32> to vector<1x32xf32>
    %236 = vector.shape_cast %235 : vector<1x32xf32> to vector<32xf32>
    %237 = vector.shape_cast %236 : vector<32xf32> to vector<1x1x32xf32>
    %238 = vector.broadcast %237 : vector<1x1x32xf32> to vector<8x16x32xf32>
    %239 = arith.mulf %234, %238 : vector<8x16x32xf32>
    %240 = arith.addf %233, %239 : vector<8x16x32xf32>
    %c0_26 = arith.constant 0 : index
    %c0_27 = arith.constant 0 : index
    %241 = vector.load %arg6[%c0_26, %c0_27] : memref<1x32xf32, #tpu.memory_space<vmem>>, vector<1x32xf32>
    %242 = vector.shape_cast %241 : vector<1x32xf32> to vector<1x1x32xf32>
    %243 = vector.broadcast %242 : vector<1x1x32xf32> to vector<8x16x32xf32>
    %244 = arith.addf %240, %243 : vector<8x16x32xf32>
    %245 = vector.shape_cast %244 : vector<8x16x32xf32> to vector<128x32xf32>
    %c0_28 = arith.constant 0 : index
    %c0_29 = arith.constant 0 : index
    %246 = vector.load %arg7[%c0_28, %c0_29] : memref<32x35xf32, #tpu.memory_space<vmem>>, vector<32x35xf32>
    %cst_30 = arith.constant dense<0.000000e+00> : vector<128x35xf32>
    %247 = tpu.matmul %245, %246, %cst_30 {dimension_numbers = #tpu.dot_dimension_numbers<[1], [0], [0], [1], [0, 0, 1, 1], [], []>} : vector<128x32xf32>, vector<32x35xf32>, vector<128x35xf32> -> vector<128x35xf32>
    %c0_31 = arith.constant 0 : index
    %c0_32 = arith.constant 0 : index
    %248 = vector.load %arg8[%c0_31, %c0_32] : memref<1x35xf32, #tpu.memory_space<vmem>>, vector<1x35xf32>
    %249 = vector.broadcast %248 : vector<1x35xf32> to vector<128x35xf32>
    %250 = arith.addf %247, %249 : vector<128x35xf32>
    %251 = vector.extract_strided_slice %250 {offsets = [0, 0], sizes = [128, 32], strides = [1, 1]} : vector<128x35xf32> to vector<128x32xf32>
    %252 = vector.shape_cast %251 : vector<128x32xf32> to vector<8x16x32xf32>
    %c0_33 = arith.constant 0 : index
    %c0_34 = arith.constant 0 : index
    %c0_35 = arith.constant 0 : index
    %c0_36 = arith.constant 0 : index
    %253 = vector.load %arg9[%c0_33, %c0_34, %c0_35, %c0_36] : memref<1x8x16x32xf32, #tpu.memory_space<vmem>>, vector<1x8x16x32xf32>
    %254 = vector.shape_cast %253 : vector<1x8x16x32xf32> to vector<8x16x32xf32>
    %255 = vector.shape_cast %252 : vector<8x16x32xf32> to vector<1x8x16x32xf32>
    tpu.vector_store %arg9[%c0_33, %c0_34, %c0_35, %c0_36], %255 {strides = array<i32>} : memref<1x8x16x32xf32, #tpu.memory_space<vmem>>, vector<1x8x16x32xf32>,
    %256 = vector.extract_strided_slice %250 {offsets = [0, 32], sizes = [128, 3], strides = [1, 1]} : vector<128x35xf32> to vector<128x3xf32>
    %257 = vector.shape_cast %256 : vector<128x3xf32> to vector<8x16x3xf32>
    %c0_37 = arith.constant 0 : index
    %c0_38 = arith.constant 0 : index
    %c0_39 = arith.constant 0 : index
    %c0_40 = arith.constant 0 : index
    %258 = vector.load %arg10[%c0_37, %c0_38, %c0_39, %c0_40] : memref<1x8x16x3xf32, #tpu.memory_space<vmem>>, vector<1x8x16x3xf32>
    %259 = vector.shape_cast %258 : vector<1x8x16x3xf32> to vector<8x16x3xf32>
    %260 = vector.shape_cast %257 : vector<8x16x3xf32> to vector<1x8x16x3xf32>
    tpu.vector_store %arg10[%c0_37, %c0_38, %c0_39, %c0_40], %260 {strides = array<i32>} : memref<1x8x16x3xf32, #tpu.memory_space<vmem>>, vector<1x8x16x3xf32>,
    return
  }
  func.func @transform_0(%arg0: i32, %arg1: i32) -> (i32, i32, i32, i32, i32) {
    %c0_i32 = arith.constant 0 : i32
    %c0_i32_0 = arith.constant 0 : i32
    %c0_i32_1 = arith.constant 0 : i32
    %c0_i32_2 = arith.constant 0 : i32
    return %arg0, %arg1, %c0_i32, %c0_i32_0, %c0_i32_1 : i32, i32, i32, i32, i32
  }
  func.func @transform_1(%arg0: i32, %arg1: i32) -> (i32, i32) {
    %c0_i32 = arith.constant 0 : i32
    %c0_i32_0 = arith.constant 0 : i32
    %c0_i32_1 = arith.constant 0 : i32
    return %c0_i32, %c0_i32_0 : i32, i32
  }
  func.func @transform_2(%arg0: i32, %arg1: i32) -> (i32, i32) {
    %c0_i32 = arith.constant 0 : i32
    %c0_i32_0 = arith.constant 0 : i32
    %c0_i32_1 = arith.constant 0 : i32
    return %c0_i32, %c0_i32_0 : i32, i32
  }
  func.func @transform_3(%arg0: i32, %arg1: i32) -> (i32, i32) {
    %c0_i32 = arith.constant 0 : i32
    %c0_i32_0 = arith.constant 0 : i32
    %c0_i32_1 = arith.constant 0 : i32
    return %c0_i32, %c0_i32_0 : i32, i32
  }
  func.func @transform_4(%arg0: i32, %arg1: i32) -> (i32, i32) {
    %c0_i32 = arith.constant 0 : i32
    %c0_i32_0 = arith.constant 0 : i32
    %c0_i32_1 = arith.constant 0 : i32
    return %c0_i32, %c0_i32_0 : i32, i32
  }
  func.func @transform_5(%arg0: i32, %arg1: i32) -> (i32, i32) {
    %c0_i32 = arith.constant 0 : i32
    %c0_i32_0 = arith.constant 0 : i32
    %c0_i32_1 = arith.constant 0 : i32
    return %c0_i32, %c0_i32_0 : i32, i32
  }
  func.func @transform_6(%arg0: i32, %arg1: i32) -> (i32, i32) {
    %c0_i32 = arith.constant 0 : i32
    %c0_i32_0 = arith.constant 0 : i32
    %c0_i32_1 = arith.constant 0 : i32
    return %c0_i32, %c0_i32_0 : i32, i32
  }
  func.func @transform_7(%arg0: i32, %arg1: i32) -> (i32, i32, i32, i32) {
    %c0_i32 = arith.constant 0 : i32
    %c0_i32_0 = arith.constant 0 : i32
    %c0_i32_1 = arith.constant 0 : i32
    return %arg0, %arg1, %c0_i32, %c0_i32_0 : i32, i32, i32, i32
  }
  func.func @transform_8(%arg0: i32, %arg1: i32) -> (i32, i32, i32, i32) {
    %c0_i32 = arith.constant 0 : i32
    %c0_i32_0 = arith.constant 0 : i32
    %c0_i32_1 = arith.constant 0 : i32
    return %arg0, %arg1, %c0_i32, %c0_i32_0 : i32, i32, i32, i32
  }
}

</mosaic_0001>

<bundles_post_ra>
// kernel: tpu_custom_call.1
= control target key start
LH: loop header
LB: loop body
LE: loop exit
PB: predicated region body
PF: predicated region fallthrough
CT: control target
= control target key end

     0   :  { %s5409_s0 = inlined_call_operand.vmem [shape: f32[2,2,12,16,3], index: 0, kind: input, shape index: {}]   ;;  %s5410_s1 = inlined_call_operand.vmem [shape: f32[3,32], index: 1, kind: input, shape index: {}]   ;;  %s5411_s2 = inlined_call_operand.vmem [shape: f32[1,32], index: 2, kind: input, shape index: {}]   ;;  %s5412_s3 = inlined_call_operand.vmem [shape: f32[25,32], index: 3, kind: input, shape index: {}]   ;;  %s5413_s4 = inlined_call_operand.vmem [shape: f32[1,32], index: 4, kind: input, shape index: {}]   ;;  %s5414_s5 = inlined_call_operand.vmem [shape: f32[32,35], index: 5, kind: input, shape index: {}]   ;;  %s5415_s6 = inlined_call_operand.vmem [shape: f32[1,35], index: 6, kind: input, shape index: {}]   ;;  %s5416_s7 = inlined_call_operand.hbm [shape: f32[2,16,16,32], index: 7, kind: output, shape index: {0}]   ;;  %s5417_s8 = inlined_call_operand.vmem [shape: f32[2,16,16,3], index: 8, kind: output, shape index: {1}]  }
   0x1   :  { %5497 = sst [smem:[#allocation118_spill]] %s5409_s0 }
   0x2   :  { %5498 = sst [smem:[#allocation119_spill]] %s5410_s1 }
   0x3   :  { %5499 = sst [smem:[#allocation120_spill]] %s5411_s2 }
   0x4   :  { %5500 = sst [smem:[#allocation121_spill]] %s5412_s3 }
   0x5   :  { %14 = vsyncpa [#allocation3], 0 }
   0x6   :  { %16 = vsyncpa [#allocation3 + $0x1], 0  ;;  %s2872_s27 = smov 0   ;;  %s2874_s28 = smov 0  }
   0x7   :  { %s2876_s29 = smov 0   ;;  %s2878_s30 = smov 0  }
   0x8   :  { %s2880_s9 = smov 0   ;;  %s2882_s10 = smov 0  }
   0x9   :  { %s2884_s11 = smov 0   ;;  %s2886_s12 = smov 0  }
   0xa LB: > { %s2460_s13 = sadd.s32 4294967295, %s2821_s12   ;;  %s2461_s14 = sadd.s32 4294967294, %s2821_s12   ;;  %s2821_s12 = sphi %s2886_s12, %s22_s12   ;;  %s2817_s11 = sphi %s2884_s11, %s5909_s11   ;;  %s2813_s10 = sphi %s2882_s10, %s5908_s10   ;;  %s2809_s9 = sphi %s2880_s9, %s5907_s9   ;;  %s2805_s30 = sphi %s2878_s30, %s5906_s30   ;;  %s2801_s29 = sphi %s2876_s29, %s5905_s29   ;;  %s2797_s28 = sphi %s2874_s28, %s5904_s28   ;;  %s2793_s27 = sphi %s2872_s27, %s5903_s27  }
   0xb   : > { %s31_s15 = sadd.s32 1, %s2813_s10  ;;  %s34_s16 = sadd.s32 1, %s2817_s11 }
   0xc   : > { %p32_p0 = scmp.ge.s32.totalorder %s31_s15, 2  ;;  %p207_p1 = scmp.ne.s32.totalorder %s2801_s29, %s2797_s28 }
   0xd   : > { %p208_p2 = scmp.eq.s32.totalorder %s2460_s13, 3  ;;  %p213_p5 = scmp.ne.s32.totalorder %s2797_s28, %s2793_s27 }
   0xe   : > { %s5911_s15 = smov (%p32_p0, %s31_s15), 0  ;;  %s5913_s16 = smov (!%p32_p0, %s34_s16), %s2817_s11 }
   0xf   : > { %s193_s17 = ssub.s32 %s2813_s10, %s5911_s15  ;;  %p2923_p3 = por %p208_p2, %p207_p1 }
  0x10   : > { %p36_p4 = scmp.ge.s32.totalorder %s5913_s16, 2  ;;  %p214_p6 = scmp.eq.s32.totalorder %s2461_s14, 3 }
  0x11   : > { %p2464_p7 = scmp.ge.s32.totalorder %s2821_s12, 1  ;;  %p290_p9 = scmp.lt.s32.totalorder %s2821_s12, 5 }
  0x12   : > { %s5915_s16 = smov (%p36_p4, %s5913_s16), 0  ;;  %p2932_p8 = por %p214_p6, %p213_p5 }
  0x13   : > { %s192_s20 = ssub.s32 %s2817_s11, %s5915_s16  ;;  %s197_s21 = sadd.s32 1, %s2801_s29 }
  0x14   : > { %s194_s22 = sor.u32 %s193_s17, %s192_s20  ;;  %p291_p10 = pnand %p2464_p7, %p290_p9 }
  0x15   : > { %p195_p11 = scmp.eq.s32.totalorder %s194_s22, 0 }
  0x16   : > { %294 = sbr.rel (%p291_p10) target bundleno = 878 (0x36e), region = 48 }
  0x17   : > { %s2941_s23 = scalar_select %p195_p11, %s2801_s29, %s197_s21  }
  0x1d   : > { %s5503_s1 = sld [smem:[#allocation119_spill]]  ;;  %vm464_vm0 = vcmask 1042432   ;;  %p338_p12 = scmp.lt.s32.totalorder %s2809_s9, 1  ;;  %vm391_vm1 = vcmask 23552   ;;  %v747_v25 = vlaneseq }
  0x1e   : > { %p340_p13 = scmp.lt.s32.totalorder %s2805_s30, 1  ;;  %s5504_s0 = sld [smem:[#allocation118_spill]] }
  0x1f   : > { %s2949_s26 = scalar_select %p338_p12, %s2809_s9, 1  ;;  %v3008_v26 = vshrl.u32 %v747_v25, 7 }
  0x20   : > { %s341_s13 = scalar_select %p340_p13, %s2805_s30, 1 }
  0x21   : > { %s2650_s14 = smul.u32 48, %s2949_s26  ;;  %p653_p0 = scmp.eq.s32.totalorder %s2805_s30, 0  ;;  %v907_v28 = vsub.s32 2, %v3008_v26  ;;  %v835_v31 = vsub.s32 0, %v3008_v26  ;;  %v3020_v32 = vsub.s32 1, %v3008_v26  ;;  %v3034_v35 = vsub.s32 3, %v3008_v26 }
  0x22   : > { %s2649_s17 = smul.u32 24, %s341_s13  ;;  %p655_p1 = scmp.eq.s32.totalorder %s2805_s30, 1  ;;  %v3051_v40 = vadd.s32 8, %v3008_v26  ;;  %vm774_vm4 = vcmp.lt.s32.totalorder %v3008_v26, 2  ;;  %v979_v42 = vsub.s32 4, %v3008_v26  ;;  %vm1037_vm5 = vcmp.lt.s32.totalorder %v3008_v26, 1 }
  0x23   : > { %v383_v0 = vld [vmem:[%s5503_s1] sm:$0x7]  ;;  %s654_s13 = scalar_select %p653_p0, 2, 0  ;;  %5506 = vst [vmem:[#allocation5_spill] sm:$0xff] %v3034_v35  ;;  %vm1478_vm6 = vcmp.lt.s32.totalorder %v3008_v26, 7 }
  0x24   : > { %2569 = vmatprep.subr.msk.mxu0 %vm464_vm0, %v383_v0  ;;  %2647 = vmatprep.subr.msk.mxu1 %vm464_vm0, %v383_v0  ;;  %s344_s20 = sadd.s32 %s2650_s14, %s2649_s17  ;;  %s5505_s3 = sld [smem:[#allocation121_spill]]  ;;  %v3063_v44 = vsub.s32 7, %v3008_v26  ;;  %vm799_vm8 = vcmp.ge.s32.totalorder %v3008_v26, 2  ;;  %vm1062_vm9 = vcmp.ge.s32.totalorder %v3008_v26, 1  ;;  %v871_v48 = vsub.s32 5, %v3008_v26 }
  0x25   : > { %2570 = vmatpush3.msk.msra.mxu0 %vm464_vm0, %v383_v0  ;;  %2648 = vmatpush3.msk.msra.mxu1 %vm464_vm0, %v383_v0  ;;  %s2466_s21 = sshll.u32 %s344_s20, 3  ;;  %v3010_v27 = vstv %s654_s13  ;;  %s5509_s2 = sld [smem:[#allocation120_spill]]  ;;  %vm1741_vm10 = vcmp.lt.s32.totalorder %v3008_v26, 6  ;;  %v1132_v51 = vsub.s32 6, %v3008_v26  ;;  %vm1506_vm13 = vcmp.lt.s32.totalorder %v3051_v40, 15 }
  0x26   : > { %s2956_s25 = scalar_lea.vmem %s5504_s0, %s2466_s21  ;;  %vm658_vm2 = vcmp.le.s32.totalorder %v3010_v27, 0  ;;  %5513 = vst [vmem:[#allocation11_spill] sm:$0xff] %v3063_v44  ;;  %vm659_vm11 = vcmp.le.s32.totalorder %v3010_v27, 1  ;;  %vm1767_vm14 = vcmp.lt.s32.totalorder %v3051_v40, 14  ;;  %vm660_vm0 = vcmp.le.s32.totalorder %v3010_v27, 2  ;;  %s323_s17 = sand.u32 1, %s2797_s28  }
  0x27   : > { %v359_v1 = vld [vmem:[%s2956_s25] sm:$0xff]  ;;  %v360_v2 = vld [vmem:[%s2956_s25 + $0x8] sm:$0xff]  ;;  %v361_v3 = vld [vmem:[%s2956_s25 + $0x10] sm:$0xff]  ;;  %s656_s14 = scalar_select %p655_p1, 10, 12 }
  0x28   : > { %2571 = vmatprep.mubr.msk.f32.mxu0 %vm391_vm1, %v359_v1  ;;  %v362_v4 = vld [vmem:[%s2956_s25 + $0x18] sm:$0xff]  ;;  %v363_v5 = vld [vmem:[%s2956_s25 + $0x20] sm:$0xff]  ;;  %v364_v7 = vld [vmem:[%s2956_s25 + $0x28] sm:$0xff]  ;;  %s2465_s20 = sshll.u32 %s323_s17, 7  ;;  %s2523_s13 = sshll.u32 %s2805_s30, 4 }
  0x29   : > { %2572 = vmatmul.mubr.msk.f32.vlgmr.msra.gmra.mrb[0].mxu0 %vm391_vm1, %v360_v2  ;;  %v379_v6 = vld [vmem:[%s2956_s25 + $0xa0] sm:$0xff]  ;;  %v380_v8 = vld [vmem:[%s2956_s25 + $0xa8] sm:$0xff]  ;;  %v381_v9 = vld [vmem:[%s2956_s25 + $0xb0] sm:$0xff]  ;;  %v3013_v29 = vstv %s656_s14  ;;  %s5242_s24 = scalar_lea.vmem [#allocation2], %s2465_s20  ;;  %s2519_s14 = sshll.u32 %s2809_s9, 5 }
  0x2a   : > { %2574 = vmatprep.mubr.msk.f32.mxu0 %vm391_vm1, %v361_v3  ;;  %2601 = vmatprep.mubr.msk.f32.mxu1 %vm391_vm1, %v379_v6  ;;  %v365_v10 = vld [vmem:[%s2956_s25 + $0x30] sm:$0xff]  ;;  %v382_v11 = vld [vmem:[%s2956_s25 + $0xb8] sm:$0xff]  ;;  %v367_v13 = vld [vmem:[%s2956_s25 + $0x40] sm:$0xff]  ;;  %vm671_vm3 = vcmp.gt.s32.totalorder %v3013_v29, 0  ;;  %vm672_vm12 = vcmp.gt.s32.totalorder %v3013_v29, 1  ;;  %s2326_s20 = sadd.s32 %s2523_s13, %s2519_s14  ;;  %s2329_s22 = sshll.u32 %s5242_s24, 4  ;;  %s5307_s22 = int_to_ptr.vmem [resolvable:$true] %s2329_s22 }
  0x2b   : > { %2602 = vmatmul.mubr.msk.f32.vlgmr.msra.gmra.mrb[0].mxu1 %vm391_vm1, %v380_v8  ;;  %v366_v12 = vld [vmem:[%s2956_s25 + $0x38] sm:$0xff]  ;;  %v368_v14 = vld [vmem:[%s2956_s25 + $0x48] sm:$0xff]  ;;  %v369_v15 = vld [vmem:[%s2956_s25 + $0x50] sm:$0xff]  ;;  %s2520_s21 = sshll.u32 %s2326_s20, 7  ;;  %s5318_s20 = scalar_lea.sflag [#allocation3], %s323_s17 }
  0x2c   : > { %2604 = vmatprep.mubr.msk.f32.mxu1 %vm391_vm1, %v381_v9  ;;  %v370_v16 = vld [vmem:[%s2956_s25 + $0x58] sm:$0xff]  ;;  %v371_v17 = vld [vmem:[%s2956_s25 + $0x60] sm:$0xff]  ;;  %v372_v18 = vld [vmem:[%s2956_s25 + $0x68] sm:$0xff]  ;;  %s5305_s14 = scalar_lea.hbm %s5416_s7, %s2520_s21  ;;  %s2727_s21 = scalar_lea.vmem %s5307_s22, 2048 }
  0x2d   : > { %2575 = vmatmul.mubr.msk.f32.gmra.mrb[2].mxu0 %vm391_vm1, %v362_v4  ;;  %v373_v19 = vld [vmem:[%s2956_s25 + $0x70] sm:$0xff]  ;;  %v374_v20 = vld [vmem:[%s2956_s25 + $0x78] sm:$0xff]  ;;  %v375_v21 = vld [vmem:[%s2956_s25 + $0x80] sm:$0xff]  ;;  %p2728_p2 = scmp.ne.s32.totalorder %s5307_s22, %s2727_s21  ;;  %s2824_s9 = smov [#allocation2]  }
  0x2e   : > { %2577 = vmatprep.mubr.msk.f32.mxu0 %vm391_vm1, %v363_v5  ;;  %v376_v22 = vld [vmem:[%s2956_s25 + $0x88] sm:$0xff]  ;;  %v377_v23 = vld [vmem:[%s2956_s25 + $0x90] sm:$0xff]  ;;  %v378_v24 = vld [vmem:[%s2956_s25 + $0x98] sm:$0xff]  ;;  %s2823_s25 = smov 96   ;;  %s2731_s13 = sshll.u32 %s2824_s9, 4  ;;  %s2732_s13 = int_to_ptr.vmem [resolvable:$false] %s2731_s13 }
  0x2f   : > { %2605 = vmatmul.mubr.msk.f32.gmra.mrb[2].mxu1 %vm391_vm1, %v382_v11  ;;  %v743_v30 = vld [vmem:[%s5505_s3] sm:$0xff]  ;;  %v3026_v33 = vld [vmem:[%s5505_s3 + $0x8] sm:$0xff]  ;;  %v3031_v34 = vld [vmem:[%s5505_s3 + $0x10] sm:$0xff]  ;;  %p2729_p4 = pnand %p2728_p2, %p2923_p3  ;;  %s2733_s0 = scalar_lea.vmem %s2732_s13, 4096 }
  0x30   : > { %v3038_v36 = vrot.slane %v3026_v33, %v907_v28  ;;  %v3040_v37 = vrot.slane %v743_v30, %v907_v28  ;;  %v3043_v38 = vrot.slane %v3031_v34, %v907_v28  ;;  %v3048_v39 = vld [vmem:[%s5509_s2] ss:$0 sm:$0xff]  ;;  %v3054_v41 = vrot.slane %v743_v30, %v835_v31  ;;  %vm3067_vm7 = vmand %vm658_vm2, %vm671_vm3  ;;  %p2734_p6 = scmp.lt.s32.totalorder %s5307_s22, %s2732_s13  ;;  %p2735_p7 = scmp.lt.s32.totalorder %s2733_s0, %s2727_s21 }
  0x31   : > { %2578 = vmatmul.mubr.msk.f32.gmra.mrb[4].mxu0 %vm391_vm1, %v364_v7  ;;  %5510 = vst [vmem:[#allocation8_spill] sm:$0xff] %v3048_v39  ;;  %v3059_v43 = vrot.slane %v743_v30, %v3020_v32  ;;  %v3074_v47 = vrot.slane %v743_v30, %v3034_v35  ;;  %v3083_v53 = vrot.slane %v3031_v34, %v979_v42  ;;  %vm3116_vm15 = vmand %vm659_vm11, %vm672_vm12  ;;  %vm673_vm2 = vcmp.gt.s32.totalorder %v3013_v29, 2  ;;  %p2730_p5 = pneg %p2729_p4 }
  0x32   : > { %2580 = vmatprep.mubr.msk.f32.mxu0 %vm391_vm1, %v365_v10  ;;  %5507 = vst [vmem:[#allocation6_spill] sm:$0xff] %v3040_v37  ;;  %5508 = vst [vmem:[#allocation7_spill] sm:$0xff] %v3043_v38  ;;  %v3086_v54 = vrot.slane %v3031_v34, %v835_v31  ;;  %v3092_v56 = vrot.slane %v743_v30, %v979_v42  ;;  %v3095_v57 = vrot.slane %v743_v30, %v3063_v44  ;;  %p2736_p9 = por %p2735_p7, %p2734_p6 }
  0x33   : > { %5511 = vst [vmem:[#allocation9_spill] sm:$0xff] %v3054_v41  ;;  %5512 = vst [vmem:[#allocation10_spill] sm:$0xff] %v3059_v43  ;;  %v3099_v61 = vrot.slane %v3026_v33, %v3063_v44  ;;  %v3101_v62 = vrot.slane %v743_v30, %v871_v48  ;;  %v3106_v2 = vrot.slane %v743_v30, %v1132_v51  ;;  %vm674_vm11 = vcmp.gt.s32.totalorder %v3013_v29, 3 }
  0x34   : > { %5516 = vst [vmem:[#allocation12_spill] sm:$0xff] %v3074_v47  ;;  %5517 = vst [vmem:[#allocation13_spill] sm:$0xff] %v3092_v56  ;;  %v3109_v3 = vrot.slane %v3026_v33, %v835_v31  ;;  %v3121_v11 = vrot.slane %v3031_v34, %v871_v48  ;;  %p2737_p10 = pnand %p2736_p9, %p2730_p5 }
  0x35   : > { %2581 = vmatmul.mubr.msk.f32.gmra.mrb[6].mxu0 %vm391_vm1, %v366_v12  ;;  %5518 = vst [vmem:[#allocation14_spill] sm:$0xff] %v3106_v2  ;;  %v3125_v12 = vrot.slane %v3026_v33, %v3020_v32  ;;  %vm3234_vm3 = vmand %vm660_vm0, %vm673_vm2  ;;  %vm675_vm0 = vcmp.gt.s32.totalorder %v3013_v29, 4  ;;  %vm663_vm2 = vcmp.le.s32.totalorder %v3010_v27, 5 }
  0x36   : > { %2583 = vmatprep.mubr.msk.f32.mxu0 %vm391_vm1, %v367_v13  ;;  %5519 = vst [vmem:[#allocation15_spill] sm:$0xff] %v3109_v3 }
  0x37   : > { %5522 = vst [vmem:[#allocation16_spill] sm:$0xff] %v3125_v12 }
  0x39   : > { %2584 = vmatmul.mubr.msk.f32.gmra.mrb[8].mxu0 %vm391_vm1, %v368_v14 }
  0x3a   : > { %2586 = vmatprep.mubr.msk.f32.mxu0 %vm391_vm1, %v369_v15 }
  0x3d   : > { %2587 = vmatmul.mubr.msk.f32.gmra.mrb[10].mxu0 %vm391_vm1, %v370_v16 }
  0x3e   : > { %2589 = vmatprep.mubr.msk.f32.mxu0 %vm391_vm1, %v371_v17 }
  0x41   : > { %2590 = vmatmul.mubr.msk.f32.gmra.mrb[12].mxu0 %vm391_vm1, %v372_v18  ;;  %v3138_v18 = vrot.slane %v3026_v33, %v979_v42 }
  0x42   : > { %2592 = vmatprep.mubr.msk.f32.mxu0 %vm391_vm1, %v373_v19 }
  0x45   : > { %2593 = vmatmul.mubr.msk.f32.gmra.mrb[14].mxu0 %vm391_vm1, %v374_v20  ;;  %v3144_v20 = vrot.slane %v3026_v33, %v3034_v35 }
  0x46   : > { %2595 = vmatprep.mubr.msk.f32.mxu0 %vm391_vm1, %v375_v21  ;;  %v3147_v21 = vrot.slane %v3026_v33, %v871_v48 }
  0x47   : > { %5523 = vst [vmem:[#allocation17_spill] sm:$0xff] %v3144_v20 }
  0x48   : > { %5524 = vst [vmem:[#allocation18_spill] sm:$0xff] %v3147_v21 }
  0x49   : > { %2596 = vmatmul.mubr.msk.f32.gmra.mrb[16].mxu0 %vm391_vm1, %v376_v22  ;;  %v3150_v22 = vrot.slane %v3026_v33, %v1132_v51 }
  0x4a   : > { %2598 = vmatprep.mubr.msk.f32.mxu0 %vm391_vm1, %v377_v23 }
  0x4b   : > { %5525 = vst [vmem:[#allocation19_spill] sm:$0xff] %v3150_v22 }
  0x4d   : > { %2599 = vmatmul.mubr.msk.f32.gmra.mrb[18].mxu0 %vm391_vm1, %v378_v24 }
  0xfc   : > { %v2573_v45 = vpop.f32.mrb[0].mxu0 }
  0xfd   : > { %v540_v49 = vadd.f32 %v2573_v45, %v3048_v39  ;;  %v534_v50 = vpop.f32.mrb[1].mxu0 }
  0xfe   : > { %v535_v52 = vadd.f32 %v3048_v39, %v534_v50  ;;  %v3179_v50 = vrot.slane %v3031_v34, %v1132_v51 }
  0xff   : > { %v720_v55 = vsel %vm3067_vm7, %v540_v49, 0.0  ;;  %v3176_v49 = vrot.slane %v3031_v34, %v3020_v32 }
 0x100   : > { %v762_v58 = vrot.slane %v720_v55, 6  ;;  %v1025_v59 = vrot.slane %v720_v55, 7  ;;  %v2576_v60 = vpop.f32.mrb[2].mxu0  ;;  %v1466_v63 = vrot.slane %v720_v55, 1  ;;  %v719_v0 = vsel %vm3067_vm7, %v535_v52, 0.0 }
 0x101   : > { %v544_v1 = vpop.f32.mrb[3].mxu0  ;;  %v750_v4 = vrot.slane %v719_v0, 6  ;;  %v1013_v5 = vrot.slane %v719_v0, 7  ;;  %v1454_v6 = vrot.slane %v719_v0, 1  ;;  %v550_v7 = vadd.f32 %v2576_v60, %v3048_v39 }
 0x102   : > { %v1729_v8 = vrot.slane %v720_v55, 2  ;;  %v1717_v9 = vrot.slane %v719_v0, 2  ;;  %v545_v28 = vadd.f32 %v3048_v39, %v544_v1  ;;  %v3168_v45 = vmul.f32 %v3040_v37, %v720_v55 }
 0x103   : > { %v775_v13 = vsel %vm774_vm4, %v750_v4, %v762_v58  ;;  %v787_v14 = vsel %vm774_vm4, %v762_v58, %v750_v4  ;;  %v1038_v15 = vsel %vm1037_vm5, %v1013_v5, %v1025_v59  ;;  %v1050_v16 = vsel %vm1037_vm5, %v1025_v59, %v1013_v5 }
 0x104   : > { %v2579_v17 = vpop.f32.mrb[4].mxu0  ;;  %v1479_v23 = vsel %vm1478_vm6, %v1454_v6, %v1466_v63  ;;  %v1491_v24 = vsel %vm1478_vm6, %v1466_v63, %v1454_v6  ;;  %v722_v25 = vsel %vm3116_vm15, %v550_v7, 0.0  ;;  %v809_v30 = vsel %vm799_vm8, %v787_v14, 0.0  ;;  %5526 = vst [vmem:[#allocation20_spill] sm:$0xff] %v3168_v45 }
 0x105   : > { %v3140_v19 = vpop.f32.mrb[5].mxu0  ;;  %v1070_v31 = vsel %vm1062_vm9, %v1050_v16, 0.0  ;;  %v1742_v33 = vsel %vm1741_vm10, %v1717_v9, %v1729_v8  ;;  %v1754_v42 = vsel %vm1741_vm10, %v1729_v8, %v1717_v9  ;;  %v1514_v46 = vsel %vm1506_vm13, %v1491_v24, 0.0 }
 0x106   : > { %v838_v52 = vmul.f32 %v3054_v41, %v775_v13  ;;  %v3183_v58 = vmul.f32 %v3040_v37, %v719_v0  ;;  %v763_v59 = vrot.slane %v722_v25, 6  ;;  %v1026_v55 = vrot.slane %v722_v25, 7 }
 0x107   : > { %v837_v63 = vmul.f32 %v3054_v41, %v809_v30  ;;  %v3189_v1 = vmul.f32 %v3059_v43, %v1070_v31  ;;  %v3192_v32 = vmul.f32 %v3059_v43, %v1038_v15  ;;  %v721_v34 = vsel %vm3116_vm15, %v545_v28, 0.0 }
 0x108   : > { %v3172_v48 = vpop.f32.mrb[6].mxu0  ;;  %5527 = vst [vmem:[#allocation21_spill] sm:$0xff] %v3183_v58  ;;  %v3197_v51 = vmul.f32 %v3074_v47, %v1479_v23  ;;  %v3200_v0 = vmul.f32 %v3074_v47, %v1514_v46  ;;  %v751_v4 = vrot.slane %v721_v34, 6  ;;  %v1014_v5 = vrot.slane %v721_v34, 7 }
 0x109   : > { %v3185_v60 = vpop.f32.mrb[7].mxu0  ;;  %v1775_v6 = vsel %vm1767_vm14, %v1754_v42, 0.0  ;;  %v1467_v7 = vrot.slane %v722_v25, 1  ;;  %v1730_v8 = vrot.slane %v722_v25, 2  ;;  %v1455_v9 = vrot.slane %v721_v34, 1 }
 0x10a   : > { %5528 = vst [vmem:[#allocation22_spill] sm:$0xff] %v3197_v51  ;;  %5529 = vst [vmem:[#allocation23_spill] sm:$0xff] %v3200_v0  ;;  %v776_v10 = vsel %vm774_vm4, %v751_v4, %v763_v59  ;;  %v788_v14 = vsel %vm774_vm4, %v763_v59, %v751_v4  ;;  %v1039_v15 = vsel %vm1037_vm5, %v1014_v5, %v1026_v55  ;;  %v1718_v30 = vrot.slane %v721_v34, 2 }
 0x10b   : > { %v1051_v16 = vsel %vm1037_vm5, %v1026_v55, %v1014_v5  ;;  %v811_v24 = vsel %vm799_vm8, %v788_v14, 0.0  ;;  %v874_v28 = vmul.f32 %v3101_v62, %v776_v10  ;;  %v560_v31 = vadd.f32 %v2579_v17, %v3048_v39 }
 0x10c   : > { %v3204_v13 = vpop.f32.mrb[8].mxu0  ;;  %v3221_v42 = vmul.f32 %v3092_v56, %v1742_v33  ;;  %v3224_v46 = vmul.f32 %v3092_v56, %v1775_v6  ;;  %v3227_v59 = vmul.f32 %v3040_v37, %v722_v25  ;;  %v873_v55 = vmul.f32 %v3101_v62, %v811_v24 }
 0x10d   : > { %v3214_v23 = vpop.f32.mrb[9].mxu0  ;;  %v3239_v17 = vmul.f32 %v3095_v57, %v722_v25  ;;  %v890_v33 = vadd.f32 %v874_v28, %v838_v52  ;;  %v1072_v5 = vsel %vm1062_vm9, %v1051_v16, 0.0  ;;  %v1480_v6 = vsel %vm1478_vm6, %v1455_v9, %v1467_v7 }
 0x10e   : > { %5530 = vst [vmem:[#allocation24_spill] sm:$0xff] %v3221_v42  ;;  %5531 = vst [vmem:[#allocation25_spill] sm:$0xff] %v3224_v46  ;;  %v889_v46 = vadd.f32 %v873_v55, %v837_v63  ;;  %v3251_v0 = vmul.f32 %v3095_v57, %v721_v34  ;;  %v1492_v25 = vsel %vm1478_vm6, %v1467_v7, %v1455_v9  ;;  %vm661_vm7 = vcmp.le.s32.totalorder %v3010_v27, 3 }
 0x10f   : > { %5532 = vst [vmem:[#allocation26_spill] sm:$0xff] %v3227_v59  ;;  %5535 = vst [vmem:[#allocation27_spill] sm:$0xff] %v3239_v17  ;;  %v3248_v59 = vmul.f32 %v3040_v37, %v721_v34  ;;  %v1743_v16 = vsel %vm1741_vm10, %v1718_v30, %v1730_v8  ;;  %v1755_v63 = vsel %vm1741_vm10, %v1730_v8, %v1718_v30  ;;  %v3265_v28 = vsel %vm3234_vm3, %v560_v31, 0.0 }
 0x110   : > { %v3245_v14 = vpop.f32.mrb[10].mxu0  ;;  %5537 = vst [vmem:[#allocation29_spill] sm:$0xff] %v3251_v0  ;;  %5538 = vst [vmem:[#allocation30_spill] sm:$0xff] %v3265_v28  ;;  %v555_v34 = vadd.f32 %v3048_v39, %v3140_v19  ;;  %v839_v7 = vmul.f32 %v3054_v41, %v811_v24  ;;  %v840_v9 = vmul.f32 %v3054_v41, %v776_v10  ;;  %v1516_v42 = vsel %vm1506_vm13, %v1492_v25, 0.0 }
 0x111   : > { %5536 = vst [vmem:[#allocation28_spill] sm:$0xff] %v3248_v59  ;;  %v3257_v52 = vpop.f32.mrb[11].mxu0  ;;  %v3272_v55 = vmul.f32 %v3059_v43, %v1072_v5  ;;  %v3277_v35 = vmul.f32 %v3059_v43, %v1039_v15  ;;  %v3280_v8 = vmul.f32 %v3106_v2, %v1072_v5  ;;  %v3283_v30 = vmul.f32 %v3106_v2, %v1039_v15  ;;  %vm3369_vm12 = vmand %vm661_vm7, %vm674_vm11 }
 0x112   : > { %v1777_v19 = vsel %vm1767_vm14, %v1755_v63, 0.0  ;;  %v3290_v10 = vmul.f32 %v3074_v47, %v1480_v6  ;;  %v3293_v31 = vmul.f32 %v3109_v3, %v1480_v6  ;;  %v764_v25 = vrot.slane %v3265_v28, 6 }
 0x113   : > { %5539 = vst [vmem:[#allocation31_spill] sm:$0xff] %v3272_v55  ;;  %5540 = vst [vmem:[#allocation32_spill] sm:$0xff] %v3277_v35  ;;  %v1027_v44 = vrot.slane %v3265_v28, 7  ;;  %v3300_v15 = vmul.f32 %v3074_v47, %v1516_v42  ;;  %v3303_v59 = vmul.f32 %v3109_v3, %v1516_v42  ;;  %v3306_v63 = vmul.f32 %v3092_v56, %v1743_v16 }
 0x114   : > { %v3287_v24 = vpop.f32.mrb[12].mxu0  ;;  %5541 = vst [vmem:[#allocation33_spill] sm:$0xff] %v3290_v10  ;;  %5542 = vst [vmem:[#allocation34_spill] sm:$0xff] %v3293_v31  ;;  %v3310_v10 = vsel %vm3234_vm3, %v555_v34, 0.0  ;;  %v3313_v6 = vmul.f32 %v3092_v56, %v1777_v19  ;;  %v3316_v31 = vmul.f32 %v3125_v12, %v1743_v16  ;;  %v3321_v42 = vmul.f32 %v3125_v12, %v1777_v19  ;;  %v3334_v16 = vpop.f32.mrb[0].mxu1 }
 0x115   : > { %v3297_v5 = vpop.f32.mrb[13].mxu0  ;;  %5543 = vst [vmem:[#allocation35_spill] sm:$0xff] %v3300_v15  ;;  %5544 = vst [vmem:[#allocation36_spill] sm:$0xff] %v3303_v59  ;;  %v752_v51 = vrot.slane %v3310_v10, 6  ;;  %v1015_v15 = vrot.slane %v3310_v10, 7  ;;  %v3329_v4 = vmul.f32 %v3095_v57, %v3265_v28  ;;  %v1468_v34 = vrot.slane %v3265_v28, 1 }
 0x116   : > { %5545 = vst [vmem:[#allocation37_spill] sm:$0xff] %v3306_v63  ;;  %5546 = vst [vmem:[#allocation38_spill] sm:$0xff] %v3310_v10  ;;  %v3325_v63 = vmul.f32 %v3040_v37, %v3265_v28  ;;  %v1456_v35 = vrot.slane %v3310_v10, 1  ;;  %vm662_vm15 = vcmp.le.s32.totalorder %v3010_v27, 4  ;;  %vm676_vm3 = vcmp.gt.s32.totalorder %v3013_v29, 5 }
 0x117   : > { %5547 = vst [vmem:[#allocation39_spill] sm:$0xff] %v3313_v6  ;;  %5548 = vst [vmem:[#allocation40_spill] sm:$0xff] %v3316_v31  ;;  %v777_v56 = vsel %vm774_vm4, %v752_v51, %v764_v25  ;;  %v789_v19 = vsel %vm774_vm4, %v764_v25, %v752_v51  ;;  %v3355_v51 = vmul.f32 %v3138_v18, %v3265_v28 }
 0x118   : > { %5549 = vst [vmem:[#allocation41_spill] sm:$0xff] %v3321_v42  ;;  %5550 = vst [vmem:[#allocation42_spill] sm:$0xff] %v3325_v63  ;;  %v3332_v6 = vpop.f32.mrb[14].mxu0  ;;  %v1040_v42 = vsel %vm1037_vm5, %v1015_v15, %v1027_v44  ;;  %v1052_v63 = vsel %vm1037_vm5, %v1027_v44, %v1015_v15  ;;  %v813_v59 = vsel %vm799_vm8, %v789_v19, 0.0  ;;  %v876_v31 = vmul.f32 %v3101_v62, %v777_v56 }
 0x119   : > { %5551 = vst [vmem:[#allocation43_spill] sm:$0xff] %v3329_v4  ;;  %5552 = vst [vmem:[#allocation44_spill] sm:$0xff] %v3334_v16  ;;  %v3344_v12 = vpop.f32.mrb[15].mxu0  ;;  %v3346_v4 = vpop.f32.mrb[1].mxu1  ;;  %v910_v16 = vmul.f32 %v3038_v36, %v777_v56  ;;  %v875_v25 = vmul.f32 %v3101_v62, %v813_v59  ;;  %v909_v44 = vmul.f32 %v3038_v36, %v813_v59 }
 0x11a   : > { %5553 = vst [vmem:[#allocation45_spill] sm:$0xff] %v3346_v4  ;;  %5554 = vst [vmem:[#allocation46_spill] sm:$0xff] %v3355_v51  ;;  %v570_v15 = vadd.f32 %v3172_v48, %v3048_v39  ;;  %v892_v19 = vadd.f32 %v876_v31, %v840_v9  ;;  %v1074_v48 = vsel %vm1062_vm9, %v1052_v63, 0.0  ;;  %v3383_v31 = vmul.f32 %v3040_v37, %v3310_v10 }
 0x11b   : > { %v3362_v55 = vadd.f32 %v910_v16, %v890_v33  ;;  %v891_v45 = vadd.f32 %v875_v25, %v839_v7  ;;  %v925_v58 = vadd.f32 %v909_v44, %v889_v46  ;;  %v565_v33 = vadd.f32 %v3048_v39, %v3185_v60  ;;  %vm3544_vm7 = vmand %vm662_vm15, %vm675_vm0 }
 0x11c   : > { %v3373_v0 = vpop.f32.mrb[16].mxu0  ;;  %5558 = vst [vmem:[#allocation48_spill] sm:$0xff] %v3383_v31  ;;  %v3387_v16 = vmul.f32 %v3095_v57, %v3310_v10  ;;  %v1481_v7 = vsel %vm1478_vm6, %v1456_v35, %v1468_v34  ;;  %v1493_v46 = vsel %vm1478_vm6, %v1468_v34, %v1456_v35  ;;  %v841_v63 = vmul.f32 %v3054_v41, %v813_v59  ;;  %vm3644_vm11 = vmand %vm663_vm2, %vm676_vm3 }
 0x11d   : > { %v3379_v9 = vpop.f32.mrb[17].mxu0  ;;  %v842_v60 = vmul.f32 %v3054_v41, %v777_v56  ;;  %v3397_v25 = vmul.f32 %v3138_v18, %v3310_v10  ;;  %v3401_v44 = vsel %vm3369_vm12, %v570_v15, 0.0  ;;  %v3404_v4 = vmul.f32 %v3059_v43, %v1074_v48 }
 0x11e   : > { %5557 = vst [vmem:[#allocation47_spill] sm:$0xff] %v3379_v9  ;;  %5559 = vst [vmem:[#allocation49_spill] sm:$0xff] %v3387_v16  ;;  %v3407_v17 = vmul.f32 %v3059_v43, %v1040_v42  ;;  %v1518_v35 = vsel %vm1506_vm13, %v1493_v46, 0.0  ;;  %v5564_v59 = vrot.slane %v3310_v10, 2  ;;  %v5565_v56 = vrot.slane %v3265_v28, 2 }
 0x11f   : > { %5560 = vst [vmem:[#allocation50_spill] sm:$0xff] %v3397_v25  ;;  %5561 = vst [vmem:[#allocation51_spill] sm:$0xff] %v3401_v44  ;;  %v3420_v15 = vmul.f32 %v3106_v2, %v1074_v48  ;;  %v3423_v31 = vmul.f32 %v3106_v2, %v1040_v42  ;;  %v3429_v46 = vmul.f32 %v3144_v20, %v1040_v42  ;;  %v765_v28 = vrot.slane %v3401_v44, 6 }
 0x120   : > { %5562 = vst [vmem:[#allocation52_spill] sm:$0xff] %v3404_v4  ;;  %5563 = vst [vmem:[#allocation53_spill] sm:$0xff] %v3407_v17  ;;  %v1756_v34 = vsel %vm1741_vm10, %v5565_v56, %v5564_v59  ;;  %v3417_v9 = vpop.f32.mrb[18].mxu0  ;;  %v3426_v17 = vmul.f32 %v3144_v20, %v1074_v48  ;;  %v3436_v59 = vmul.f32 %v3074_v47, %v1481_v7  ;;  %v1028_v48 = vrot.slane %v3401_v44, 7 }
 0x121   : > { %5566 = vst [vmem:[#allocation54_spill] sm:$0xff] %v3417_v9  ;;  %5567 = vst [vmem:[#allocation55_spill] sm:$0xff] %v3420_v15  ;;  %v3433_v10 = vpop.f32.mrb[19].mxu0  ;;  %v3440_v56 = vsel %vm1767_vm14, %v1756_v34, 0.0  ;;  %v3445_v42 = vmul.f32 %v3074_v47, %v1518_v35  ;;  %v3448_v9 = vmul.f32 %v3109_v3, %v1481_v7  ;;  %v3451_v4 = vmul.f32 %v3147_v21, %v1481_v7 }
 0x122   : > { %5568 = vst [vmem:[#allocation56_spill] sm:$0xff] %v3423_v31  ;;  %5569 = vst [vmem:[#allocation57_spill] sm:$0xff] %v3429_v46  ;;  %v3458_v34 = vmul.f32 %v3109_v3, %v1518_v35  ;;  %v3471_v7 = vmul.f32 %v3040_v37, %v3401_v44  ;;  %v3475_v51 = vmul.f32 %v3095_v57, %v3401_v44  ;;  %vm677_vm15 = vcmp.gt.s32.totalorder %v3013_v29, 6 }
 0x123   : > { %5570 = vst [vmem:[#allocation58_spill] sm:$0xff] %v3433_v10  ;;  %5571 = vst [vmem:[#allocation59_spill] sm:$0xff] %v3436_v59  ;;  %v3455_v10 = vsel %vm3369_vm12, %v565_v33, 0.0  ;;  %v3461_v59 = vmul.f32 %v3147_v21, %v1518_v35  ;;  %v1469_v33 = vrot.slane %v3401_v44, 1  ;;  %v3505_v31 = vmul.f32 %v3138_v18, %v3401_v44 }
 0x124   : > { %5572 = vst [vmem:[#allocation60_spill] sm:$0xff] %v3440_v56  ;;  %5573 = vst [vmem:[#allocation61_spill] sm:$0xff] %v3445_v42  ;;  %v753_v16 = vrot.slane %v3455_v10, 6  ;;  %v1016_v42 = vrot.slane %v3455_v10, 7  ;;  %vm664_vm12 = vcmp.le.s32.totalorder %v3010_v27, 6  ;;  %vm665_vm2 = vcmp.le.s32.totalorder %v3010_v27, 7 }
 0x125   : > { %5574 = vst [vmem:[#allocation62_spill] sm:$0xff] %v3448_v9  ;;  %5575 = vst [vmem:[#allocation63_spill] sm:$0xff] %v3451_v4  ;;  %v3467_v9 = vmul.f32 %v3150_v22, %v3440_v56  ;;  %vm678_vm3 = vcmp.gt.s32.totalorder %v3013_v29, 7 }
 0x126   : > { %5576 = vst [vmem:[#allocation64_spill] sm:$0xff] %v3455_v10  ;;  %5577 = vst [vmem:[#allocation65_spill] sm:$0xff] %v3458_v34  ;;  %v778_v35 = vsel %vm774_vm4, %v753_v16, %v765_v28  ;;  %v790_v34 = vsel %vm774_vm4, %v765_v28, %v753_v16  ;;  %v1041_v56 = vsel %vm1037_vm5, %v1016_v42, %v1028_v48  ;;  %v1457_v16 = vrot.slane %v3455_v10, 1 }
 0x127   : > { %5578 = vst [vmem:[#allocation66_spill] sm:$0xff] %v3461_v59  ;;  %5579 = vst [vmem:[#allocation67_spill] sm:$0xff] %v3467_v9  ;;  %v1053_v9 = vsel %vm1037_vm5, %v1028_v48, %v1016_v42  ;;  %v815_v59 = vsel %vm799_vm8, %v790_v34, 0.0  ;;  %v912_v22 = vmul.f32 %v3038_v36, %v778_v35  ;;  %v946_v34 = vmul.f32 %v3099_v61, %v778_v35 }
 0x128   : > { %5580 = vst [vmem:[#allocation68_spill] sm:$0xff] %v3471_v7  ;;  %5581 = vst [vmem:[#allocation69_spill] sm:$0xff] %v3475_v51  ;;  %v878_v51 = vmul.f32 %v3101_v62, %v778_v35  ;;  %v877_v4 = vmul.f32 %v3101_v62, %v815_v59  ;;  %v911_v21 = vmul.f32 %v3038_v36, %v815_v59  ;;  %v5432_v7 = vrot.slane %v3455_v10, 2 }
 0x129   : > { %v945_v28 = vmul.f32 %v3099_v61, %v815_v59  ;;  %v3499_v42 = vadd.f32 %v912_v22, %v892_v19  ;;  %5582 = vst [vmem:[#allocation70_spill] sm:$0xff] %v3505_v31  ;;  %v3518_v22 = vadd.f32 %v946_v34, %v3362_v55  ;;  %v1076_v19 = vsel %vm1062_vm9, %v1053_v9, 0.0  ;;  %vm3852_vm0 = vmand %vm664_vm12, %vm677_vm15 }
 0x12a   : > { %v3497_v48 = vadd.f32 %v878_v51, %v842_v60  ;;  %v3507_v15 = vadd.f32 %v877_v4, %v841_v63  ;;  %v3509_v25 = vadd.f32 %v911_v21, %v891_v45  ;;  %v3515_v60 = vmul.f32 %v3176_v49, %v3401_v44  ;;  %vm4034_vm12 = vmand %vm665_vm2, %vm678_vm3 }
 0x12b   : > { %v3511_v46 = vadd.f32 %v945_v28, %v925_v58  ;;  %v580_v51 = vadd.f32 %v3204_v13, %v3048_v39  ;;  %v3526_v4 = vmul.f32 %v3040_v37, %v3455_v10  ;;  %v3530_v21 = vmul.f32 %v3095_v57, %v3455_v10 }
 0x12c   : > { %5583 = vst [vmem:[#allocation71_spill] sm:$0xff] %v3515_v60  ;;  %v3534_v45 = vmul.f32 %v3138_v18, %v3455_v10  ;;  %v3538_v58 = vmul.f32 %v3176_v49, %v3455_v10  ;;  %v3549_v55 = vmul.f32 %v3054_v41, %v778_v35  ;;  %v3553_v9 = vsel %vm1478_vm6, %v1457_v16, %v1469_v33 }
 0x12d   : > { %5584 = vst [vmem:[#allocation72_spill] sm:$0xff] %v3526_v4  ;;  %5585 = vst [vmem:[#allocation73_spill] sm:$0xff] %v3530_v21  ;;  %v1494_v63 = vsel %vm1478_vm6, %v1469_v33, %v1457_v16  ;;  %v5589_v28 = vrot.slane %v3401_v44, 2  ;;  %v3564_v31 = vmul.f32 %v3054_v41, %v815_v59  ;;  %v3567_v35 = vmul.f32 %v3059_v43, %v1076_v19 }
 0x12e   : > { %5588 = vst [vmem:[#allocation74_spill] sm:$0xff] %v3553_v9  ;;  %v3570_v60 = vmul.f32 %v3059_v43, %v1041_v56  ;;  %v3574_v4 = vsel %vm1506_vm13, %v1494_v63, 0.0  ;;  %v3577_v33 = vmul.f32 %v3106_v2, %v1076_v19  ;;  %v3580_v16 = vmul.f32 %v3106_v2, %v1041_v56 }
 0x12f   : > { %v1757_v34 = vsel %vm1741_vm10, %v5589_v28, %v5432_v7  ;;  %5590 = vst [vmem:[#allocation75_spill] sm:$0xff] %v3567_v35  ;;  %5592 = vst [vmem:[#allocation77_spill] sm:$0xff] %v3574_v4  ;;  %v3583_v28 = vmul.f32 %v3144_v20, %v1076_v19  ;;  %v3587_v59 = vsel %vm3544_vm7, %v580_v51, 0.0  ;;  %v3590_v7 = vmul.f32 %v3144_v20, %v1041_v56 }
 0x130   : > { %5591 = vst [vmem:[#allocation76_spill] sm:$0xff] %v3570_v60  ;;  %5593 = vst [vmem:[#allocation78_spill] sm:$0xff] %v3577_v33  ;;  %v3593_v10 = vmul.f32 %v3086_v54, %v1076_v19  ;;  %v3596_v63 = vmul.f32 %v3086_v54, %v1041_v56  ;;  %v3600_v44 = vmul.f32 %v3074_v47, %v3553_v9  ;;  %v3612_v35 = vsel %vm1767_vm14, %v1757_v34, 0.0 }
 0x131   : > { %5594 = vst [vmem:[#allocation79_spill] sm:$0xff] %v3580_v16  ;;  %5595 = vst [vmem:[#allocation80_spill] sm:$0xff] %v3587_v59  ;;  %v3604_v43 = vmul.f32 %v3074_v47, %v3574_v4  ;;  %v3608_v51 = vmul.f32 %v3109_v3, %v3553_v9  ;;  %v575_v56 = vadd.f32 %v3048_v39, %v3214_v23  ;;  %v1029_v47 = vrot.slane %v3587_v59, 7 }
 0x132   : > { %5596 = vst [vmem:[#allocation81_spill] sm:$0xff] %v3600_v44  ;;  %5599 = vst [vmem:[#allocation84_spill] sm:$0xff] %v3612_v35  ;;  %v3618_v19 = vmul.f32 %v3043_v38, %v3574_v4  ;;  %v766_v44 = vrot.slane %v3587_v59, 6  ;;  %v3630_v34 = vmul.f32 %v3095_v57, %v3587_v59  ;;  %v3634_v23 = vmul.f32 %v3138_v18, %v3587_v59 }
 0x133   : > { %5597 = vst [vmem:[#allocation82_spill] sm:$0xff] %v3604_v43  ;;  %5598 = vst [vmem:[#allocation83_spill] sm:$0xff] %v3608_v51  ;;  %v590_v43 = vadd.f32 %v3245_v14, %v3048_v39  ;;  %v3626_v51 = vmul.f32 %v3040_v37, %v3587_v59  ;;  %v3638_v4 = vsel %vm3544_vm7, %v575_v56, 0.0  ;;  %v3650_v35 = vmul.f32 %v3176_v49, %v3587_v59 }
 0x134   : > { %5600 = vst [vmem:[#allocation85_spill] sm:$0xff] %v3618_v19  ;;  %5602 = vst [vmem:[#allocation87_spill] sm:$0xff] %v3630_v34  ;;  %v3654_v34 = vmul.f32 %v3179_v50, %v3587_v59  ;;  %v754_v13 = vrot.slane %v3638_v4, 6  ;;  %v1017_v56 = vrot.slane %v3638_v4, 7  ;;  %v585_v19 = vadd.f32 %v3048_v39, %v3257_v52 }
 0x135   : > { %5601 = vst [vmem:[#allocation86_spill] sm:$0xff] %v3626_v51  ;;  %5603 = vst [vmem:[#allocation88_spill] sm:$0xff] %v3634_v23  ;;  %v1470_v23 = vrot.slane %v3587_v59, 1  ;;  %v3663_v9 = vadd.f32 %v3287_v24, %v3048_v39  ;;  %v3675_v59 = vsel %vm3644_vm11, %v590_v43, 0.0  ;;  %v3679_v52 = vadd.f32 %v3332_v6, %v3048_v39  ;;  %v3681_v24 = vpop.f32.mrb[2].mxu1 }
 0x136   : > { %5604 = vst [vmem:[#allocation89_spill] sm:$0xff] %v3638_v4  ;;  %5607 = vst [vmem:[#allocation90_spill] sm:$0xff] %v3650_v35  ;;  %v3667_v35 = vadd.f32 %v3048_v39, %v3297_v5  ;;  %v791_v38 = vsel %vm774_vm4, %v766_v44, %v754_v13  ;;  %v3687_v51 = vmul.f32 %v3040_v37, %v3638_v4  ;;  %vm666_vm7 = vcmp.le.s32.totalorder %v3010_v27, 8 }
 0x137   : > { %5608 = vst [vmem:[#allocation91_spill] sm:$0xff] %v3654_v34  ;;  %v779_v34 = vsel %vm774_vm4, %v754_v13, %v766_v44  ;;  %5609 = vst [vmem:[#allocation92_spill] sm:$0xff] %v3675_v59  ;;  %v817_v5 = vsel %vm799_vm8, %v791_v38, 0.0  ;;  %v3691_v44 = vadd.f32 %v3048_v39, %v3344_v12  ;;  %v3695_v43 = vadd.f32 %v3373_v0, %v3048_v39  ;;  %v3697_v13 = vpop.f32.mrb[3].mxu1 }
 0x138   : > { %5610 = vst [vmem:[#allocation93_spill] sm:$0xff] %v3679_v52  ;;  %5611 = vst [vmem:[#allocation94_spill] sm:$0xff] %v3681_v24  ;;  %v1054_v6 = vsel %vm1037_vm5, %v1029_v47, %v1017_v56  ;;  %v3703_v38 = vmul.f32 %v3095_v57, %v3638_v4  ;;  %v3707_v24 = vmul.f32 %v3138_v18, %v3638_v4  ;;  %v1458_v52 = vrot.slane %v3638_v4, 1 }
 0x139   : > { %5612 = vst [vmem:[#allocation95_spill] sm:$0xff] %v3687_v51  ;;  %5613 = vst [vmem:[#allocation96_spill] sm:$0xff] %v3691_v44  ;;  %v3711_v12 = vmul.f32 %v3176_v49, %v3638_v4  ;;  %v879_v0 = vmul.f32 %v3101_v62, %v817_v5  ;;  %v880_v3 = vmul.f32 %v3101_v62, %v779_v34  ;;  %vm680_vm2 = vcmp.gt.s32.totalorder %v3013_v29, 9 }
 0x13a   : > { %5614 = vst [vmem:[#allocation97_spill] sm:$0xff] %v3695_v43  ;;  %5615 = vst [vmem:[#allocation98_spill] sm:$0xff] %v3697_v13  ;;  %v914_v13 = vmul.f32 %v3038_v36, %v779_v34  ;;  %v981_v51 = vmul.f32 %v3083_v53, %v817_v5  ;;  %v913_v39 = vmul.f32 %v3038_v36, %v817_v5 }
 0x13b   : > { %5616 = vst [vmem:[#allocation99_spill] sm:$0xff] %v3703_v38  ;;  %5617 = vst [vmem:[#allocation100_spill] sm:$0xff] %v3707_v24  ;;  %v947_v38 = vmul.f32 %v3099_v61, %v817_v5  ;;  %v948_v60 = vmul.f32 %v3099_v61, %v779_v34  ;;  %v982_v24 = vmul.f32 %v3083_v53, %v779_v34 }
 0x13c   : > { %5618 = vst [vmem:[#allocation101_spill] sm:$0xff] %v3711_v12  ;;  %v997_v43 = vadd.f32 %v981_v51, %v3511_v46  ;;  %v3724_v21 = vsel %vm1037_vm5, %v1017_v56, %v1029_v47  ;;  %v3728_v44 = vmul.f32 %v3179_v50, %v3638_v4  ;;  %v3732_v16 = vmul.f32 %v3054_v41, %v817_v5 }
 0x13d   : > { %5619 = vst [vmem:[#allocation102_spill] sm:$0xff] %v3724_v21  ;;  %v3735_v33 = vmul.f32 %v3054_v41, %v779_v34  ;;  %v998_v12 = vadd.f32 %v982_v24, %v3518_v22  ;;  %v3740_v46 = vsel %vm1062_vm9, %v1054_v6, 0.0  ;;  %v895_v47 = vadd.f32 %v879_v0, %v3564_v31  ;;  %v5636_v41 = vld [vmem:[#allocation50_spill] sm:$0xff] }
 0x13e   : > { %5620 = vst [vmem:[#allocation103_spill] sm:$0xff] %v3740_v46  ;;  %v896_v51 = vadd.f32 %v880_v3, %v3549_v55  ;;  %v930_v56 = vadd.f32 %v914_v13, %v3497_v48  ;;  %v1114_v4 = vadd.f32 %v3189_v1, %v997_v43  ;;  %v929_v34 = vadd.f32 %v913_v39, %v3507_v15 }
 0x13f   : > { %v963_v22 = vadd.f32 %v947_v38, %v3509_v25  ;;  %v964_v24 = vadd.f32 %v948_v60, %v3499_v42  ;;  %v1115_v5 = vadd.f32 %v3192_v32, %v998_v12  ;;  %v3754_v31 = vmul.f32 %v3106_v2, %v3740_v46 }
 0x140   : > { %v3758_v3 = vmul.f32 %v3106_v2, %v3724_v21  ;;  %v1150_v1 = vadd.f32 %v3280_v8, %v1114_v4  ;;  %v3763_v48 = vmul.f32 %v3144_v20, %v3740_v46  ;;  %v3768_v25 = vmul.f32 %v3144_v20, %v3724_v21  ;;  %v5621_v4 = vld [vmem:[#allocation57_spill] sm:$0xff] }
 0x141   : > { %v1151_v39 = vadd.f32 %v3283_v30, %v1115_v5  ;;  %v3772_v32 = vmul.f32 %v3086_v54, %v3740_v46  ;;  %v1495_v15 = vsel %vm1478_vm6, %v1470_v23, %v1458_v52  ;;  %v3779_v8 = vmul.f32 %v3086_v54, %v3724_v21 }
 0x142   : > { %v1186_v42 = vadd.f32 %v3426_v17, %v1150_v1  ;;  %v1242_v30 = vmul.f32 %v3121_v11, %v3740_v46  ;;  %v767_v60 = vrot.slane %v3675_v59, 6  ;;  %v1243_v43 = vmul.f32 %v3121_v11, %v3724_v21 }
 0x143   : > { %v1187_v55 = vadd.f32 %v5621_v4, %v1151_v39  ;;  %v3789_v13 = vsel %vm1478_vm6, %v1458_v52, %v1470_v23  ;;  %v3793_v17 = vsel %vm3644_vm11, %v585_v19, 0.0  ;;  %v3798_v38 = vsel %vm1506_vm13, %v1495_v15, 0.0  ;;  %v5629_v4 = vld [vmem:[#allocation21_spill] sm:$0xff] }
 0x144   : > { %5622 = vst [vmem:[#allocation57_spill] sm:$0xff] %v3789_v13  ;;  %5623 = vst [vmem:[#allocation104_spill] sm:$0xff] %v3793_v17  ;;  %v1222_v6 = vadd.f32 %v3593_v10, %v1186_v42  ;;  %v1030_v12 = vrot.slane %v3675_v59, 7  ;;  %v755_v0 = vrot.slane %v3793_v17, 6  ;;  %v3805_v23 = vmul.f32 %v3040_v37, %v3675_v59 }
 0x145   : > { %5624 = vst [vmem:[#allocation105_spill] sm:$0xff] %v3798_v38  ;;  %v1223_v5 = vadd.f32 %v3596_v63, %v1187_v55  ;;  %v3809_v19 = vmul.f32 %v3095_v57, %v3675_v59  ;;  %v3813_v10 = vmul.f32 %v3138_v18, %v3675_v59  ;;  %v3817_v52 = vmul.f32 %v3176_v49, %v3675_v59 }
 0x146   : > { %5625 = vst [vmem:[#allocation106_spill] sm:$0xff] %v3805_v23  ;;  %v1258_v14 = vadd.f32 %v1242_v30, %v1222_v6  ;;  %v3821_v63 = vsel %vm774_vm4, %v755_v0, %v767_v60  ;;  %v792_v1 = vsel %vm774_vm4, %v767_v60, %v755_v0  ;;  %v1018_v30 = vrot.slane %v3793_v17, 7 }
 0x147   : > { %5626 = vst [vmem:[#allocation107_spill] sm:$0xff] %v3809_v19  ;;  %5627 = vst [vmem:[#allocation108_spill] sm:$0xff] %v3813_v10  ;;  %v1259_v39 = vadd.f32 %v1243_v43, %v1223_v5  ;;  %v3827_v15 = vsel %vm799_vm8, %v792_v1, 0.0  ;;  %v916_v42 = vmul.f32 %v3038_v36, %v3821_v63  ;;  %v3835_v6 = vmul.f32 %v3179_v50, %v3675_v59  ;;  %v5631_v43 = vld [vmem:[#allocation20_spill] sm:$0xff] }
 0x148   : > { %5628 = vst [vmem:[#allocation109_spill] sm:$0xff] %v3817_v52  ;;  %v1294_v55 = vadd.f32 %v5629_v4, %v1258_v14  ;;  %v915_v10 = vmul.f32 %v3038_v36, %v3827_v15  ;;  %v949_v60 = vmul.f32 %v3099_v61, %v3827_v15  ;;  %v950_v1 = vmul.f32 %v3099_v61, %v3821_v63  ;;  %v5634_v52 = vld [vmem:[#allocation29_spill] sm:$0xff] }
 0x149   : > { %5630 = vst [vmem:[#allocation21_spill] sm:$0xff] %v3835_v6  ;;  %v1295_v0 = vadd.f32 %v5631_v43, %v1259_v39  ;;  %v3842_v5 = vadd.f32 %v916_v42, %v896_v51  ;;  %v983_v14 = vmul.f32 %v3083_v53, %v3827_v15  ;;  %v984_v39 = vmul.f32 %v3083_v53, %v3821_v63  ;;  %v5635_v42 = vld [vmem:[#allocation27_spill] sm:$0xff] }
 0x14a   : > { %v1330_v6 = vadd.f32 %v5634_v52, %v1294_v55  ;;  %v3857_v38 = vadd.f32 %v915_v10, %v895_v47  ;;  %v3859_v51 = vadd.f32 %v949_v60, %v929_v34  ;;  %v3864_v23 = vadd.f32 %v950_v1, %v930_v56  ;;  %v5638_v34 = vld [vmem:[#allocation46_spill] sm:$0xff]  ;;  %v5640_v55 = vld [vmem:[#allocation31_spill] sm:$0xff] }
 0x14b   : > { %v1331_v43 = vadd.f32 %v5635_v42, %v1295_v0  ;;  %v999_v19 = vadd.f32 %v983_v14, %v963_v22  ;;  %v1055_v13 = vsel %vm1037_vm5, %v1030_v12, %v1018_v30  ;;  %v1471_v46 = vrot.slane %v3675_v59, 1  ;;  %v5646_v0 = vld [vmem:[#allocation55_spill] sm:$0xff] }
 0x14c   : > { %v1366_v21 = vadd.f32 %v5636_v41, %v1330_v6  ;;  %v1000_v52 = vadd.f32 %v984_v39, %v964_v24  ;;  %v3873_v47 = vsel %vm3852_vm0, %v3663_v9, 0.0  ;;  %v3881_v22 = vmul.f32 %v3040_v37, %v3793_v17 }
 0x14d   : > { %5637 = vst [vmem:[#allocation20_spill] sm:$0xff] %v3873_v47  ;;  %v3876_v10 = vadd.f32 %v5638_v34, %v1331_v43  ;;  %v1116_v56 = vadd.f32 %v5640_v55, %v999_v19  ;;  %v3886_v41 = vsel %vm3852_vm0, %v3667_v35, 0.0  ;;  %v3891_v9 = vsel %vm1037_vm5, %v1018_v30, %v1030_v12  ;;  %v5645_v19 = vld [vmem:[#allocation32_spill] sm:$0xff] }
 0x14e   : > { %5641 = vst [vmem:[#allocation27_spill] sm:$0xff] %v3881_v22  ;;  %5642 = vst [vmem:[#allocation50_spill] sm:$0xff] %v3886_v41  ;;  %v1402_v24 = vadd.f32 %v3538_v58, %v1366_v21  ;;  %v3895_v6 = vsel %vm1062_vm9, %v1055_v13, 0.0  ;;  %v1117_v60 = vadd.f32 %v5645_v19, %v1000_v52  ;;  %v3901_v14 = vmul.f32 %v3095_v57, %v3793_v17  ;;  %v5647_v30 = vld [vmem:[#allocation56_spill] sm:$0xff]  ;;  %v5648_v52 = vld [vmem:[#allocation22_spill] sm:$0xff] }
 0x14f   : > { %5639 = vst [vmem:[#allocation29_spill] sm:$0xff] %v3876_v10  ;;  %5643 = vst [vmem:[#allocation46_spill] sm:$0xff] %v3891_v9  ;;  %v1152_v1 = vadd.f32 %v5646_v0, %v1116_v56  ;;  %v3905_v35 = vmul.f32 %v3138_v18, %v3793_v17  ;;  %v3909_v21 = vmul.f32 %v3176_v49, %v3793_v17  ;;  %v1459_v0 = vrot.slane %v3793_v17, 1 }
 0x150   : > { %5644 = vst [vmem:[#allocation31_spill] sm:$0xff] %v3895_v6  ;;  %v1438_v58 = vadd.f32 %v3728_v44, %v1402_v24  ;;  %v3914_v13 = vmul.f32 %v3101_v62, %v3827_v15  ;;  %v3918_v12 = vmul.f32 %v3101_v62, %v3821_v63  ;;  %v1153_v4 = vadd.f32 %v5647_v30, %v1117_v60 }
 0x151   : > { %v3925_v39 = vmul.f32 %v3106_v2, %v3895_v6  ;;  %v3929_v44 = vmul.f32 %v3106_v2, %v3891_v9  ;;  %v3933_v42 = vmul.f32 %v3144_v20, %v3895_v6  ;;  %v1188_v43 = vadd.f32 %v3583_v28, %v1152_v1 }
 0x152   : > { %v3937_v34 = vadd.f32 %v5648_v52, %v1438_v58  ;;  %v3941_v55 = vmul.f32 %v3144_v20, %v3891_v9  ;;  %v1189_v56 = vadd.f32 %v3590_v7, %v1153_v4  ;;  %v768_v24 = vrot.slane %v3873_v47, 6 }
 0x153   : > { %v3947_v19 = vmul.f32 %v3086_v54, %v3895_v6  ;;  %v1224_v60 = vadd.f32 %v3772_v32, %v1188_v43  ;;  %v1244_v28 = vmul.f32 %v3121_v11, %v3895_v6  ;;  %v1211_v1 = vmul.f32 %v3086_v54, %v3891_v9  ;;  %v5696_v6 = vld [vmem:[#allocation75_spill] sm:$0xff] }
 0x154   : > { %5649 = vst [vmem:[#allocation32_spill] sm:$0xff] %v3937_v34  ;;  %v1225_v58 = vadd.f32 %v3779_v8, %v1189_v56  ;;  %v1245_v7 = vmul.f32 %v3121_v11, %v3891_v9  ;;  %v756_v30 = vrot.slane %v3886_v41, 6  ;;  %v1424_v52 = vmul.f32 %v3179_v50, %v3793_v17 }
 0x155   : > { %v1260_v4 = vadd.f32 %v1244_v28, %v1224_v60  ;;  %v1031_v32 = vrot.slane %v3873_v47, 7  ;;  %v1019_v43 = vrot.slane %v3886_v41, 7  ;;  %v3967_v10 = vmul.f32 %v3040_v37, %v3873_v47  ;;  %v5652_v60 = vld [vmem:[#allocation28_spill] sm:$0xff] }
 0x156   : > { %v3963_v59 = vadd.f32 %v1245_v7, %v1225_v58  ;;  %v3971_v8 = vsel %vm774_vm4, %v756_v30, %v768_v24  ;;  %v793_v56 = vsel %vm774_vm4, %v768_v24, %v756_v30  ;;  %v3978_v17 = vsel %vm1478_vm6, %v1459_v0, %v1471_v46 }
 0x157   : > { %5651 = vst [vmem:[#allocation56_spill] sm:$0xff] %v3967_v10  ;;  %v1296_v28 = vadd.f32 %v5652_v60, %v1260_v4  ;;  %5653 = vst [vmem:[#allocation22_spill] sm:$0xff] %v3978_v17  ;;  %v3982_v58 = vsel %vm799_vm8, %v793_v56, 0.0  ;;  %v952_v7 = vmul.f32 %v3099_v61, %v3971_v8  ;;  %v986_v4 = vmul.f32 %v3083_v53, %v3971_v8  ;;  %v5655_v60 = vld [vmem:[#allocation49_spill] sm:$0xff] }
 0x158   : > { %5650 = vst [vmem:[#allocation55_spill] sm:$0xff] %v3963_v59  ;;  %v3988_v59 = vsel %vm1478_vm6, %v1471_v46, %v1459_v0  ;;  %v951_v24 = vmul.f32 %v3099_v61, %v3982_v58  ;;  %v985_v30 = vmul.f32 %v3083_v53, %v3982_v58  ;;  %v4002_v10 = vsel %vm1037_vm5, %v1019_v43, %v1031_v32 }
 0x159   : > { %5654 = vst [vmem:[#allocation28_spill] sm:$0xff] %v3988_v59  ;;  %v1332_v34 = vadd.f32 %v5655_v60, %v1296_v28  ;;  %v3998_v56 = vadd.f32 %v952_v7, %v3842_v5  ;;  %5656 = vst [vmem:[#allocation49_spill] sm:$0xff] %v4002_v10  ;;  %v1056_v46 = vsel %vm1037_vm5, %v1031_v32, %v1019_v43  ;;  %vm679_vm11 = vcmp.gt.s32.totalorder %v3013_v29, 8 }
 0x15a   : > { %v4008_v0 = vmul.f32 %v3095_v57, %v3873_v47  ;;  %v4011_v59 = vadd.f32 %v951_v24, %v3857_v38  ;;  %v1001_v22 = vadd.f32 %v985_v30, %v3859_v51  ;;  %v1002_v28 = vadd.f32 %v986_v4, %v3864_v23  ;;  %v5665_v24 = vld [vmem:[#allocation53_spill] sm:$0xff]  ;;  %vm4131_vm15 = vmand %vm666_vm7, %vm679_vm11 }
 0x15b   : > { %v1368_v5 = vadd.f32 %v3534_v45, %v1332_v34  ;;  %v4020_v32 = vmul.f32 %v3138_v18, %v3873_v47  ;;  %v4024_v43 = vmul.f32 %v3176_v49, %v3873_v47  ;;  %v4028_v38 = vmul.f32 %v3179_v50, %v3873_v47  ;;  %v5664_v34 = vld [vmem:[#allocation52_spill] sm:$0xff]  ;;  %v5666_v4 = vld [vmem:[#allocation101_spill] sm:$0xff] }
 0x15c   : > { %5657 = vst [vmem:[#allocation110_spill] sm:$0xff] %v4008_v0  ;;  %v1472_v45 = vrot.slane %v3873_v47, 1  ;;  %v4041_v51 = vsel %vm1062_vm9, %v1056_v46, 0.0  ;;  %v1118_v7 = vadd.f32 %v5664_v34, %v1001_v22  ;;  %v1119_v30 = vadd.f32 %v5665_v24, %v1002_v28  ;;  %v5669_v46 = vld [vmem:[#allocation78_spill] sm:$0xff]  ;;  %v5670_v0 = vld [vmem:[#allocation79_spill] sm:$0xff]  ;;  %v5671_v34 = vld [vmem:[#allocation93_spill] sm:$0xff] }
 0x15d   : > { %5658 = vst [vmem:[#allocation111_spill] sm:$0xff] %v4020_v32  ;;  %5659 = vst [vmem:[#allocation112_spill] sm:$0xff] %v4024_v43  ;;  %v1404_v60 = vadd.f32 %v5666_v4, %v1368_v5  ;;  %v4048_v32 = vmul.f32 %v3040_v37, %v3886_v41  ;;  %v4052_v43 = vmul.f32 %v3095_v57, %v3886_v41  ;;  %v1460_v28 = vrot.slane %v3886_v41, 1 }
 0x15e   : > { %5660 = vst [vmem:[#allocation113_spill] sm:$0xff] %v4028_v38  ;;  %5663 = vst [vmem:[#allocation114_spill] sm:$0xff] %v4041_v51  ;;  %v4056_v38 = vmul.f32 %v3138_v18, %v3886_v41  ;;  %v1154_v47 = vadd.f32 %v5669_v46, %v1118_v7  ;;  %v1155_v22 = vadd.f32 %v5670_v0, %v1119_v30  ;;  %v4064_v5 = vsel %vm4034_vm12, %v5671_v34, 0.0 }
 0x15f   : > { %5667 = vst [vmem:[#allocation52_spill] sm:$0xff] %v4048_v32  ;;  %5668 = vst [vmem:[#allocation53_spill] sm:$0xff] %v4052_v43  ;;  %v1440_v24 = vadd.f32 %v1424_v52, %v1404_v60  ;;  %v4068_v4 = vmul.f32 %v3038_v36, %v3982_v58  ;;  %v4072_v37 = vmul.f32 %v3038_v36, %v3971_v8  ;;  %v5675_v60 = vld [vmem:[#allocation33_spill] sm:$0xff]  ;;  %v769_v43 = vrot.slane %v4064_v5, 6 }
 0x160   : > { %5672 = vst [vmem:[#allocation101_spill] sm:$0xff] %v4064_v5  ;;  %v4076_v7 = vmul.f32 %v3144_v20, %v4041_v51  ;;  %v1190_v0 = vadd.f32 %v3763_v48, %v1154_v47  ;;  %v1191_v30 = vadd.f32 %v3768_v25, %v1155_v22  ;;  %v4082_v46 = vsel %vm1478_vm6, %v1460_v28, %v1472_v45 }
 0x161   : > { %5673 = vst [vmem:[#allocation78_spill] sm:$0xff] %v4082_v46  ;;  %v4086_v52 = vsel %vm1478_vm6, %v1472_v45, %v1460_v28  ;;  %v4089_v34 = vadd.f32 %v5675_v60, %v1440_v24  ;;  %v1246_v32 = vmul.f32 %v3121_v11, %v4041_v51  ;;  %v1032_v48 = vrot.slane %v4064_v5, 7  ;;  %v5677_v46 = vld [vmem:[#allocation96_spill] sm:$0xff] }
 0x162   : > { %5674 = vst [vmem:[#allocation79_spill] sm:$0xff] %v4086_v52  ;;  %v1226_v25 = vadd.f32 %v3947_v19, %v1190_v0  ;;  %v1227_v47 = vadd.f32 %v1211_v1, %v1191_v30  ;;  %v1247_v22 = vmul.f32 %v3121_v11, %v4002_v10  ;;  %v4101_v45 = vsel %vm4034_vm12, %v5677_v46, 0.0 }
 0x163   : > { %5676 = vst [vmem:[#allocation93_spill] sm:$0xff] %v4089_v34  ;;  %v4105_v28 = vmul.f32 %v3144_v20, %v4002_v10  ;;  %v757_v60 = vrot.slane %v4101_v45, 6  ;;  %v1020_v52 = vrot.slane %v4101_v45, 7  ;;  %v1212_v19 = vmul.f32 %v3086_v54, %v4041_v51  ;;  %v5688_v51 = vld [vmem:[#allocation97_spill] sm:$0xff] }
 0x164   : > { %v1262_v1 = vadd.f32 %v1246_v32, %v1226_v25  ;;  %v4112_v0 = vadd.f32 %v1247_v22, %v1227_v47  ;;  %v1213_v25 = vmul.f32 %v3086_v54, %v4002_v10  ;;  %v5682_v47 = vld [vmem:[#allocation48_spill] sm:$0xff]  ;;  %v4161_v10 = vmul.f32 %v3095_v57, %v4064_v5  ;;  %v5700_v32 = vld [vmem:[#allocation59_spill] sm:$0xff] }
 0x165   : > { %v4117_v30 = vsel %vm774_vm4, %v757_v60, %v769_v43  ;;  %v794_v46 = vsel %vm774_vm4, %v769_v43, %v757_v60  ;;  %v4123_v24 = vsel %vm1037_vm5, %v1020_v52, %v1032_v48  ;;  %v1057_v34 = vsel %vm1037_vm5, %v1032_v48, %v1020_v52 }
 0x166   : > { %5678 = vst [vmem:[#allocation33_spill] sm:$0xff] %v4112_v0  ;;  %5679 = vst [vmem:[#allocation96_spill] sm:$0xff] %v4117_v30  ;;  %v1298_v43 = vadd.f32 %v5682_v47, %v1262_v1  ;;  %v4140_v22 = vsel %vm799_vm8, %v794_v46, 0.0  ;;  %v988_v52 = vmul.f32 %v3083_v53, %v4117_v30  ;;  %v4146_v48 = vmul.f32 %v3176_v49, %v3886_v41  ;;  %v5686_v47 = vld [vmem:[#allocation73_spill] sm:$0xff] }
 0x167   : > { %5683 = vst [vmem:[#allocation48_spill] sm:$0xff] %v4140_v22  ;;  %v1426_v60 = vmul.f32 %v3179_v50, %v3886_v41  ;;  %v987_v23 = vmul.f32 %v3083_v53, %v4140_v22  ;;  %v5684_v0 = vrot.slane %v4101_v45, 1  ;;  %v5685_v1 = vrot.slane %v4064_v5, 1  ;;  %5687 = vst [vmem:[#allocation73_spill] sm:$0xff] %v4161_v10 }
 0x168   : > { %v1334_v20 = vadd.f32 %v5686_v47, %v1298_v43  ;;  %v1004_v2 = vadd.f32 %v988_v52, %v3998_v56  ;;  %v4167_v41 = vsel %vm4131_vm15, %v5688_v51, 0.0  ;;  %v4171_v9 = vmul.f32 %v3138_v18, %v4064_v5  ;;  %v5693_v56 = vld [vmem:[#allocation100_spill] sm:$0xff] }
 0x169   : > { %v1498_v46 = vsel %vm1478_vm6, %v5685_v1, %v5684_v0  ;;  %5689 = vst [vmem:[#allocation97_spill] sm:$0xff] %v4167_v41  ;;  %v4175_v0 = vmul.f32 %v3176_v49, %v4064_v5  ;;  %v4179_v43 = vmul.f32 %v3179_v50, %v4064_v5  ;;  %v1003_v1 = vadd.f32 %v987_v23, %v4011_v59  ;;  %v5694_v47 = vld [vmem:[#allocation76_spill] sm:$0xff]  ;;  %v5697_v59 = vld [vmem:[#allocation47_spill] sm:$0xff] }
 0x16a   : > { %5690 = vst [vmem:[#allocation115_spill] sm:$0xff] %v4171_v9  ;;  %v1370_v52 = vadd.f32 %v5693_v56, %v1334_v20  ;;  %v4185_v51 = vsel %vm1062_vm9, %v1057_v34, 0.0  ;;  %v1121_v10 = vadd.f32 %v5694_v47, %v1004_v2  ;;  %v4190_v9 = vmul.f32 %v3176_v49, %v4101_v45  ;;  %v5698_v23 = vld [vmem:[#allocation8_spill] sm:$0xff] }
 0x16b   : > { %5691 = vst [vmem:[#allocation116_spill] sm:$0xff] %v4175_v0  ;;  %5692 = vst [vmem:[#allocation117_spill] sm:$0xff] %v4179_v43  ;;  %v1120_v0 = vadd.f32 %v5696_v6, %v1003_v1  ;;  %v1249_v5 = vmul.f32 %v3121_v11, %v4123_v24  ;;  %v770_v43 = vrot.slane %v4167_v41, 6  ;;  %v615_v20 = vadd.f32 %v5698_v23, %v5697_v59 }
 0x16c   : > { %5695 = vst [vmem:[#allocation100_spill] sm:$0xff] %v4190_v9  ;;  %v1406_v56 = vadd.f32 %v3909_v21, %v1370_v52  ;;  %v1157_v34 = vadd.f32 %v3758_v3, %v1121_v10  ;;  %v897_v2 = vadd.f32 %v3914_v13, %v3732_v16  ;;  %v898_v47 = vadd.f32 %v3918_v12, %v3735_v33 }
 0x16d   : > { %v1156_v6 = vadd.f32 %v3754_v31, %v1120_v0  ;;  %v4207_v1 = vsel %vm4131_vm15, %v615_v20, 0.0  ;;  %v953_v9 = vmul.f32 %v3099_v61, %v4140_v22  ;;  %v954_v21 = vmul.f32 %v3099_v61, %v4117_v30 }
 0x16e   : > { %5699 = vst [vmem:[#allocation76_spill] sm:$0xff] %v4207_v1  ;;  %v1442_v52 = vadd.f32 %v1426_v60, %v1406_v56  ;;  %v1193_v3 = vadd.f32 %v3941_v55, %v1157_v34  ;;  %v758_v16 = vrot.slane %v4207_v1, 6  ;;  %v933_v10 = vadd.f32 %v4068_v4, %v897_v2 }
 0x16f   : > { %v1192_v33 = vadd.f32 %v3933_v42, %v1156_v6  ;;  %v1033_v31 = vrot.slane %v4167_v41, 7  ;;  %v934_v13 = vadd.f32 %v4072_v37, %v898_v47  ;;  %v1021_v12 = vrot.slane %v4207_v1, 7 }
 0x170   : > { %v4221_v0 = vadd.f32 %v5700_v32, %v1442_v52  ;;  %v1229_v59 = vadd.f32 %v1213_v25, %v1193_v3  ;;  %v4225_v60 = vsel %vm774_vm4, %v758_v16, %v770_v43  ;;  %v795_v55 = vsel %vm774_vm4, %v770_v43, %v758_v16  ;;  %v5706_v52 = vld [vmem:[#allocation10_spill] sm:$0xff]  ;;  %v5707_v16 = vld [vmem:[#allocation72_spill] sm:$0xff] }
 0x171   : > { %v1228_v4 = vadd.f32 %v1212_v19, %v1192_v33  ;;  %v1248_v42 = vmul.f32 %v3121_v11, %v4185_v51  ;;  %v4233_v37 = vsel %vm799_vm8, %v795_v55, 0.0  ;;  %v969_v23 = vadd.f32 %v953_v9, %v933_v10 }
 0x172   : > { %5701 = vst [vmem:[#allocation75_spill] sm:$0xff] %v4221_v0  ;;  %v4235_v20 = vadd.f32 %v1249_v5, %v1229_v59  ;;  %v1428_v25 = vmul.f32 %v3179_v50, %v4101_v45  ;;  %v970_v56 = vadd.f32 %v954_v21, %v934_v13  ;;  %v989_v34 = vmul.f32 %v3083_v53, %v4233_v37  ;;  %v5705_v21 = vld [vmem:[#allocation103_spill] sm:$0xff] }
 0x173   : > { %v1264_v2 = vadd.f32 %v1248_v42, %v1228_v4  ;;  %v990_v19 = vmul.f32 %v3083_v53, %v4225_v60  ;;  %v4245_v43 = vsel %vm1037_vm5, %v1021_v12, %v1033_v31  ;;  %v1058_v9 = vsel %vm1037_vm5, %v1033_v31, %v1021_v12  ;;  %v5709_v31 = vld [vmem:[#allocation102_spill] sm:$0xff]  ;;  %v5712_v4 = vld [vmem:[#allocation99_spill] sm:$0xff] }
 0x174   : > { %5702 = vst [vmem:[#allocation47_spill] sm:$0xff] %v4235_v20  ;;  %v4251_v5 = vsel %vm1506_vm13, %v1498_v46, 0.0  ;;  %v4255_v47 = vmul.f32 %v3095_v57, %v4167_v41  ;;  %v1005_v6 = vadd.f32 %v989_v34, %v969_v23  ;;  %v1106_v3 = vmul.f32 %v5706_v52, %v5705_v21  ;;  %v5716_v23 = vld [vmem:[#allocation81_spill] sm:$0xff] }
 0x175   : > { %5703 = vst [vmem:[#allocation8_spill] sm:$0xff] %v4251_v5  ;;  %v1300_v10 = vadd.f32 %v5707_v16, %v1264_v2  ;;  %v4262_v33 = vmul.f32 %v3138_v18, %v4167_v41  ;;  %v1006_v13 = vadd.f32 %v990_v19, %v970_v56  ;;  %v1107_v12 = vmul.f32 %v5706_v52, %v5709_v31 }
 0x176   : > { %5704 = vst [vmem:[#allocation59_spill] sm:$0xff] %v4255_v47  ;;  %v4268_v46 = vmul.f32 %v3176_v49, %v4167_v41  ;;  %v4272_v32 = vmul.f32 %v3179_v50, %v4167_v41  ;;  %v1474_v59 = vrot.slane %v4167_v41, 1  ;;  %v1122_v55 = vadd.f32 %v1106_v3, %v1005_v6 }
 0x177   : > { %5708 = vst [vmem:[#allocation103_spill] sm:$0xff] %v4262_v33  ;;  %v1336_v42 = vadd.f32 %v5712_v4, %v1300_v10  ;;  %v4279_v56 = vsel %vm1062_vm9, %v1058_v9, 0.0  ;;  %v1123_v34 = vadd.f32 %v1107_v12, %v1006_v13  ;;  %v4283_v2 = vmul.f32 %v3099_v61, %v4233_v37  ;;  %v5713_v4 = vld [vmem:[#allocation54_spill] sm:$0xff]  ;;  %v5727_v33 = vld [vmem:[#allocation100_spill] sm:$0xff] }
 0x178   : > { %5710 = vst [vmem:[#allocation10_spill] sm:$0xff] %v4268_v46  ;;  %5711 = vst [vmem:[#allocation72_spill] sm:$0xff] %v4272_v32  ;;  %v4287_v19 = vmul.f32 %v3099_v61, %v4225_v60  ;;  %v1158_v21 = vadd.f32 %v3925_v39, %v1122_v55  ;;  %v1462_v6 = vrot.slane %v4207_v1, 1  ;;  %v1214_v9 = vmul.f32 %v3086_v54, %v4185_v51 }
 0x179   : > { %v1372_v3 = vadd.f32 %v3905_v35, %v1336_v42  ;;  %v1159_v16 = vadd.f32 %v3929_v44, %v1123_v34  ;;  %v1215_v10 = vmul.f32 %v3086_v54, %v4123_v24  ;;  %v4300_v31 = vmul.f32 %v3086_v54, %v4279_v56 }
 0x17a   : > { %v1194_v13 = vadd.f32 %v4076_v7, %v1158_v21  ;;  %v4304_v39 = vsel %vm1478_vm6, %v1462_v6, %v1474_v59  ;;  %v1499_v35 = vsel %vm1478_vm6, %v1474_v59, %v1462_v6  ;;  %v1250_v55 = vmul.f32 %v3121_v11, %v4279_v56  ;;  %v4315_v7 = vld [vmem:[%s5509_s2] ss:$0 sm:$0xff]  ;;  %v5714_v59 = vld [vmem:[#allocation58_spill] sm:$0xff] }
 0x17b   : > { %v1408_v44 = vadd.f32 %v4146_v48, %v1372_v3  ;;  %v1195_v12 = vadd.f32 %v4105_v28, %v1159_v16  ;;  %v630_v42 = vadd.f32 %v4315_v7, %v5713_v4  ;;  %vm667_vm0 = vcmp.le.s32.totalorder %v3010_v27, 9 }
 0x17c   : > { %v1230_v34 = vadd.f32 %v1214_v9, %v1194_v13  ;;  %v625_v48 = vadd.f32 %v4315_v7, %v5714_v59  ;;  %v4325_v21 = vmul.f32 %v3086_v54, %v4245_v43  ;;  %v1251_v3 = vmul.f32 %v3121_v11, %v4245_v43  ;;  %vm692_vm3 = vmand %vm667_vm0, %vm680_vm2 }
 0x17d   : > { %v1444_v28 = vadd.f32 %v1428_v25, %v1408_v44  ;;  %v1231_v6 = vadd.f32 %v1215_v10, %v1195_v12  ;;  %v4329_v4 = vsel %vm692_vm3, %v630_v42, 0.0  ;;  %v883_v13 = vmul.f32 %v3101_v62, %v3982_v58  ;;  %v5719_v12 = vld [vmem:[#allocation95_spill] sm:$0xff] }
 0x17e   : > { %v1266_v16 = vadd.f32 %v1250_v55, %v1230_v34  ;;  %5715 = vst [vmem:[#allocation102_spill] sm:$0xff] %v4329_v4  ;;  %v4331_v9 = vsel %vm692_vm3, %v625_v48, 0.0  ;;  %v4340_v44 = vmul.f32 %v3095_v57, %v4207_v1  ;;  %v771_v10 = vrot.slane %v4329_v4, 6 }
 0x17f   : > { %v4336_v59 = vadd.f32 %v5716_v23, %v1444_v28  ;;  %v1267_v25 = vadd.f32 %v1251_v3, %v1231_v6  ;;  %v4346_v55 = vmul.f32 %v3138_v18, %v4207_v1  ;;  %v4350_v42 = vmul.f32 %v3176_v49, %v4207_v1  ;;  %v5721_v23 = vld [vmem:[#allocation9_spill] sm:$0xff]  ;;  %v5723_v6 = vld [vmem:[#allocation12_spill] sm:$0xff] }
 0x180   : > { %5718 = vst [vmem:[#allocation54_spill] sm:$0xff] %v4340_v44  ;;  %v1302_v46 = vadd.f32 %v5719_v12, %v1266_v16  ;;  %v847_v34 = vmul.f32 %v5721_v23, %v3827_v15  ;;  %v1430_v48 = vmul.f32 %v3179_v50, %v4207_v1  ;;  %v5722_v28 = vld [vmem:[#allocation57_spill] sm:$0xff]  ;;  %v759_v32 = vrot.slane %v4331_v9, 6 }
 0x181   : > { %5717 = vst [vmem:[#allocation99_spill] sm:$0xff] %v4336_v59  ;;  %5720 = vst [vmem:[#allocation58_spill] sm:$0xff] %v4346_v55  ;;  %v1549_v3 = vmul.f32 %v5723_v6, %v5722_v28  ;;  %v848_v16 = vmul.f32 %v5721_v23, %v3821_v63  ;;  %v884_v41 = vmul.f32 %v3101_v62, %v3971_v8  ;;  %v5724_v59 = vld [vmem:[#allocation15_spill] sm:$0xff]  ;;  %v4380_v28 = vsel %vm1506_vm13, %v1499_v35, 0.0 }
 0x182   : > { %v1338_v12 = vadd.f32 %v3901_v14, %v1302_v46  ;;  %v899_v20 = vadd.f32 %v883_v13, %v847_v34  ;;  %v919_v15 = vmul.f32 %v3038_v36, %v4140_v22  ;;  %v1585_v0 = vmul.f32 %v5724_v59, %v3978_v17  ;;  %5725 = vst [vmem:[#allocation81_spill] sm:$0xff] %v4380_v28 }
 0x183   : > { %v784_v47 = vsel %vm774_vm4, %v759_v32, %v771_v10  ;;  %v796_v44 = vsel %vm774_vm4, %v771_v10, %v759_v32  ;;  %v920_v63 = vmul.f32 %v3038_v36, %v4117_v30  ;;  %v900_v34 = vadd.f32 %v884_v41, %v848_v16 }
 0x184   : > { %v1374_v14 = vadd.f32 %v4056_v38, %v1338_v12  ;;  %v827_v13 = vsel %vm799_vm8, %v796_v44, 0.0  ;;  %v1034_v5 = vrot.slane %v4329_v4, 7  ;;  %v4385_v32 = vmul.f32 %v3138_v18, %v4329_v4  ;;  %v5728_v44 = vld [vmem:[#allocation86_spill] sm:$0xff] }
 0x185   : > { %v935_v10 = vadd.f32 %v919_v15, %v899_v20  ;;  %v936_v38 = vadd.f32 %v920_v63, %v900_v34  ;;  %v991_v12 = vmul.f32 %v3083_v53, %v827_v13  ;;  %v992_v46 = vmul.f32 %v3083_v53, %v784_v47  ;;  %v5731_v34 = vld [vmem:[#allocation31_spill] sm:$0xff] }
 0x186   : > { %5726 = vst [vmem:[#allocation95_spill] sm:$0xff] %v4385_v32  ;;  %v1410_v55 = vadd.f32 %v5727_v33, %v1374_v14  ;;  %v1303_v41 = vadd.f32 %v5728_v44, %v1267_v25  ;;  %v4393_v35 = vmul.f32 %v3176_v49, %v4329_v4  ;;  %v1022_v1 = vrot.slane %v4331_v9, 7  ;;  %v5732_v44 = vld [vmem:[#allocation46_spill] sm:$0xff]  ;;  %v5733_v32 = vld [vmem:[#allocation107_spill] sm:$0xff] }
 0x187   : > { %v971_v16 = vadd.f32 %v4283_v2, %v935_v10  ;;  %v4399_v20 = vmul.f32 %v3179_v50, %v4329_v4  ;;  %v1475_v33 = vrot.slane %v4329_v4, 1  ;;  %v972_v15 = vadd.f32 %v4287_v19, %v936_v38 }
 0x188   : > { %5729 = vst [vmem:[#allocation12_spill] sm:$0xff] %v4393_v35  ;;  %v1446_v28 = vadd.f32 %v1430_v48, %v1410_v55  ;;  %v1047_v25 = vsel %vm1037_vm5, %v1022_v1, %v1034_v5  ;;  %v1059_v14 = vsel %vm1037_vm5, %v1034_v5, %v1022_v1  ;;  %v1108_v2 = vmul.f32 %v5706_v52, %v5731_v34 }
 0x189   : > { %5730 = vst [vmem:[#allocation15_spill] sm:$0xff] %v4399_v20  ;;  %v1007_v63 = vadd.f32 %v991_v12, %v971_v16  ;;  %v1008_v48 = vadd.f32 %v992_v46, %v972_v15  ;;  %v1109_v20 = vmul.f32 %v5706_v52, %v5732_v44  ;;  %v4413_v35 = vadd.f32 %v5733_v32, %v1303_v41  ;;  %v5736_v12 = vld [vmem:[#allocation114_spill] sm:$0xff]  ;;  %v5739_v46 = vld [vmem:[#allocation49_spill] sm:$0xff] }
 0x18a   : > { %v1565_v10 = vadd.f32 %v1549_v3, %v1446_v28  ;;  %v4416_v19 = vmul.f32 %v3038_v36, %v784_v47  ;;  %v5737_v16 = vld [vmem:[#allocation14_spill] sm:$0xff]  ;;  %v1088_v28 = vsel %vm1062_vm9, %v1059_v14, 0.0  ;;  %v4427_v34 = vmul.f32 %v3038_v36, %v827_v13 }
 0x18b   : > { %5734 = vst [vmem:[#allocation100_spill] sm:$0xff] %v4413_v35  ;;  %v1124_v38 = vadd.f32 %v1108_v2, %v1007_v63  ;;  %v1144_v1 = vmul.f32 %v5737_v16, %v5736_v12  ;;  %v1125_v3 = vadd.f32 %v1109_v20, %v1008_v48  ;;  %v1145_v15 = vmul.f32 %v5737_v16, %v5739_v46  ;;  %v5741_v63 = vld [vmem:[#allocation17_spill] sm:$0xff] }
 0x18c   : > { %5735 = vst [vmem:[#allocation86_spill] sm:$0xff] %v4416_v19  ;;  %v4420_v5 = vadd.f32 %v1585_v0, %v1565_v10  ;;  %5740 = vst [vmem:[#allocation46_spill] sm:$0xff] %v4427_v34  ;;  %v957_v32 = vmul.f32 %v3099_v61, %v827_v13  ;;  %v1180_v2 = vmul.f32 %v5741_v63, %v4185_v51  ;;  %v1463_v20 = vrot.slane %v4331_v9, 1 }
 0x18d   : > { %v1160_v41 = vadd.f32 %v1144_v1, %v1124_v38  ;;  %v958_v44 = vmul.f32 %v3099_v61, %v784_v47  ;;  %v1161_v0 = vadd.f32 %v1145_v15, %v1125_v3  ;;  %v1181_v10 = vmul.f32 %v5741_v63, %v4123_v24  ;;  %v5744_v3 = vld [vmem:[#allocation44_spill] sm:$0xff] }
 0x18e   : > { %5738 = vst [vmem:[#allocation31_spill] sm:$0xff] %v4420_v5  ;;  %v4437_v14 = vmul.f32 %v5741_v63, %v1088_v28  ;;  %v4440_v48 = vmul.f32 %v5741_v63, %v1047_v25  ;;  %v4443_v13 = vmul.f32 %v3086_v54, %v1088_v28  ;;  %v4447_v47 = vsel %vm1478_vm6, %v1463_v20, %v1475_v33 }
 0x18f   : > { %v1196_v55 = vadd.f32 %v1180_v2, %v1160_v41  ;;  %v1197_v38 = vadd.f32 %v1181_v10, %v1161_v0  ;;  %v1500_v1 = vsel %vm1478_vm6, %v1475_v33, %v1463_v20  ;;  %v640_v15 = vadd.f32 %v4315_v7, %v5744_v3  ;;  %v5749_v3 = vld [vmem:[#allocation27_spill] sm:$0xff] }
 0x190   : > { %5742 = vst [vmem:[#allocation107_spill] sm:$0xff] %v4437_v14  ;;  %5743 = vst [vmem:[#allocation114_spill] sm:$0xff] %v4440_v48  ;;  %v4454_v4 = vmul.f32 %v3086_v54, %v1047_v25  ;;  %v1252_v41 = vmul.f32 %v3121_v11, %v1088_v28  ;;  %vm668_vm7 = vcmp.le.s32.totalorder %v3010_v27, 10  ;;  %v1253_v0 = vmul.f32 %v3121_v11, %v1047_v25 }
 0x191   : > { %v1232_v35 = vadd.f32 %v4300_v31, %v1196_v55  ;;  %v1233_v2 = vadd.f32 %v4325_v21, %v1197_v38  ;;  %v1360_v10 = vmul.f32 %v3138_v18, %v4101_v45  ;;  %vm681_vm11 = vcmp.gt.s32.totalorder %v3013_v29, 10  ;;  %v5747_v55 = vld [vmem:[#allocation45_spill] sm:$0xff] }
 0x192   : > { %v4466_v20 = vmul.f32 %v3138_v18, %v4331_v9  ;;  %v4470_v31 = vmul.f32 %v3176_v49, %v4331_v9  ;;  %vm693_vm12 = vmand %vm668_vm7, %vm681_vm11  ;;  %v635_v21 = vadd.f32 %v4315_v7, %v5747_v55  ;;  %v885_v38 = vmul.f32 %v3101_v62, %v4140_v22 }
 0x193   : > { %v1268_v33 = vadd.f32 %v1252_v41, %v1232_v35  ;;  %v1269_v28 = vadd.f32 %v1253_v0, %v1233_v2  ;;  %v4474_v25 = vsel %vm693_vm12, %v640_v15, 0.0  ;;  %v886_v35 = vmul.f32 %v3101_v62, %v4117_v30  ;;  %v5750_v2 = vld [vmem:[#allocation106_spill] sm:$0xff] }
 0x194   : > { %5745 = vst [vmem:[#allocation14_spill] sm:$0xff] %v4466_v20  ;;  %5746 = vst [vmem:[#allocation49_spill] sm:$0xff] %v4470_v31  ;;  %v1432_v41 = vmul.f32 %v3179_v50, %v4331_v9  ;;  %v849_v5 = vmul.f32 %v5721_v23, %v3982_v58  ;;  %v850_v55 = vmul.f32 %v5721_v23, %v3971_v8  ;;  %v5751_v20 = vld [vmem:[#allocation78_spill] sm:$0xff]  ;;  %v772_v14 = vrot.slane %v4474_v25, 6 }
 0x195   : > { %5748 = vst [vmem:[#allocation17_spill] sm:$0xff] %v4474_v25  ;;  %v1304_v18 = vadd.f32 %v5749_v3, %v1268_v33  ;;  %v1305_v15 = vadd.f32 %v5750_v2, %v1269_v28  ;;  %v1551_v0 = vmul.f32 %v5723_v6, %v3978_v17  ;;  %v1587_v48 = vmul.f32 %v5724_v59, %v5751_v20  ;;  %v5752_v33 = vld [vmem:[#allocation53_spill] sm:$0xff]  ;;  %v5753_v58 = vld [vmem:[#allocation110_spill] sm:$0xff] }
 0x196   : > { %v4494_v31 = vsel %vm693_vm12, %v635_v21, 0.0  ;;  %v901_v19 = vadd.f32 %v885_v38, %v849_v5  ;;  %v902_v34 = vadd.f32 %v886_v35, %v850_v55  ;;  %v921_v28 = vmul.f32 %v3038_v36, %v4233_v37 }
 0x197   : > { %v1340_v3 = vadd.f32 %v5752_v33, %v1304_v18  ;;  %v1341_v30 = vadd.f32 %v5753_v58, %v1305_v15  ;;  %v760_v8 = vrot.slane %v4494_v31, 6  ;;  %v922_v2 = vmul.f32 %v3038_v36, %v4225_v60  ;;  %v5754_v18 = vld [vmem:[#allocation115_spill] sm:$0xff] }
 0x198   : > { %v1035_v22 = vrot.slane %v4474_v25, 7  ;;  %v1023_v21 = vrot.slane %v4494_v31, 7  ;;  %v937_v55 = vadd.f32 %v921_v28, %v901_v19  ;;  %v4515_v36 = vsel %vm1506_vm13, %v1500_v1, 0.0  ;;  %v5758_v1 = vld [vmem:[#allocation18_spill] sm:$0xff] }
 0x199   : > { %v1376_v17 = vadd.f32 %v1360_v10, %v1340_v3  ;;  %v4506_v5 = vadd.f32 %v5754_v18, %v1341_v30  ;;  %v785_v38 = vsel %vm774_vm4, %v760_v8, %v772_v14  ;;  %v797_v35 = vsel %vm774_vm4, %v772_v14, %v760_v8  ;;  %5756 = vst [vmem:[#allocation45_spill] sm:$0xff] %v4515_v36  ;;  %v5757_v30 = vld [vmem:[#allocation7_spill] sm:$0xff] }
 0x19a   : > { %v829_v10 = vsel %vm799_vm8, %v797_v35, 0.0  ;;  %v938_v33 = vadd.f32 %v922_v2, %v902_v34  ;;  %v4521_v3 = vmul.f32 %v5757_v30, %v4447_v47  ;;  %v973_v58 = vadd.f32 %v957_v32, %v937_v55 }
 0x19b   : > { %5755 = vst [vmem:[#allocation44_spill] sm:$0xff] %v4506_v5  ;;  %v1412_v15 = vadd.f32 %v4350_v42, %v1376_v17  ;;  %v993_v18 = vmul.f32 %v3083_v53, %v829_v10  ;;  %v994_v14 = vmul.f32 %v3083_v53, %v785_v38  ;;  %v1048_v17 = vsel %vm1037_vm5, %v1023_v21, %v1035_v22 }
 0x19c   : > { %v974_v8 = vadd.f32 %v958_v44, %v938_v33  ;;  %v1060_v42 = vsel %vm1037_vm5, %v1035_v22, %v1023_v21  ;;  %v4531_v34 = vmul.f32 %v5758_v1, %v4515_v36  ;;  %v4535_v28 = vmul.f32 %v5757_v30, %v4515_v36  ;;  %v5775_v36 = vld [vmem:[#allocation58_spill] sm:$0xff] }
 0x19d   : > { %v1448_v19 = vadd.f32 %v1432_v41, %v1412_v15  ;;  %v1009_v32 = vadd.f32 %v993_v18, %v973_v58  ;;  %v1110_v2 = vmul.f32 %v5706_v52, %v5736_v12  ;;  %v4541_v44 = vmul.f32 %v3176_v49, %v4474_v25 }
 0x19e   : > { %5759 = vst [vmem:[#allocation27_spill] sm:$0xff] %v4535_v28  ;;  %v1010_v35 = vadd.f32 %v994_v14, %v974_v8  ;;  %v1111_v22 = vmul.f32 %v5706_v52, %v5739_v46  ;;  %v4547_v21 = vmul.f32 %v3179_v50, %v4474_v25  ;;  %v1476_v55 = vrot.slane %v4474_v25, 1 }
 0x19f   : > { %v1567_v41 = vadd.f32 %v1551_v0, %v1448_v19  ;;  %v1126_v15 = vadd.f32 %v1110_v2, %v1009_v32  ;;  %v1146_v33 = vmul.f32 %v5737_v16, %v4185_v51  ;;  %v1147_v18 = vmul.f32 %v5737_v16, %v4123_v24 }
 0x1a0   : > { %v1127_v58 = vadd.f32 %v1111_v22, %v1010_v35  ;;  %v1090_v46 = vsel %vm1062_vm9, %v1060_v42, 0.0  ;;  %v1182_v19 = vmul.f32 %v5741_v63, %v4279_v56  ;;  %v1464_v8 = vrot.slane %v4494_v31, 1 }
 0x1a1   : > { %v4552_v12 = vadd.f32 %v1587_v48, %v1567_v41  ;;  %v1162_v14 = vadd.f32 %v1146_v33, %v1126_v15  ;;  %v960_v32 = vmul.f32 %v3099_v61, %v785_v38  ;;  %v1183_v48 = vmul.f32 %v5741_v63, %v4245_v43  ;;  %v5761_v41 = vld [vmem:[#allocation101_spill] sm:$0xff] }
 0x1a2   : > { %v1163_v2 = vadd.f32 %v1147_v18, %v1127_v58  ;;  %v5762_v35 = vrot.slane %v5761_v41, 1  ;;  %v5763_v22 = vrot.slane %v4101_v45, 1  ;;  %v959_v42 = vmul.f32 %v3099_v61, %v829_v10 }
 0x1a3   : > { %5760 = vst [vmem:[#allocation106_spill] sm:$0xff] %v4552_v12  ;;  %v1198_v15 = vadd.f32 %v1182_v19, %v1162_v14  ;;  %v4576_v33 = vsel %vm1478_vm6, %v1464_v8, %v1476_v55  ;;  %v1501_v38 = vsel %vm1478_vm6, %v1476_v55, %v1464_v8  ;;  %v4581_v63 = vmul.f32 %v3086_v54, %v1090_v46  ;;  %v5764_v14 = vld [vmem:[#allocation94_spill] sm:$0xff]  ;;  %v5780_v12 = vld [vmem:[#allocation12_spill] sm:$0xff] }
 0x1a4   : > { %v4571_v0 = vsel %vm1478_vm6, %v5763_v22, %v5762_v35  ;;  %v1199_v58 = vadd.f32 %v1183_v48, %v1163_v2  ;;  %v4584_v18 = vmul.f32 %v3086_v54, %v1048_v17  ;;  %v1254_v35 = vmul.f32 %v3121_v11, %v1090_v46  ;;  %v5766_v48 = vld [vmem:[#allocation52_spill] sm:$0xff] }
 0x1a5   : > { %v1234_v22 = vadd.f32 %v4443_v13, %v1198_v15  ;;  %v1255_v61 = vmul.f32 %v3121_v11, %v1048_v17  ;;  %v1326_v10 = vmul.f32 %v3095_v57, %v4101_v45  ;;  %v650_v19 = vadd.f32 %v4315_v7, %v5764_v14  ;;  %v5765_v57 = vld [vmem:[#allocation98_spill] sm:$0xff]  ;;  %v5770_v14 = vld [vmem:[#allocation48_spill] sm:$0xff] }
 0x1a6   : > { %v1235_v55 = vadd.f32 %v4454_v4, %v1199_v58  ;;  %v4596_v8 = vmul.f32 %v3176_v49, %v4494_v31  ;;  %v1434_v54 = vmul.f32 %v3179_v50, %v4494_v31  ;;  %vm669_vm15 = vcmp.le.s32.totalorder %v3010_v27, 11 }
 0x1a7   : > { %v1270_v13 = vadd.f32 %v1254_v35, %v1234_v22  ;;  %v1553_v17 = vmul.f32 %v5723_v6, %v5751_v20  ;;  %vm682_vm0 = vcmp.gt.s32.totalorder %v3013_v29, 11  ;;  %v645_v46 = vadd.f32 %v4315_v7, %v5765_v57  ;;  %v5769_v35 = vld [vmem:[#allocation56_spill] sm:$0xff] }
 0x1a8   : > { %v1271_v2 = vadd.f32 %v1255_v61, %v1235_v55  ;;  %v4608_v4 = vmul.f32 %v5758_v1, %v4304_v39  ;;  %vm694_vm2 = vmand %vm669_vm15, %vm682_vm0  ;;  %v887_v49 = vmul.f32 %v3101_v62, %v4233_v37  ;;  %v888_v27 = vmul.f32 %v3101_v62, %v4225_v60  ;;  %v5772_v37 = vld [vmem:[#allocation96_spill] sm:$0xff] }
 0x1a9   : > { %v1306_v15 = vadd.f32 %v5766_v48, %v1270_v13  ;;  %v1589_v29 = vmul.f32 %v5724_v59, %v4571_v0  ;;  %v4617_v58 = vsel %vm694_vm2, %v650_v19, 0.0  ;;  %v4619_v7 = vsel %vm694_vm2, %v645_v46, 0.0  ;;  %v5774_v46 = vld [vmem:[#allocation73_spill] sm:$0xff] }
 0x1aa   : > { %5767 = vst [vmem:[#allocation78_spill] sm:$0xff] %v4617_v58  ;;  %5768 = vst [vmem:[#allocation53_spill] sm:$0xff] %v4619_v7  ;;  %v1307_v22 = vadd.f32 %v5769_v35, %v1271_v2  ;;  %v773_v61 = vrot.slane %v4617_v58, 6  ;;  %v5771_v55 = vmov %v5721_v23  ;;  %v4629_v60 = vsel %vm1506_vm13, %v1501_v38, 0.0 }
 0x1ab   : > { %v851_v57 = vmul.f32 %v5771_v55, %v5770_v14  ;;  %v852_v23 = vmul.f32 %v5771_v55, %v5772_v37  ;;  %v1342_v62 = vadd.f32 %v1326_v10, %v1306_v15  ;;  %5773 = vst [vmem:[#allocation110_spill] sm:$0xff] %v4629_v60  ;;  %v1036_v19 = vrot.slane %v4617_v58, 7  ;;  %v5776_v15 = vld [vmem:[#allocation103_spill] sm:$0xff] }
 0x1ac   : > { %v761_v13 = vrot.slane %v4619_v7, 6  ;;  %v1343_v48 = vadd.f32 %v5774_v46, %v1307_v22  ;;  %v1024_v28 = vrot.slane %v4619_v7, 7  ;;  %v4638_v55 = vmul.f32 %v5757_v30, %v4576_v33  ;;  %v5778_v22 = vld [vmem:[#allocation86_spill] sm:$0xff] }
 0x1ad   : > { %v903_v2 = vadd.f32 %v887_v49, %v851_v57  ;;  %v904_v35 = vadd.f32 %v888_v27, %v852_v23  ;;  %v1378_v14 = vadd.f32 %v5775_v36, %v1342_v62  ;;  %v5777_v23 = vld [vmem:[#allocation46_spill] sm:$0xff]  ;;  %v5779_v36 = vld [vmem:[#allocation49_spill] sm:$0xff] }
 0x1ae   : > { %v786_v38 = vsel %vm774_vm4, %v761_v13, %v773_v61  ;;  %v798_v10 = vsel %vm774_vm4, %v773_v61, %v761_v13  ;;  %v1379_v37 = vadd.f32 %v5776_v15, %v1343_v48  ;;  %v1049_v5 = vsel %vm1037_vm5, %v1024_v28, %v1036_v19 }
 0x1af   : > { %v831_v49 = vsel %vm799_vm8, %v798_v10, 0.0  ;;  %v939_v27 = vadd.f32 %v5777_v23, %v903_v2  ;;  %v940_v57 = vadd.f32 %v5778_v22, %v904_v35  ;;  %v1414_v62 = vadd.f32 %v5779_v36, %v1378_v14  ;;  %v4660_v2 = vld [vmem:[%s5505_s3 + $0x10] sm:$0xff]  ;;  %v2004_v36 = vld [vmem:[%s5414_s5 + $0x18] sm:$0xff] }
 0x1b0   : > { %v995_v46 = vmul.f32 %v3083_v53, %v831_v49  ;;  %v996_v25 = vmul.f32 %v3083_v53, %v786_v38  ;;  %v1415_v61 = vadd.f32 %v5780_v12, %v1379_v37  ;;  %v1061_v10 = vsel %vm1037_vm5, %v1036_v19, %v1024_v28  ;;  %v5781_v35 = vld [vmem:[#allocation11_spill] sm:$0xff] }
 0x1b1   : > { %v975_v13 = vadd.f32 %v959_v42, %v939_v27  ;;  %v976_v48 = vadd.f32 %v960_v32, %v940_v57  ;;  %v1450_v15 = vadd.f32 %v1434_v54, %v1414_v62  ;;  %v4664_v14 = vrot.slane %v4660_v2, %v5781_v35 }
 0x1b2   : > { %v1477_v53 = vrot.slane %v4617_v58, 1  ;;  %v1112_v12 = vmul.f32 %v5706_v52, %v4185_v51  ;;  %v4670_v32 = vadd.f32 %v4547_v21, %v1415_v61  ;;  %v1113_v54 = vmul.f32 %v5706_v52, %v4123_v24 }
 0x1b3   : > { %v1011_v42 = vadd.f32 %v995_v46, %v975_v13  ;;  %v1012_v28 = vadd.f32 %v996_v25, %v976_v48  ;;  %v1569_v19 = vadd.f32 %v1553_v17, %v1450_v15  ;;  %v4676_v38 = vmul.f32 %v5757_v30, %v4629_v60  ;;  %v5783_v48 = vld [vmem:[#allocation107_spill] sm:$0xff]  ;;  %v5784_v15 = vld [vmem:[#allocation114_spill] sm:$0xff] }
 0x1b4   : > { %5782 = vst [vmem:[#allocation115_spill] sm:$0xff] %v4670_v32  ;;  %v1092_v37 = vsel %vm1062_vm9, %v1061_v10, 0.0  ;;  %v1148_v49 = vmul.f32 %v5737_v16, %v4279_v56  ;;  %v1149_v21 = vmul.f32 %v5737_v16, %v4245_v43  ;;  %v1465_v25 = vrot.slane %v4619_v7, 1  ;;  %v2001_v56 = vld [vmem:[%s5414_s5] sm:$0xff]  ;;  %v5822_v60 = vld [vmem:[#allocation66_spill] sm:$0xff] }
 0x1b5   : > { %v1128_v51 = vadd.f32 %v1112_v12, %v1011_v42  ;;  %v1129_v23 = vadd.f32 %v1113_v54, %v1012_v28  ;;  %v1605_v27 = vadd.f32 %v1589_v29, %v1569_v19  ;;  %v1697_v24 = vmul.f32 %v4664_v14, %v4576_v33  ;;  %v2002_v33 = vld [vmem:[%s5414_s5 + $0x8] sm:$0xff]  ;;  %v2003_v29 = vld [vmem:[%s5414_s5 + $0x10] sm:$0xff]  ;;  %v5858_v32 = vld [vmem:[#allocation113_spill] sm:$0xff] }
 0x1b6   : > { %v4690_v17 = vmul.f32 %v3179_v50, %v4617_v58  ;;  %v1490_v43 = vsel %vm1478_vm6, %v1465_v25, %v1477_v53  ;;  %v1502_v16 = vsel %vm1478_vm6, %v1477_v53, %v1465_v25  ;;  %v5493_v46 = vrot.slane %v4617_v58, 2  ;;  %v5785_v53 = vld [vmem:[#allocation6_spill] sm:$0xff] }
 0x1b7   : > { %v1164_v22 = vadd.f32 %v1148_v49, %v1128_v51  ;;  %v1165_v57 = vadd.f32 %v1149_v21, %v1129_v23  ;;  %v1641_v62 = vadd.f32 %v4608_v4, %v1605_v27  ;;  %v1256_v61 = vmul.f32 %v3121_v11, %v1092_v37  ;;  %v5786_v49 = vld [vmem:[#allocation32_spill] sm:$0xff]  ;;  %v5787_v51 = vld [vmem:[#allocation34_spill] sm:$0xff] }
 0x1b8   : > { %v1257_v13 = vmul.f32 %v3121_v11, %v1049_v5  ;;  %v1292_v12 = vmul.f32 %v5785_v53, %v4101_v45  ;;  %v1293_v42 = vmul.f32 %v5785_v53, %v5761_v41  ;;  %v5492_v4 = vrot.slane %v4619_v7, 2 }
 0x1b9   : > { %v1200_v10 = vadd.f32 %v5783_v48, %v1164_v22  ;;  %v1201_v35 = vadd.f32 %v5784_v15, %v1165_v57  ;;  %v1677_v28 = vadd.f32 %v4521_v3, %v1641_v62  ;;  %v2639_v54 = vpack.c.bf16 %v2002_v33, %v2001_v56  ;;  %v5789_v3 = vld [vmem:[#allocation8_spill] sm:$0xff]  ;;  %v5792_v22 = vld [vmem:[#allocation74_spill] sm:$0xff] }
 0x1ba   : > { %v2643_v19 = vpack.c.bf16 %v2004_v36, %v2003_v29  ;;  %v1436_v5 = vmul.f32 %v3179_v50, %v4619_v7  ;;  %v1593_v23 = vadd.f32 %v5787_v51, %v5786_v49  ;;  %v1555_v25 = vmul.f32 %v5723_v6, %v4571_v0  ;;  %v5793_v36 = vld [vmem:[#allocation30_spill] sm:$0xff]  ;;  %v5802_v51 = vld [vmem:[#allocation81_spill] sm:$0xff] }
 0x1bb   : > { %v1236_v37 = vadd.f32 %v4581_v63, %v1200_v10  ;;  %v1237_v11 = vadd.f32 %v4584_v18, %v1201_v35  ;;  %v4726_v21 = vadd.f32 %v1697_v24, %v1677_v28  ;;  %v1556_v27 = vmul.f32 %v5723_v6, %v5789_v3  ;;  %2640 = vmatprep.subr.bf16.mxu1 %v2639_v54  ;;  %v5791_v24 = vld [vmem:[#allocation63_spill] sm:$0xff]  ;;  %v5795_v48 = vld [vmem:[#allocation38_spill] sm:$0xff]  ;;  %v5799_v35 = vld [vmem:[#allocation64_spill] sm:$0xff] }
 0x1bc   : > { %v4738_v63 = vsel %vm1741_vm10, %v5493_v46, %v5492_v4  ;;  %2642 = vmatpush3.bf16.msra.mxu1 %v2639_v54  ;;  %v1629_v56 = vadd.f32 %v5791_v24, %v1593_v23  ;;  %v1649_v57 = vmul.f32 %v5757_v30, %v5792_v22  ;;  %v1536_v33 = vsel %vm1506_vm13, %v1502_v16, 0.0  ;;  %v5809_v4 = vld [vmem:[#allocation5_spill] sm:$0xff]  ;;  %v5811_v46 = vld [vmem:[#allocation62_spill] sm:$0xff] }
 0x1bd   : > { %5788 = vst [vmem:[#allocation7_spill] sm:$0xff] %v4726_v21  ;;  %5790 = vst [vmem:[#allocation18_spill] sm:$0xff] %v4738_v63  ;;  %v1272_v50 = vadd.f32 %v1256_v61, %v1236_v37  ;;  %v1273_v18 = vadd.f32 %v1257_v13, %v1237_v11  ;;  %v1591_v29 = vmul.f32 %v5724_v59, %v4304_v39  ;;  %2644 = vmatprep.subr.bf16.mxu1 %v2643_v19  ;;  %v5797_v13 = vld [vmem:[#allocation51_spill] sm:$0xff]  ;;  %v5801_v11 = vld [vmem:[#allocation57_spill] sm:$0xff]  ;;  %vm2012_vm4 = vcmask 261120  }
 0x1be   : > { %v5794_v62 = vrot.slane %v5793_v36, 2  ;;  %v5796_v10 = vrot.slane %v5795_v48, 2  ;;  %v5798_v15 = vrot.slane %v5797_v13, 2  ;;  %v5800_v53 = vrot.slane %v5799_v35, 2  ;;  %v5803_v36 = vld [vmem:[#allocation89_spill] sm:$0xff]  ;;  %v5804_v48 = vld [vmem:[#allocation80_spill] sm:$0xff] }
 0x1bf   : > { %v1308_v16 = vadd.f32 %v1292_v12, %v1272_v50  ;;  %v1309_v54 = vadd.f32 %v1293_v42, %v1273_v18  ;;  %v1665_v37 = vadd.f32 %v1649_v57, %v1629_v56  ;;  %v1685_v49 = vmul.f32 %v4664_v14, %v5801_v11  ;;  %v5805_v13 = vld [vmem:[#allocation54_spill] sm:$0xff]  ;;  %v5807_v42 = vld [vmem:[#allocation29_spill] sm:$0xff]  ;;  %v5808_v50 = vld [vmem:[#allocation71_spill] sm:$0xff] }
 0x1c0   : > { %v4753_v61 = vsel %vm1741_vm10, %v5796_v10, %v5794_v62  ;;  %v4761_v28 = vsel %vm1741_vm10, %v5800_v53, %v5798_v15  ;;  %v1592_v23 = vmul.f32 %v5724_v59, %v5802_v51  ;;  %v1627_v24 = vmul.f32 %v5758_v1, %v4447_v47  ;;  %v5806_v15 = vld [vmem:[#allocation59_spill] sm:$0xff]  ;;  %2646 = vmatpush3.bf16.msra.mxu1 %v2643_v19 }
 0x1c1   : > { %v1721_v62 = vrot.slane %v5803_v36, 2  ;;  %v1733_v10 = vrot.slane %v5804_v48, 2  ;;  %v1344_v35 = vadd.f32 %v5805_v13, %v1308_v16  ;;  %v1345_v53 = vadd.f32 %v5806_v15, %v1309_v54  ;;  %v5810_v48 = vld [vmem:[#allocation93_spill] sm:$0xff]  ;;  %v5812_v13 = vld [vmem:[#allocation14_spill] sm:$0xff]  ;;  %v5813_v19 = vld [vmem:[#allocation95_spill] sm:$0xff] }
 0x1c2   : > { %v1701_v12 = vadd.f32 %v1685_v49, %v1665_v37  ;;  %v1403_v18 = vadd.f32 %v5808_v50, %v5807_v42  ;;  %v4776_v56 = vmul.f32 %v4664_v14, %v1490_v43  ;;  %v4779_v57 = vmul.f32 %v4664_v14, %v1536_v33  ;;  %v5814_v49 = vld [vmem:[#allocation24_spill] sm:$0xff]  ;;  %v5815_v42 = vld [vmem:[#allocation91_spill] sm:$0xff] }
 0x1c3   : > { %v4783_v36 = vrot.slane %v4660_v2, %v5809_v4  ;;  %v1595_v16 = vadd.f32 %v5811_v46, %v5810_v48  ;;  %v1380_v54 = vadd.f32 %v5812_v13, %v1344_v35  ;;  %v1381_v37 = vadd.f32 %v5813_v19, %v1345_v53  ;;  %v5816_v33 = vld [vmem:[#allocation19_spill] sm:$0xff]  ;;  %v4804_v35 = vld [vmem:[%s5505_s3 + $0x18] ss:$0 sm:$0xff] }
 0x1c4   : > { %v1818_v15 = vadd.f32 %v5814_v49, %v1701_v12  ;;  %v1439_v50 = vadd.f32 %v5815_v42, %v1403_v18  ;;  %v4793_v43 = vsel %vm1741_vm10, %v1721_v62, %v1733_v10  ;;  %v1874_v52 = vmul.f32 %v5816_v33, %v4753_v61  ;;  %v5817_v53 = vld [vmem:[#allocation40_spill] sm:$0xff]  ;;  %v5818_v18 = vld [vmem:[#allocation23_spill] sm:$0xff] }
 0x1c5   : > { %v1615_v2 = vmul.f32 %v5758_v1, %v5792_v22  ;;  %v1416_v46 = vadd.f32 %v4596_v8, %v1380_v54  ;;  %v1417_v4 = vadd.f32 %v4541_v44, %v1381_v37  ;;  %v1758_v13 = vsel %vm1741_vm10, %v1733_v10, %v1721_v62  ;;  %v5819_v49 = vld [vmem:[#allocation36_spill] sm:$0xff]  ;;  %v5821_v10 = vld [vmem:[#allocation22_spill] sm:$0xff] }
 0x1c6   : > { %v1854_v12 = vadd.f32 %v5817_v53, %v1818_v15  ;;  %v1558_v48 = vadd.f32 %v5818_v18, %v1439_v50  ;;  %v1910_v19 = vmul.f32 %v4783_v36, %v4761_v28  ;;  %v1651_v8 = vmul.f32 %v5757_v30, %v5801_v11  ;;  %v5820_v50 = vld [vmem:[#allocation105_spill] sm:$0xff] }
 0x1c7   : > { %v1631_v22 = vadd.f32 %v1615_v2, %v1595_v16  ;;  %v1452_v44 = vadd.f32 %v1436_v5, %v1416_v46  ;;  %v1453_v54 = vadd.f32 %v4690_v17, %v1417_v4  ;;  %v1946_v15 = vmul.f32 %v4804_v35, %v4793_v43  ;;  %v5823_v46 = vld [vmem:[#allocation104_spill] sm:$0xff] }
 0x1c8   : > { %v1890_v37 = vadd.f32 %v1874_v52, %v1854_v12  ;;  %v1594_v42 = vadd.f32 %v5819_v49, %v1558_v48  ;;  %v1686_v53 = vmul.f32 %v4664_v14, %v5820_v50  ;;  %v1687_v18 = vmul.f32 %v4664_v14, %v5821_v10  ;;  %v4826_v52 = vld [vmem:[%s5413_s4] ss:$0 sm:$0xff]  ;;  %v5824_v12 = vld [vmem:[#allocation92_spill] sm:$0xff]  ;;  %v5825_v49 = vld [vmem:[#allocation55_spill] sm:$0xff] }
 0x1c9   : > { %v1667_v62 = vadd.f32 %v1651_v8, %v1631_v22  ;;  %v1571_v16 = vadd.f32 %v1555_v25, %v1452_v44  ;;  %v1572_v2 = vadd.f32 %v1556_v27, %v1453_v54  ;;  %v1722_v4 = vrot.slane %v5823_v46, 2  ;;  %v5826_v22 = vld [vmem:[#allocation26_spill] sm:$0xff]  ;;  %v5827_v27 = vld [vmem:[#allocation85_spill] sm:$0xff] }
 0x1ca   : > { %v1926_v63 = vadd.f32 %v1910_v19, %v1890_v37  ;;  %v1630_v5 = vadd.f32 %v5822_v60, %v1594_v42  ;;  %v1734_v48 = vrot.slane %v5824_v12, 2  ;;  %v1297_v8 = vadd.f32 %v5826_v22, %v5825_v49  ;;  %v5828_v44 = vld [vmem:[#allocation37_spill] sm:$0xff]  ;;  %v5829_v37 = vld [vmem:[#allocation16_spill] sm:$0xff] }
 0x1cb   : > { %v1703_v17 = vadd.f32 %v1687_v18, %v1667_v62  ;;  %v1607_v7 = vadd.f32 %v1591_v29, %v1571_v16  ;;  %v1608_v58 = vadd.f32 %v1592_v23, %v1572_v2  ;;  %v4835_v60 = vsel %vm1767_vm14, %v1758_v13, 0.0  ;;  %v5830_v62 = vld [vmem:[#allocation43_spill] sm:$0xff]  ;;  %v5831_v16 = vld [vmem:[#allocation70_spill] sm:$0xff] }
 0x1cc   : > { %v1962_v25 = vadd.f32 %v1946_v15, %v1926_v63  ;;  %v1666_v19 = vadd.f32 %v5827_v27, %v1630_v5  ;;  %v1840_v42 = vmul.f32 %v5829_v37, %v4753_v61  ;;  %v1333_v18 = vadd.f32 %v5830_v62, %v1297_v8  ;;  %v5834_v8 = vld [vmem:[#allocation90_spill] sm:$0xff]  ;;  %v5837_v27 = vld [vmem:[#allocation41_spill] sm:$0xff] }
 0x1cd   : > { %v1820_v54 = vadd.f32 %v5828_v44, %v1703_v17  ;;  %v1643_v46 = vadd.f32 %v1627_v24, %v1607_v7  ;;  %v1644_v12 = vadd.f32 %v4531_v34, %v1608_v58  ;;  %v4845_v63 = vsel %vm1741_vm10, %v1722_v4, %v1734_v48  ;;  %v5832_v34 = vld [vmem:[#allocation25_spill] sm:$0xff]  ;;  %v5833_v7 = vld [vmem:[#allocation84_spill] sm:$0xff] }
 0x1ce   : > { %v1985_v29 = vadd.f32 %v4826_v52, %v1962_v25  ;;  %v1702_v23 = vadd.f32 %v1686_v53, %v1666_v19  ;;  %v1876_v13 = vmul.f32 %v5816_v33, %v4761_v28  ;;  %v1369_v2 = vadd.f32 %v5831_v16, %v1333_v18  ;;  %v5839_v18 = vld [vmem:[#allocation28_spill] sm:$0xff] }
 0x1cf   : > { %v1856_v15 = vadd.f32 %v1840_v42, %v1820_v54  ;;  %v1679_v5 = vadd.f32 %v4638_v55, %v1643_v46  ;;  %v1680_v17 = vadd.f32 %v4676_v38, %v1644_v12  ;;  %v1911_v24 = vmul.f32 %v4783_v36, %v5833_v7  ;;  %v5838_v42 = vld [vmem:[#allocation21_spill] sm:$0xff]  ;;  %v5840_v12 = vld [vmem:[#allocation75_spill] sm:$0xff] }
 0x1d0   : > { %2615 = vmatprep.mubr.msk.f32.mxu1 %vm2012_vm4, %v1985_v29  ;;  %v1819_v58 = vadd.f32 %v5832_v34, %v1702_v23  ;;  %v1947_v53 = vmul.f32 %v4804_v35, %v4835_v60  ;;  %v1912_v22 = vmul.f32 %v4783_v36, %v4793_v43  ;;  %v1405_v25 = vadd.f32 %v5834_v8, %v1369_v2  ;;  %v5841_v29 = vld [vmem:[#allocation83_spill] sm:$0xff] }
 0x1d1   : > { %v1892_v49 = vadd.f32 %v1876_v13, %v1856_v15  ;;  %v4862_v55 = vadd.f32 %v4776_v56, %v1679_v5  ;;  %v4865_v38 = vadd.f32 %v4779_v57, %v1680_v17  ;;  %v1948_v44 = vmul.f32 %v4804_v35, %v4845_v63  ;;  %v5842_v23 = vld [vmem:[#allocation67_spill] sm:$0xff]  ;;  %v5843_v57 = vld [vmem:[#allocation77_spill] sm:$0xff] }
 0x1d2   : > { %v1855_v19 = vadd.f32 %v5837_v27, %v1819_v58  ;;  %v1441_v62 = vadd.f32 %v5838_v42, %v1405_v25  ;;  %v4874_v46 = vsel %vm1506_vm13, %v5839_v18, 0.0  ;;  %v1597_v56 = vadd.f32 %v5841_v29, %v5840_v12  ;;  %v5844_v17 = vld [vmem:[#allocation35_spill] sm:$0xff]  ;;  %v5845_v58 = vld [vmem:[#allocation50_spill] sm:$0xff]  ;;  %v5847_v18 = vld [vmem:[#allocation65_spill] sm:$0xff] }
 0x1d3   : > { %5835 = vst [vmem:[#allocation101_spill] sm:$0xff] %v4862_v55  ;;  %5836 = vst [vmem:[#allocation94_spill] sm:$0xff] %v4865_v38  ;;  %v1928_v54 = vadd.f32 %v1912_v22, %v1892_v49  ;;  %v1616_v13 = vmul.f32 %v5758_v1, %v5843_v57  ;;  %v1759_v16 = vsel %vm1741_vm10, %v1734_v48, %v1722_v4  ;;  %v1723_v49 = vrot.slane %v5845_v58, 2  ;;  %v5846_v22 = vld [vmem:[#allocation20_spill] sm:$0xff] }
 0x1d4   : > { %v1891_v15 = vadd.f32 %v5842_v23, %v1855_v19  ;;  %v1617_v2 = vmul.f32 %v5758_v1, %v5801_v11  ;;  %v1560_v34 = vadd.f32 %v5844_v17, %v1441_v62  ;;  %v1735_v8 = vrot.slane %v5846_v22, 2  ;;  %v5848_v62 = vld [vmem:[#allocation60_spill] sm:$0xff]  ;;  %v5850_v17 = vld [vmem:[#allocation42_spill] sm:$0xff] }
 0x1d5   : > { %v1964_v5 = vadd.f32 %v1948_v44, %v1928_v54  ;;  %v1652_v27 = vmul.f32 %v5757_v30, %v5820_v50  ;;  %v1653_v42 = vmul.f32 %v5757_v30, %v5821_v10  ;;  %v1688_v48 = vmul.f32 %v4664_v14, %v4874_v46 }
 0x1d6   : > { %v1927_v25 = vadd.f32 %v1911_v24, %v1891_v15  ;;  %v1633_v19 = vadd.f32 %v1617_v2, %v1597_v56  ;;  %v1596_v4 = vadd.f32 %v5847_v18, %v1560_v34  ;;  %v4897_v44 = vsel %vm1767_vm14, %v1759_v16, 0.0  ;;  %v5849_v16 = vld [vmem:[#allocation33_spill] sm:$0xff] }
 0x1d7   : > { %v4901_v54 = vsel %vm1741_vm10, %v1723_v49, %v1735_v8  ;;  %v1841_v12 = vmul.f32 %v5829_v37, %v5848_v62  ;;  %v1689_v56 = vmul.f32 %v4664_v14, %v5751_v20  ;;  %v1987_v23 = vadd.f32 %v4826_v52, %v1964_v5 }
 0x1d8   : > { %v1963_v24 = vadd.f32 %v1947_v53, %v1927_v25  ;;  %v1669_v29 = vadd.f32 %v1653_v42, %v1633_v19  ;;  %v1632_v15 = vadd.f32 %v1616_v13, %v1596_v4  ;;  %v1877_v2 = vmul.f32 %v5816_v33, %v5833_v7  ;;  %v5851_v25 = vld [vmem:[#allocation13_spill] sm:$0xff] }
 0x1d9   : > { %v1299_v34 = vadd.f32 %v5850_v17, %v5849_v16  ;;  %v1913_v53 = vmul.f32 %v4783_v36, %v4835_v60  ;;  %v1806_v19 = vmul.f32 %v5851_v25, %v4753_v61  ;;  %v1949_v5 = vmul.f32 %v4804_v35, %v4897_v44  ;;  %v5852_v13 = vld [vmem:[#allocation69_spill] sm:$0xff] }
 0x1da   : > { %v1986_v58 = vadd.f32 %v4826_v52, %v1963_v24  ;;  %v1705_v22 = vadd.f32 %v1689_v56, %v1669_v29  ;;  %v1668_v42 = vadd.f32 %v1652_v27, %v1632_v15  ;;  %v1760_v4 = vsel %vm1741_vm10, %v1735_v8, %v1723_v49  ;;  %v5853_v15 = vld [vmem:[#allocation88_spill] sm:$0xff]  ;;  %v5854_v8 = vld [vmem:[#allocation79_spill] sm:$0xff] }
 0x1db   : > { %v1335_v18 = vadd.f32 %v5852_v13, %v1299_v34  ;;  %v1842_v24 = vmul.f32 %v5829_v37, %v4761_v28  ;;  %v1878_v29 = vmul.f32 %v5816_v33, %v4793_v43  ;;  %v1914_v61 = vmul.f32 %v4783_v36, %v4845_v63 }
 0x1dc   : > { %2616 = vmatmul.mubr.msk.f32.vlgmr.msra.gmra.mrb[4].mxu1 %vm2012_vm4, %v1986_v58  ;;  %v1822_v16 = vadd.f32 %v1806_v19, %v1705_v22  ;;  %v1704_v27 = vadd.f32 %v1688_v48, %v1668_v42  ;;  %v1950_v56 = vmul.f32 %v4804_v35, %v4901_v54  ;;  %v4936_v17 = vsel %vm1506_vm13, %v5854_v8, 0.0  ;;  %v5856_v42 = vld [vmem:[#allocation109_spill] sm:$0xff] }
 0x1dd   : > { %2618 = vmatprep.mubr.msk.f32.mxu1 %vm2012_vm4, %v1987_v23  ;;  %v1371_v49 = vadd.f32 %v5853_v15, %v1335_v18  ;;  %v1582_v58 = vmul.f32 %v5724_v59, %v5843_v57  ;;  %v1618_v22 = vmul.f32 %v5758_v1, %v5820_v50  ;;  %v1583_v48 = vmul.f32 %v5724_v59, %v5801_v11  ;;  %v5855_v23 = vld [vmem:[#allocation39_spill] sm:$0xff] }
 0x1de   : > { %v1858_v34 = vadd.f32 %v1842_v24, %v1822_v16  ;;  %v1821_v19 = vadd.f32 %v5855_v23, %v1704_v27  ;;  %v1654_v18 = vmul.f32 %v5757_v30, %v4874_v46  ;;  %v1619_v15 = vmul.f32 %v5758_v1, %v5821_v10  ;;  %v5857_v24 = vld [vmem:[#allocation99_spill] sm:$0xff] }
 0x1df   : > { %v1407_v13 = vadd.f32 %v5856_v42, %v1371_v49  ;;  %v1599_v8 = vadd.f32 %v1583_v48, %v5857_v24  ;;  %v1724_v57 = vrot.slane %v4101_v45, 2  ;;  %v1736_v38 = vrot.slane %v5761_v41, 2 }
 0x1e0   : > { %v1894_v16 = vadd.f32 %v1878_v29, %v1858_v34  ;;  %v1857_v55 = vadd.f32 %v1841_v12, %v1821_v19  ;;  %v1690_v27 = vmul.f32 %v4664_v14, %v4936_v17  ;;  %v4958_v49 = vsel %vm1767_vm14, %v1760_v4, 0.0  ;;  %v5859_v12 = vld [vmem:[#allocation61_spill] sm:$0xff]  ;;  %v5860_v19 = vld [vmem:[#allocation47_spill] sm:$0xff] }
 0x1e1   : > { %v1443_v11 = vadd.f32 %v5858_v32, %v1407_v13  ;;  %v1635_v42 = vadd.f32 %v1619_v15, %v1599_v8  ;;  %v1655_v10 = vmul.f32 %v5757_v30, %v5751_v20  ;;  %v4964_v45 = vsel %vm1741_vm10, %v1724_v57, %v1736_v38  ;;  %v5861_v13 = vld [vmem:[#allocation68_spill] sm:$0xff] }
 0x1e2   : > { %v1930_v23 = vadd.f32 %v1914_v61, %v1894_v16  ;;  %v1893_v41 = vadd.f32 %v1877_v2, %v1857_v55  ;;  %v1807_v32 = vmul.f32 %v5851_v25, %v5848_v62  ;;  %v1843_v34 = vmul.f32 %v5829_v37, %v5833_v7 }
 0x1e3   : > { %v1562_v29 = vadd.f32 %v5859_v12, %v1443_v11  ;;  %v1671_v48 = vadd.f32 %v1655_v10, %v1635_v42  ;;  %v1691_v61 = vmul.f32 %v4664_v14, %v4571_v0  ;;  %v1301_v15 = vadd.f32 %v5861_v13, %v5860_v19  ;;  %v5862_v11 = vld [vmem:[#allocation87_spill] sm:$0xff] }
 0x1e4   : > { %v1966_v4 = vadd.f32 %v1950_v56, %v1930_v23  ;;  %v1929_v16 = vadd.f32 %v1913_v53, %v1893_v41  ;;  %v1879_v55 = vmul.f32 %v5816_v33, %v4835_v60  ;;  %v1915_v2 = vmul.f32 %v4783_v36, %v4897_v44 }
 0x1e5   : > { %v1598_v24 = vadd.f32 %v1582_v58, %v1562_v29  ;;  %v1951_v62 = vmul.f32 %v4804_v35, %v4958_v49  ;;  %v1707_v8 = vadd.f32 %v1691_v61, %v1671_v48  ;;  %v1808_v56 = vmul.f32 %v5851_v25, %v4761_v28  ;;  %v5863_v48 = vld [vmem:[#allocation108_spill] sm:$0xff] }
 0x1e6   : > { %v1337_v23 = vadd.f32 %v5862_v11, %v1301_v15  ;;  %v1965_v42 = vadd.f32 %v1949_v5, %v1929_v16  ;;  %v1844_v53 = vmul.f32 %v5829_v37, %v4793_v43  ;;  %v1761_v58 = vsel %vm1741_vm10, %v1736_v38, %v1724_v57  ;;  %v5864_v15 = vld [vmem:[#allocation112_spill] sm:$0xff] }
 0x1e7   : > { %v1634_v10 = vadd.f32 %v1618_v22, %v1598_v24  ;;  %v1989_v41 = vadd.f32 %v4826_v52, %v1966_v4  ;;  %v1824_v12 = vadd.f32 %v1808_v56, %v1707_v8  ;;  %v1880_v29 = vmul.f32 %v5816_v33, %v4845_v63  ;;  %v5865_v8 = vld [vmem:[#allocation97_spill] sm:$0xff]  ;;  %v5867_v11 = vld [vmem:[#allocation76_spill] sm:$0xff] }
 0x1e8   : > { %v1373_v61 = vadd.f32 %v5863_v48, %v1337_v23  ;;  %v1988_v28 = vadd.f32 %v4826_v52, %v1965_v42  ;;  %v1916_v5 = vmul.f32 %v4783_v36, %v4901_v54  ;;  %v1952_v22 = vmul.f32 %v4804_v35, %v4964_v45 }
 0x1e9   : > { %v1670_v19 = vadd.f32 %v1654_v18, %v1634_v10  ;;  %v1860_v13 = vadd.f32 %v1844_v53, %v1824_v12  ;;  %v1584_v57 = vmul.f32 %v5724_v59, %v5820_v50  ;;  %v1621_v4 = vmul.f32 %v5758_v1, %v5751_v20  ;;  %v5869_v10 = vld [vmem:[#allocation117_spill] sm:$0xff] }
 0x1ea   : > { %v1409_v38 = vadd.f32 %v5864_v15, %v1373_v61  ;;  %2619 = vmatmul.mubr.msk.f32.gmra.mrb[6].mxu1 %vm2012_vm4, %v1988_v28  ;;  %v1620_v18 = vmul.f32 %v5758_v1, %v4874_v46  ;;  %v1656_v24 = vmul.f32 %v5757_v30, %v4936_v17  ;;  %v5866_v56 = vrot.slane %v5865_v8, 2 }
 0x1eb   : > { %v1706_v16 = vadd.f32 %v1690_v27, %v1670_v19  ;;  %v5868_v23 = vrot.slane %v5867_v11, 2  ;;  %2621 = vmatprep.mubr.msk.f32.mxu1 %vm2012_vm4, %v1989_v41  ;;  %v1896_v20 = vadd.f32 %v1880_v29, %v1860_v13  ;;  %v5870_v27 = vld [vmem:[#allocation31_spill] sm:$0xff]  ;;  %v1657_v48 = vmul.f32 %v5757_v30, %v4571_v0  ;;  %v5871_v29 = vld [vmem:[#allocation82_spill] sm:$0xff] }
 0x1ec   : > { %v1445_v53 = vadd.f32 %v5869_v10, %v1409_v38  ;;  %v1637_v12 = vadd.f32 %v1621_v4, %v5870_v27  ;;  %v1692_v28 = vmul.f32 %v4664_v14, %v5789_v3  ;;  %v5024_v19 = vsel %vm1767_vm14, %v1761_v58, 0.0  ;;  %v5873_v58 = vld [vmem:[#allocation111_spill] sm:$0xff] }
 0x1ed   : > { %v5013_v42 = vsel %vm1741_vm10, %v5868_v23, %v5866_v56  ;;  %v1823_v61 = vadd.f32 %v1807_v32, %v1706_v16  ;;  %v1809_v15 = vmul.f32 %v5851_v25, %v5833_v7  ;;  %v1932_v41 = vadd.f32 %v1916_v5, %v1896_v20  ;;  %v5872_v23 = vld [vmem:[#allocation100_spill] sm:$0xff] }
 0x1ee   : > { %v1564_v13 = vadd.f32 %v5871_v29, %v1445_v53  ;;  %v1673_v38 = vadd.f32 %v1657_v48, %v1637_v12  ;;  %v1693_v4 = vmul.f32 %v4664_v14, %v4304_v39  ;;  %v1845_v32 = vmul.f32 %v5829_v37, %v4835_v60  ;;  %v5874_v12 = vld [vmem:[#allocation116_spill] sm:$0xff] }
 0x1ef   : > { %v1859_v56 = vadd.f32 %v1843_v34, %v1823_v61  ;;  %v1881_v16 = vmul.f32 %v5816_v33, %v4897_v44  ;;  %v1375_v10 = vadd.f32 %v5873_v58, %v5872_v23  ;;  %v1968_v27 = vadd.f32 %v1952_v22, %v1932_v41 }
 0x1f0   : > { %v1600_v21 = vadd.f32 %v1584_v57, %v1564_v13  ;;  %v1709_v7 = vadd.f32 %v1693_v4, %v1673_v38  ;;  %v1810_v5 = vmul.f32 %v5851_v25, %v4793_v43  ;;  %v1917_v53 = vmul.f32 %v4783_v36, %v4958_v49  ;;  %v5877_v13 = vld [vmem:[#allocation72_spill] sm:$0xff] }
 0x1f1   : > { %v1895_v20 = vadd.f32 %v1879_v55, %v1859_v56  ;;  %v1953_v34 = vmul.f32 %v4804_v35, %v5024_v19  ;;  %v1411_v48 = vadd.f32 %v5874_v12, %v1375_v10  ;;  %v1846_v23 = vmul.f32 %v5829_v37, %v4845_v63 }
 0x1f2   : > { %v1636_v61 = vadd.f32 %v1620_v18, %v1600_v21  ;;  %v1826_v29 = vadd.f32 %v1810_v5, %v1709_v7  ;;  %v5875_v22 = vrot.slane %v5867_v11, 2  ;;  %v5876_v57 = vrot.slane %v5865_v8, 2 }
 0x1f3   : > { %v1931_v55 = vadd.f32 %v1915_v2, %v1895_v20  ;;  %v1882_v41 = vmul.f32 %v5816_v33, %v4901_v54  ;;  %v1447_v38 = vadd.f32 %v5877_v13, %v1411_v48  ;;  %v1550_v21 = vmul.f32 %v5723_v6, %v5820_v50  ;;  %v5878_v48 = vld [vmem:[#allocation102_spill] sm:$0xff] }
 0x1f4   : > { %v1762_v43 = vsel %vm1741_vm10, %v5876_v57, %v5875_v22  ;;  %v1672_v18 = vadd.f32 %v1656_v24, %v1636_v61  ;;  %v1862_v4 = vadd.f32 %v1846_v23, %v1826_v29  ;;  %v1918_v56 = vmul.f32 %v4783_v36, %v4964_v45  ;;  %v5881_v22 = vld [vmem:[#allocation106_spill] sm:$0xff] }
 0x1f5   : > { %v1954_v8 = vmul.f32 %v4804_v35, %v5013_v42  ;;  %v1967_v11 = vadd.f32 %v1951_v62, %v1931_v55  ;;  %v1566_v58 = vadd.f32 %v1550_v21, %v1447_v38  ;;  %v1586_v2 = vmul.f32 %v5724_v59, %v4874_v46 }
 0x1f6   : > { %v1622_v10 = vmul.f32 %v5758_v1, %v4936_v17  ;;  %v1991_v7 = vadd.f32 %v4826_v52, %v1968_v27  ;;  %v1708_v5 = vadd.f32 %v1692_v28, %v1672_v18  ;;  %v1898_v50 = vadd.f32 %v1882_v41, %v1862_v4 }
 0x1f7   : > { %v1623_v24 = vmul.f32 %v5758_v1, %v4571_v0  ;;  %v1990_v20 = vadd.f32 %v4826_v52, %v1967_v11  ;;  %v1602_v12 = vadd.f32 %v1586_v2, %v1566_v58  ;;  %v1658_v62 = vmul.f32 %v5757_v30, %v5789_v3  ;;  %v5883_v58 = vld [vmem:[#allocation10_spill] sm:$0xff] }
 0x1f8   : > { %v5879_v61 = vrot.slane %v5878_v48, 2  ;;  %v5880_v29 = vrot.slane %v4331_v9, 2  ;;  %v1825_v27 = vadd.f32 %v1809_v15, %v1708_v5  ;;  %v1934_v28 = vadd.f32 %v1918_v56, %v1898_v50  ;;  %v5884_v5 = vld [vmem:[#allocation15_spill] sm:$0xff] }
 0x1f9   : > { %v1639_v57 = vadd.f32 %v1623_v24, %v5881_v22  ;;  %v1659_v0 = vmul.f32 %v5757_v30, %v4304_v39  ;;  %2622 = vmatmul.mubr.msk.f32.gmra.mrb[8].mxu1 %vm2012_vm4, %v1990_v20  ;;  %v1638_v55 = vadd.f32 %v1622_v10, %v1602_v12  ;;  %v1694_v41 = vmul.f32 %v4664_v14, %v5802_v51 }
 0x1fa   : > { %v5077_v23 = vsel %vm1741_vm10, %v5880_v29, %v5879_v61  ;;  %v5087_v13 = vsel %vm1767_vm14, %v1762_v43, 0.0  ;;  %v1811_v38 = vmul.f32 %v5851_v25, %v4835_v60  ;;  %2624 = vmatprep.mubr.msk.f32.mxu1 %vm2012_vm4, %v1991_v7  ;;  %v1861_v15 = vadd.f32 %v1845_v32, %v1825_v27  ;;  %v5882_v43 = vld [vmem:[#allocation44_spill] sm:$0xff] }
 0x1fb   : > { %v1970_v21 = vadd.f32 %v1954_v8, %v1934_v28  ;;  %v1675_v18 = vadd.f32 %v1659_v0, %v1639_v57  ;;  %v1695_v39 = vmul.f32 %v4664_v14, %v4447_v47  ;;  %v1674_v4 = vadd.f32 %v1658_v62, %v1638_v55 }
 0x1fc   : > { %v1847_v56 = vmul.f32 %v5829_v37, %v4897_v44  ;;  %v1883_v11 = vmul.f32 %v5816_v33, %v4958_v49  ;;  %v1413_v2 = vadd.f32 %v5883_v58, %v5882_v43  ;;  %v1897_v10 = vadd.f32 %v1881_v16, %v1861_v15 }
 0x1fd   : > { %v1919_v60 = vmul.f32 %v4783_v36, %v5024_v19  ;;  %v1711_v32 = vadd.f32 %v1695_v39, %v1675_v18  ;;  %v1812_v8 = vmul.f32 %v5851_v25, %v4845_v63  ;;  %v1710_v7 = vadd.f32 %v1694_v41, %v1674_v4  ;;  %v5886_v41 = vld [vmem:[#allocation17_spill] sm:$0xff] }
 0x1fe   : > { %v1955_v47 = vmul.f32 %v4804_v35, %v5087_v13  ;;  %v1449_v50 = vadd.f32 %v5884_v5, %v1413_v2  ;;  %v1552_v24 = vmul.f32 %v5723_v6, %v4874_v46  ;;  %v1933_v20 = vadd.f32 %v1917_v53, %v1897_v10  ;;  %v5889_v2 = vld [vmem:[#allocation45_spill] sm:$0xff] }
 0x1ff   : > { %v1828_v12 = vadd.f32 %v1812_v8, %v1711_v32  ;;  %v1848_v16 = vmul.f32 %v5829_v37, %v4901_v54  ;;  %v5885_v62 = vmov %v5880_v29  ;;  %v1827_v29 = vadd.f32 %v1811_v38, %v1710_v7  ;;  %v5890_v8 = vld [vmem:[#allocation7_spill] sm:$0xff] }
 0x200   : > { %v1763_v63 = vsel %vm1741_vm10, %v5879_v61, %v5885_v62  ;;  %v1884_v27 = vmul.f32 %v5816_v33, %v4964_v45  ;;  %v1568_v28 = vadd.f32 %v1552_v24, %v1449_v50  ;;  %v1588_v46 = vmul.f32 %v5724_v59, %v4936_v17 }
 0x201   : > { %v1969_v53 = vadd.f32 %v1953_v34, %v1933_v20  ;;  %v1993_v22 = vadd.f32 %v4826_v52, %v1970_v21  ;;  %v1864_v57 = vadd.f32 %v1848_v16, %v1828_v12  ;;  %v1920_v9 = vmul.f32 %v4783_v36, %v5013_v42  ;;  %v5891_v16 = vld [vmem:[#allocation115_spill] sm:$0xff] }
 0x202   : > { %v1863_v0 = vadd.f32 %v1847_v56, %v1827_v29  ;;  %v1604_v48 = vadd.f32 %v1588_v46, %v1568_v28  ;;  %v1624_v55 = vmul.f32 %v5758_v1, %v5789_v3  ;;  %v5887_v38 = vrot.slane %v5886_v41, 2  ;;  %v5896_v41 = vld [vmem:[#allocation53_spill] sm:$0xff] }
 0x203   : > { %v5888_v15 = vrot.slane %v4494_v31, 2  ;;  %v1992_v34 = vadd.f32 %v4826_v52, %v1969_v53  ;;  %v1900_v21 = vadd.f32 %v1884_v27, %v1864_v57  ;;  %v1956_v39 = vmul.f32 %v4804_v35, %v5077_v23 }
 0x204   : > { %v1814_v4 = vmul.f32 %v5851_v25, %v4901_v54  ;;  %v1899_v56 = vadd.f32 %v1883_v11, %v1863_v0  ;;  %v1640_v43 = vadd.f32 %v1624_v55, %v1604_v48  ;;  %v1660_v58 = vmul.f32 %v5757_v30, %v5802_v51  ;;  %v5894_v48 = vld [vmem:[#allocation78_spill] sm:$0xff] }
 0x205   : > { %v5132_v18 = vsel %vm1741_vm10, %v5888_v15, %v5887_v38  ;;  %v1696_v10 = vmul.f32 %v4664_v14, %v5889_v2  ;;  %2625 = vmatmul.mubr.msk.f32.gmra.mrb[10].mxu1 %vm2012_vm4, %v1992_v34  ;;  %v1936_v32 = vadd.f32 %v1920_v9, %v1900_v21  ;;  %v1850_v5 = vmul.f32 %v5829_v37, %v4964_v45 }
 0x206   : > { %v1830_v7 = vadd.f32 %v1814_v4, %v5890_v8  ;;  %v1554_v50 = vmul.f32 %v5723_v6, %v4936_v17  ;;  %2627 = vmatprep.mubr.msk.f32.mxu1 %vm2012_vm4, %v1993_v22  ;;  %v1935_v54 = vadd.f32 %v1919_v60, %v1899_v56  ;;  %v1676_v11 = vadd.f32 %v1660_v58, %v1640_v43  ;;  %v5899_v56 = vld [vmem:[#allocation27_spill] sm:$0xff]  ;;  %v5900_v58 = vld [vmem:[#allocation101_spill] sm:$0xff] }
 0x207   : > { %v1886_v30 = vmul.f32 %v5816_v33, %v5013_v42  ;;  %v1590_v24 = vmul.f32 %v5724_v59, %v5789_v3  ;;  %v1972_v20 = vadd.f32 %v1956_v39, %v1936_v32  ;;  %v5892_v61 = vmov %v5888_v15 }
 0x208   : > { %v1866_v12 = vadd.f32 %v1850_v5, %v1830_v7  ;;  %v1570_v62 = vadd.f32 %v1554_v50, %v5891_v16  ;;  %v5893_v29 = vmov %v5887_v38  ;;  %v1971_v17 = vadd.f32 %v1955_v47, %v1935_v54 }
 0x209   : > { %v1764_v6 = vsel %vm1741_vm10, %v5893_v29, %v5892_v61  ;;  %v1712_v60 = vadd.f32 %v1696_v10, %v1676_v11  ;;  %v1813_v27 = vmul.f32 %v5851_v25, %v4897_v44  ;;  %v1922_v28 = vmul.f32 %v4783_v36, %v5077_v23  ;;  %v5901_v11 = vld [vmem:[#allocation94_spill] sm:$0xff] }
 0x20a   : > { %v1995_v59 = vadd.f32 %v4826_v52, %v1972_v20  ;;  %v1902_v3 = vadd.f32 %v1886_v30, %v1866_v12  ;;  %v1606_v46 = vadd.f32 %v1590_v24, %v1570_v62  ;;  %v1626_v31 = vmul.f32 %v5758_v1, %v5802_v51  ;;  %v5898_v51 = vld [vmem:[#allocation110_spill] sm:$0xff] }
 0x20b   : > { %v1994_v53 = vadd.f32 %v4826_v52, %v1971_v17  ;;  %v1793_v22 = vsel %vm1767_vm14, %v1763_v63, 0.0  ;;  %v1829_v47 = vadd.f32 %v1813_v27, %v1712_v60  ;;  %v1849_v57 = vmul.f32 %v5829_v37, %v4958_v49  ;;  %v5902_v17 = vld [vmem:[#allocation18_spill] sm:$0xff] }
 0x20c   : > { %v1938_v44 = vadd.f32 %v1922_v28, %v1902_v3  ;;  %v1958_v9 = vmul.f32 %v4804_v35, %v5132_v18  ;;  %v1642_v0 = vadd.f32 %v1626_v31, %v1606_v46  ;;  %v5895_v55 = vrot.slane %v5894_v48, 2 }
 0x20d   : > { %v5897_v38 = vrot.slane %v5896_v41, 2  ;;  %v1698_v15 = vmul.f32 %v4664_v14, %v5898_v51  ;;  %2628 = vmatmul.mubr.msk.f32.gmra.mrb[12].mxu1 %vm2012_vm4, %v1994_v53  ;;  %v1865_v63 = vadd.f32 %v1849_v57, %v1829_v47  ;;  %v1885_v34 = vmul.f32 %v5816_v33, %v5024_v19 }
 0x20e   : > { %v1816_v21 = vmul.f32 %v5851_v25, %v4964_v45  ;;  %2630 = vmatprep.mubr.msk.f32.mxu1 %vm2012_vm4, %v1995_v59  ;;  %v1921_v39 = vmul.f32 %v4783_v36, %v5087_v13  ;;  %v1957_v26 = vmul.f32 %v4804_v35, %v1793_v22  ;;  %v1974_v4 = vadd.f32 %v1958_v9, %v1938_v44 }
 0x20f   : > { %v1753_v1 = vsel %vm1741_vm10, %v5897_v38, %v5895_v55  ;;  %v1678_v43 = vadd.f32 %v5899_v56, %v1642_v0  ;;  %v1901_v14 = vadd.f32 %v1885_v34, %v1865_v63  ;;  %v1852_v10 = vmul.f32 %v5829_v37, %v5013_v42 }
 0x210   : > { %v1832_v2 = vadd.f32 %v1816_v21, %v5900_v58  ;;  %v1817_v32 = vmul.f32 %v5851_v25, %v5024_v19  ;;  %v1795_v8 = vsel %vm1767_vm14, %v1764_v6, 0.0  ;;  %v1815_v7 = vmul.f32 %v5851_v25, %v4958_v49 }
 0x211   : > { %v1714_v45 = vadd.f32 %v1698_v15, %v1678_v43  ;;  %v1888_v5 = vmul.f32 %v5816_v33, %v5077_v23  ;;  %v1937_v50 = vadd.f32 %v1921_v39, %v1901_v14  ;;  %v1853_v42 = vmul.f32 %v5829_v37, %v5087_v13 }
 0x212   : > { %v1868_v54 = vadd.f32 %v1852_v10, %v1832_v2  ;;  %v1833_v30 = vadd.f32 %v1817_v32, %v5901_v11  ;;  %v1851_v20 = vmul.f32 %v5829_v37, %v5024_v19  ;;  %v1887_v12 = vmul.f32 %v5816_v33, %v5087_v13 }
 0x213   : > { %v1831_v24 = vadd.f32 %v1815_v7, %v1714_v45  ;;  %v1924_v25 = vmul.f32 %v4783_v36, %v5132_v18  ;;  %v1973_v49 = vadd.f32 %v1957_v26, %v1937_v50  ;;  %v1889_v62 = vmul.f32 %v5816_v33, %v1793_v22 }
 0x214   : > { %v1904_v16 = vadd.f32 %v1888_v5, %v1868_v54  ;;  %v1869_v23 = vadd.f32 %v1853_v42, %v1833_v30  ;;  %v1997_v61 = vadd.f32 %v4826_v52, %v1974_v4  ;;  %v1960_v6 = vmul.f32 %v4804_v35, %v1753_v1 }
 0x215   : > { %v1867_v29 = vadd.f32 %v1851_v20, %v1831_v24  ;;  %v1797_v37 = vsel %vm1767_vm14, %v5902_v17, 0.0  ;;  %v1996_v19 = vadd.f32 %v4826_v52, %v1973_v49  ;;  %v1925_v18 = vmul.f32 %v4783_v36, %v1795_v8 }
 0x216   : > { %v1940_v13 = vadd.f32 %v1924_v25, %v1904_v16  ;;  %v1905_v60 = vadd.f32 %v1889_v62, %v1869_v23  ;;  %v1923_v28 = vmul.f32 %v4783_v36, %v1793_v22  ;;  %v1961_v3 = vmul.f32 %v4804_v35, %v1797_v37 }
 0x217   : > { %v1903_v27 = vadd.f32 %v1887_v12, %v1867_v29  ;;  %2631 = vmatmul.mubr.msk.f32.gmra.mrb[14].mxu1 %vm2012_vm4, %v1996_v19  ;;  %v1959_v46 = vmul.f32 %v4804_v35, %v1795_v8  ;;  %v5238_v35 = vld [vmem:[%s5415_s6] ss:$0 sm:$0xff] }
 0x218   : > { %v1976_v33 = vadd.f32 %v1960_v6, %v1940_v13  ;;  %v1941_v59 = vadd.f32 %v1925_v18, %v1905_v60  ;;  %2633 = vmatprep.mubr.msk.f32.mxu1 %vm2012_vm4, %v1997_v61 }
 0x219   : > { %v1939_v40 = vadd.f32 %v1923_v28, %v1903_v27 }
 0x21a   : > { %v1977_v31 = vadd.f32 %v1961_v3, %v1941_v59  ;;  %v1999_v57 = vadd.f32 %v4826_v52, %v1976_v33 }
 0x21b   : > { %v1975_v53 = vadd.f32 %v1959_v46, %v1939_v40 }
 0x21c   : > { %v2000_v36 = vadd.f32 %v4826_v52, %v1977_v31 }
 0x21d   : > { %v1998_v47 = vadd.f32 %v4826_v52, %v1975_v53 }
 0x21f   : > { %2634 = vmatmul.mubr.msk.f32.gmra.mrb[16].mxu1 %vm2012_vm4, %v1998_v47 }
 0x220   : > { %2636 = vmatprep.mubr.msk.f32.mxu1 %vm2012_vm4, %v1999_v57 }
 0x223   : > { %2637 = vmatmul.mubr.msk.f32.gmra.mrb[18].mxu1 %vm2012_vm4, %v2000_v36 }
 0x2af   : > { %v2617_v22 = vpop.f32.mrb[4].mxu1 }
 0x2b0   : > { %v2133_v44 = vadd.f32 %v2617_v22, %v5238_v35  ;;  %v2127_v9 = vpop.f32.mrb[5].mxu1 }
 0x2b1   : > { %v2128_v0 = vadd.f32 %v5238_v35, %v2127_v9 }
 0x2b2   : > { %2207 = vst.msk [vmem:[%s5242_s24 + $0x8] sm:$0xff] %vm2012_vm4, %v2133_v44  ;;  %2240 = vrot.lane.b32.xlu0 %v2133_v44, %s2823_s25 }
 0x2b3   : > { %2206 = vst.msk [vmem:[%s5242_s24] sm:$0xff] %vm2012_vm4, %v2128_v0 }
 0x2b6   : > { %2238 = vrot.lane.b32.xlu0 %v2128_v0, %s2823_s25 }
 0x2bd   : > { %v2620_v52 = vpop.f32.mrb[6].mxu1 }
 0x2be   : > { %v2143_v48 = vadd.f32 %v2620_v52, %v5238_v35  ;;  %v2137_v55 = vpop.f32.mrb[7].mxu1 }
 0x2bf   : > { %v2138_v41 = vadd.f32 %v5238_v35, %v2137_v55 }
 0x2c0   : > { %2209 = vst.msk [vmem:[%s5242_s24 + $0x18] sm:$0xff] %vm2012_vm4, %v2143_v48  ;;  %2244 = vrot.lane.b32.xlu1 %v2143_v48, %s2823_s25 }
 0x2c1   : > { %2208 = vst.msk [vmem:[%s5242_s24 + $0x10] sm:$0xff] %vm2012_vm4, %v2138_v41 }
 0x2c4   : > { %2242 = vrot.lane.b32.xlu1 %v2138_v41, %s2823_s25 }
 0x2cc   : > { %v2623_v38 = vpop.f32.mrb[8].mxu1 }
 0x2cd   : > { %v2153_v1 = vadd.f32 %v2623_v38, %v5238_v35  ;;  %v2147_v51 = vpop.f32.mrb[9].mxu1 }
 0x2ce   : > { %v2148_v15 = vadd.f32 %v5238_v35, %v2147_v51 }
 0x2cf   : > { %2211 = vst.msk [vmem:[%s5242_s24 + $0x28] sm:$0xff] %vm2012_vm4, %v2153_v1  ;;  %2248 = vrot.lane.b32.xlu1 %v2153_v1, %s2823_s25 }
 0x2d0   : > { %2210 = vst.msk [vmem:[%s5242_s24 + $0x20] sm:$0xff] %vm2012_vm4, %v2148_v15  ;;  %2246 = vrot.lane.b32.xlu0 %v2148_v15, %s2823_s25 }
 0x2d8   : > { %v2626_v63 = vpop.f32.mrb[10].mxu1 }
 0x2d9   : > { %v2163_v34 = vadd.f32 %v2626_v63, %v5238_v35  ;;  %v2157_v21 = vpop.f32.mrb[11].mxu1 }
 0x2da   : > { %v2158_v39 = vadd.f32 %v5238_v35, %v2157_v21 }
 0x2db   : > { %2213 = vst.msk [vmem:[%s5242_s24 + $0x38] sm:$0xff] %vm2012_vm4, %v2163_v34  ;;  %2252 = vrot.lane.b32.xlu1 %v2163_v34, %s2823_s25 }
 0x2dc   : > { %2212 = vst.msk [vmem:[%s5242_s24 + $0x30] sm:$0xff] %vm2012_vm4, %v2158_v39  ;;  %2250 = vrot.lane.b32.xlu0 %v2158_v39, %s2823_s25 }
 0x2e0   : > { %v2629_v26 = vpop.f32.mrb[12].mxu1 }
 0x2e1   : > { %v2173_v4 = vadd.f32 %v2629_v26, %v5238_v35  ;;  %v2167_v56 = vpop.f32.mrb[13].mxu1 }
 0x2e2   : > { %v2168_v43 = vadd.f32 %v5238_v35, %v2167_v56 }
 0x2e3   : > { %2215 = vst.msk [vmem:[%s5242_s24 + $0x48] sm:$0xff] %vm2012_vm4, %v2173_v4  ;;  %2256 = vrot.lane.b32.xlu1 %v2173_v4, %s2823_s25 }
 0x2e4   : > { %2214 = vst.msk [vmem:[%s5242_s24 + $0x40] sm:$0xff] %vm2012_vm4, %v2168_v43  ;;  %2254 = vrot.lane.b32.xlu0 %v2168_v43, %s2823_s25 }
 0x2ea   : > { %v2632_v14 = vpop.f32.mrb[14].mxu1 }
 0x2eb   : > { %v2183_v58 = vadd.f32 %v2632_v14, %v5238_v35  ;;  %v2177_v2 = vpop.f32.mrb[15].mxu1 }
 0x2ec   : > { %v2178_v10 = vadd.f32 %v5238_v35, %v2177_v2 }
 0x2ed   : > { %2217 = vst.msk [vmem:[%s5242_s24 + $0x58] sm:$0xff] %vm2012_vm4, %v2183_v58  ;;  %2260 = vrot.lane.b32.xlu1 %v2183_v58, %s2823_s25 }
 0x2ee   : > { %2216 = vst.msk [vmem:[%s5242_s24 + $0x50] sm:$0xff] %vm2012_vm4, %v2178_v10  ;;  %2258 = vrot.lane.b32.xlu0 %v2178_v10, %s2823_s25 }
 0x2f2   : > { %v2635_v32 = vpop.f32.mrb[16].mxu1 }
 0x2f3   : > { %v2193_v45 = vadd.f32 %v2635_v32, %v5238_v35  ;;  %v2187_v8 = vpop.f32.mrb[17].mxu1 }
 0x2f4   : > { %v2188_v7 = vadd.f32 %v5238_v35, %v2187_v8 }
 0x2f5   : > { %2219 = vst.msk [vmem:[%s5242_s24 + $0x68] sm:$0xff] %vm2012_vm4, %v2193_v45  ;;  %2264 = vrot.lane.b32.xlu1 %v2193_v45, %s2823_s25 }
 0x2f6   : > { %2218 = vst.msk [vmem:[%s5242_s24 + $0x60] sm:$0xff] %vm2012_vm4, %v2188_v7  ;;  %v2638_v5 = vpop.f32.mrb[18].mxu1  ;;  %2262 = vrot.lane.b32.xlu0 %v2188_v7, %s2823_s25 }
 0x2f7   : > { %v2203_v50 = vadd.f32 %v2638_v5, %v5238_v35  ;;  %v2197_v54 = vpop.f32.mrb[19].mxu1 }
 0x2f8   : > { %v2198_v11 = vadd.f32 %v5238_v35, %v2197_v54 }
 0x2f9   : > { %2221 = vst.msk [vmem:[%s5242_s24 + $0x78] sm:$0xff] %vm2012_vm4, %v2203_v50  ;;  %2268 = vrot.lane.b32.xlu1 %v2203_v50, %s2823_s25 }
 0x2fa   : > { %2220 = vst.msk [vmem:[%s5242_s24 + $0x70] sm:$0xff] %vm2012_vm4, %v2198_v11  ;;  %2266 = vrot.lane.b32.xlu0 %v2198_v11, %s2823_s25 }
 0x2fb   : > { %2740 = shalt.err (!%p2737_p10)
}
 0x2fc   : > { %s2741_s17 = scalar_lea.hbm %s5305_s14, 2048  ;;  %s2745_s9 = scalar_lea.hbm %s5416_s7, 8192 }
 0x2fd   : > { %p2742_p11 = scmp.ne.s32.totalorder %s5305_s14, %s2741_s17  ;;  %p2746_p0 = scmp.lt.u32.totalorder %s5305_s14, %s5416_s7 }
 0x2fe   : > { %p2747_p1 = scmp.lt.u32.totalorder %s2745_s9, %s2741_s17  ;;  %p2749_p4 = scmp.lt.u32.totalorder %s2741_s17, %s5305_s14 }
 0x2ff   : > { %p2743_p12 = pnand %p2742_p11, %p2923_p3 }
 0x300   : > { %p2748_p2 = por %p2747_p1, %p2746_p0 }
 0x301   : > { %p2744_p13 = pneg %p2743_p12 }
 0x302   : > { %p2750_p5 = por %p2749_p4, %p2748_p2 }
 0x304   : > { %p2751_p6 = pnand %p2750_p5, %p2744_p13 }
 0x306   : > { %2754 = shalt.err (!%p2751_p6)
}
 0x307   : > { %s2825_s0 = smov 128   ;;  %s2826_s21 = smov 8  }
 0x308   : > { %2651 = dma.vmem_to_hbm [thread:$0]  (%p2923_p3), %s5307_s22, 2048, %s5305_s14, %s5318_s20, %s2825_s0, %s2825_s0, %s2826_s21  }
 0x309   : > { %s2467_s24 = sshll.u32 %s2805_s30, 3  ;;  %s2469_s25 = sshll.u32 %s2949_s26, 5 }
 0x30a   : > { %p351_p7 = scmp.lt.s32.totalorder %s2467_s24, 15 }
 0x30c   : > { %s5917_s24 = smov (!%p351_p7, %s2467_s24), 15 }
 0x30d   : > { %s2468_s1 = sshll.u32 %s5917_s24, 1 }
 0x30e   : > { %s355_s9 = sadd.s32 %s2469_s25, %s2468_s1 }
 0x30f   : > { %s2470_s17 = sshll.u32 %s355_s9, 3 }
 0x310   : > { %s5347_s3 = scalar_lea.vmem %s5417_s8, %s2470_s17 }
 0x324   : > { %v2241_v30 = vpop.permute.xlu0 %2240 }
 0x325   : > { %2287 = vst.msk [vmem:[%s5347_s3 + $0x8] sm:$0xff] %vm391_vm1, %v2241_v30 }
 0x328   : > { %v2239_v42 = vpop.permute.xlu0 %2238 }
 0x329   : > { %2286 = vst.msk [vmem:[%s5347_s3] sm:$0xff] %vm391_vm1, %v2239_v42 }
 0x332   : > { %v2245_v24 = vpop.permute.xlu1 %2244 }
 0x333   : > { %2289 = vst.msk [vmem:[%s5347_s3 + $0x18] sm:$0xff] %vm391_vm1, %v2245_v24 }
 0x336   : > { %v2243_v20 = vpop.permute.xlu1 %2242 }
 0x337   : > { %2288 = vst.msk [vmem:[%s5347_s3 + $0x10] sm:$0xff] %vm391_vm1, %v2243_v20 }
 0x341   : > { %v2249_v12 = vpop.permute.xlu1 %2248 }
 0x342   : > { %v2247_v25 = vpop.permute.xlu0 %2246  ;;  %2291 = vst.msk [vmem:[%s5347_s3 + $0x28] sm:$0xff] %vm391_vm1, %v2249_v12 }
 0x343   : > { %2290 = vst.msk [vmem:[%s5347_s3 + $0x20] sm:$0xff] %vm391_vm1, %v2247_v25 }
 0x34d   : > { %v2253_v49 = vpop.permute.xlu1 %2252 }
 0x34e   : > { %v2251_v16 = vpop.permute.xlu0 %2250  ;;  %2293 = vst.msk [vmem:[%s5347_s3 + $0x38] sm:$0xff] %vm391_vm1, %v2253_v49 }
 0x34f   : > { %2292 = vst.msk [vmem:[%s5347_s3 + $0x30] sm:$0xff] %vm391_vm1, %v2251_v16 }
 0x355   : > { %v2257_v23 = vpop.permute.xlu1 %2256 }
 0x356   : > { %v2255_v62 = vpop.permute.xlu0 %2254  ;;  %2295 = vst.msk [vmem:[%s5347_s3 + $0x48] sm:$0xff] %vm391_vm1, %v2257_v23 }
 0x357   : > { %2294 = vst.msk [vmem:[%s5347_s3 + $0x40] sm:$0xff] %vm391_vm1, %v2255_v62 }
 0x35f   : > { %v2261_v61 = vpop.permute.xlu1 %2260 }
 0x360   : > { %v2259_v29 = vpop.permute.xlu0 %2258  ;;  %2297 = vst.msk [vmem:[%s5347_s3 + $0x58] sm:$0xff] %vm391_vm1, %v2261_v61 }
 0x361   : > { %2296 = vst.msk [vmem:[%s5347_s3 + $0x50] sm:$0xff] %vm391_vm1, %v2259_v29 }
 0x367   : > { %v2265_v6 = vpop.permute.xlu1 %2264 }
 0x368   : > { %v2263_v17 = vpop.permute.xlu0 %2262  ;;  %2299 = vst.msk [vmem:[%s5347_s3 + $0x68] sm:$0xff] %vm391_vm1, %v2265_v6 }
 0x369   : > { %2298 = vst.msk [vmem:[%s5347_s3 + $0x60] sm:$0xff] %vm391_vm1, %v2263_v17 }
 0x36b   : > { %v2269_v37 = vpop.permute.xlu1 %2268 }
 0x36c   : > { %v2267_v19 = vpop.permute.xlu0 %2266  ;;  %2301 = vst.msk [vmem:[%s5347_s3 + $0x78] sm:$0xff] %vm391_vm1, %v2269_v37 }
 0x36d   : > { %2300 = vst.msk [vmem:[%s5347_s3 + $0x70] sm:$0xff] %vm391_vm1, %v2267_v19 }
 0x36e PF: > { %p2657_p3 = scmp.ge.s32.totalorder %s2821_s12, 2  ;;  %s2348_s2 = sand.u32 1, %s2793_s27  }
 0x36f   : > { %s2349_s30 = scalar_lea.sflag [#allocation3], %s2348_s2 }
 0x370   : > { %p2654_p9 = pnand %p2657_p3, %p2932_p8 }
 0x372   : > { %2788 = dma.done.wait (!%p2654_p9), %s2349_s30, 2048  }
 0x373   : > { %2790 = vsyncadd (!%p2654_p9), %s2349_s30, 4294965248  ;;  %s22_s12 = sadd.s32 1, %s2821_s12   ;;  %s5903_s27 = smov %s2797_s28 }
 0x374   : > { %p19_p10 = scmp.ge.s32.totalorder %s22_s12, 6   ;;  %s5904_s28 = smov %s2801_s29 }
 0x375   : > { %s5905_s29 = smov %s2941_s23  ;;  %s5906_s30 = smov %s2813_s10 }
 0x376   : > { %s5907_s9 = smov %s2817_s11  ;;  %s5908_s10 = smov %s5911_s15 }
 0x377   : > { %s5909_s11 = smov %s5915_s16  ;;  %21 = sbr.rel (!%p19_p10) target bundleno = 10 (0xa), region = 95 }
 0x37e   :  { %2367 = vsyncpa [#allocation3], 1 }
 0x37f   :  { %2369 = vsyncpa [#allocation3 + $0x1], 1 }

</bundles_post_ra>
